<compile_context>
chip_gen: v5e
topology: v5e:2x2
jax: 0.10.0
libtpu: 0.0.40
codegen_flags: <defaults>
</compile_context>

<pallas_src>
import functools

import jax
import jax.numpy as jnp
from jax.experimental import pallas as pl
from jax.experimental.pallas import tpu as pltpu


def _round_up(x, m):
    return -(-x // m) * m


# ---------------------------------------------------------------------------
# Host-side constant builders (masks / selection matrices / packed weights)
# ---------------------------------------------------------------------------
def _conv_table(cin, c1, c2):
    cin_pad = _round_up(cin, 8)
    # (name, params key, true cin, padded cin, cout, kernel size)
    return [
        ("stem", "stem",     cin, cin_pad, c1, 3),
        ("s1c1", "s1_conv1", c1,  c1,      c1, 3),
        ("s1c2", "s1_conv2", c1,  c1,      c1, 3),
        ("s2c1", "s2_conv1", c1,  c1,      c2, 3),
        ("s2c2", "s2_conv2", c2,  c2,      c2, 3),
        ("s2dn", "s2_down",  c1,  c1,      c2, 1),
        ("dc1",  "d_conv1",  c2,  c2,      c1, 3),
        ("dc2",  "d_conv2",  c1,  c1,      c1, 3),
        ("dfin", "d_final",  c1,  c1,      1,  1),
    ]


def _pack_params(params, cin, ch_nums):
    """Pack all conv weights into one bf16 slab and all biases into one f32 slab.

    Weight rows per conv start at multiples of 16 (bf16 sublane tile); bias rows
    start at multiples of 8 (f32 sublane tile).  3x3 weights are stored as
    (Cout, 9*Cin_pad) with column index t*Cin_pad + cin (matching the in-kernel
    tap-stacked activation)."""
    table = _conv_table(cin, *ch_nums)
    kmax = max((9 if ks == 3 else 1) * cp for _, _, _, cp, _, ks in table)
    w_blocks, b_blocks, layout = [], [], {}
    w_off = b_off = 0
    for name, pkey, ci, cip, co, ks in table:
        w = params[pkey]["w"].astype(jnp.float32)
        b = params[pkey]["b"].astype(jnp.float32).reshape(co, 1)
        if ks == 3:
            k = 9 * cip
            wp = jnp.zeros((co, 9, cip), jnp.float32)
            wp = wp.at[:, :, :ci].set(jnp.transpose(w, (1, 0, 2)))
            wp = wp.reshape(co, k)
        else:
            k = cip
            wp = jnp.zeros((co, cip), jnp.float32).at[:, :ci].set(w)
        rw = _round_up(co, 16)
        rb = _round_up(co, 8)
        w_blocks.append(jnp.zeros((rw, kmax), jnp.float32).at[:co, :k].set(wp))
        b_blocks.append(jnp.zeros((rb, 1), jnp.float32).at[:co, :].set(b))
        layout[name] = (w_off, b_off, co, k)
        w_off += rw
        b_off += rb
    wslab = jnp.concatenate(w_blocks, axis=0).astype(jnp.bfloat16)
    bslab = jnp.concatenate(b_blocks, axis=0)
    return wslab, bslab, layout


def _tap_masks(h, w, spb, width):
    """(9, width) f32 per-tap validity for 'same' 3x3 conv; flat lane index
    p = n*h*w + r*w + c (spb samples folded into lanes)."""
    p = jnp.arange(width)
    valid = p < spb * h * w
    row = (p // w) % h
    col = p % w
    rows = []
    for t in range(9):
        dh, dw = t // 3 - 1, t % 3 - 1
        m = (valid & (row + dh >= 0) & (row + dh < h) &
             (col + dw >= 0) & (col + dw < w))
        rows.append(m)
    return jnp.stack(rows, axis=0).astype(jnp.float32)


def _down_matrix(H, W, spb, width2):
    """(spb*H*W, width2) bf16 0/1 matrix selecting even (row, col) pixels."""
    hw, h2, w2 = H * W, H // 2, W // 2
    hw2 = h2 * w2
    width = spb * hw
    q = jnp.arange(width2)
    n = q // hw2
    src = n * hw + 2 * ((q % hw2) // w2) * W + 2 * (q % w2)
    p = jnp.arange(width)[:, None]
    m = (q[None, :] < spb * hw2) & (p == src[None, :])
    return m.astype(jnp.bfloat16)


def _up_matrix(H, W, spb, width2):
    """(width2, spb*H*W) bf16 0/1 matrix: 2x nearest-neighbour upsample."""
    hw, h2, w2 = H * W, H // 2, W // 2
    hw2 = h2 * w2
    width = spb * hw
    p = jnp.arange(width)
    n = p // hw
    src = n * hw2 + (((p % hw) // W) // 2) * w2 + ((p % W) // 2)
    q = jnp.arange(width2)[:, None]
    return (q == src[None, :]).astype(jnp.bfloat16)


# ---------------------------------------------------------------------------
# In-kernel building blocks
# ---------------------------------------------------------------------------
def _conv3x3(x, w_ref, b_ref, masks, spec, w_dim, width):
    """'same' 3x3 conv as one MXU matmul on a tap-stacked activation.

    x     : (Cin_pad, width) f32 (padded channels are zero)
    masks : (9, width) f32 value (host-precomputed boundary validity)
    """
    w_off, b_off, cout, k = spec
    parts = []
    for t in range(9):                      # unrolled, static shifts
        dh, dw = t // 3 - 1, t % 3 - 1
        s = dh * w_dim + dw
        shifted = x if s == 0 else pltpu.roll(x, shift=(-s) % width, axis=1)
        parts.append(shifted * masks[t:t + 1, :])
    stacked = jnp.concatenate(parts, axis=0).astype(jnp.bfloat16)  # (k, width)
    w = w_ref[w_off:w_off + cout, 0:k]                              # bf16
    b = b_ref[b_off:b_off + cout, :]                                # f32
    return jnp.dot(w, stacked, preferred_element_type=jnp.float32) + b


def _conv1x1(x, w_ref, b_ref, spec):
    w_off, b_off, cout, k = spec
    w = w_ref[w_off:w_off + cout, 0:k]
    b = b_ref[b_off:b_off + cout, :]
    return jnp.dot(w, x.astype(jnp.bfloat16),
                   preferred_element_type=jnp.float32) + b


# ---------------------------------------------------------------------------
# The fused forward kernel: one grid step == samples_per_block batch elements
# folded into the lane dimension.
# ---------------------------------------------------------------------------
def _deep_ca_resnet_kernel(x_ref, w_ref, b_ref, mf_ref, mh_ref, dmat_ref,
                           umat_ref, o_ref, *, W, layout):
    width = x_ref.shape[-1]          # spb * H * W
    width2 = dmat_ref.shape[-1]      # padded spb * (H/2) * (W/2)
    W2 = W // 2

    mf = mf_ref[...]                 # (9, width)  f32
    mh = mh_ref[...]                 # (9, width2) f32
    dmat = dmat_ref[...]             # (width, width2)  bf16
    umat = umat_ref[...]             # (width2, width)  bf16
    relu = lambda v: jnp.maximum(v, 0.0)

    x = x_ref[...]                   # (Cin_pad, width) f32

    # ---- backbone ----
    x1 = relu(_conv3x3(x, w_ref, b_ref, mf, layout["stem"], W, width))

    # stage 1: BasicBlock(c1 -> c1), identity shortcut
    h = relu(_conv3x3(x1, w_ref, b_ref, mf, layout["s1c1"], W, width))
    h = _conv3x3(h, w_ref, b_ref, mf, layout["s1c2"], W, width)
    f1 = relu(h + x1)

    # stage 2: BasicBlock(c1 -> c2), stride 2, 1x1 projection shortcut.
    # stride-2 conv == stride-1 conv followed by even-pixel selection matmul.
    h = relu(_conv3x3(f1, w_ref, b_ref, mf, layout["s2c1"], W, width))
    h = jnp.dot(h.astype(jnp.bfloat16), dmat, preferred_element_type=jnp.float32)
    h = _conv3x3(h, w_ref, b_ref, mh, layout["s2c2"], W2, width2)
    sc = jnp.dot(f1.astype(jnp.bfloat16), dmat, preferred_element_type=jnp.float32)
    sc = _conv1x1(sc, w_ref, b_ref, layout["s2dn"])
    f2 = relu(h + sc)

    # ---- decoder: 2x nearest upsample + skip fusion ----
    d = jnp.dot(f2.astype(jnp.bfloat16), umat, preferred_element_type=jnp.float32)
    d = relu(_conv3x3(d, w_ref, b_ref, mf, layout["dc1"], W, width))
    d = relu(d + f1)
    d = relu(_conv3x3(d, w_ref, b_ref, mf, layout["dc2"], W, width))

    # ---- head: 1x1 conv + sigmoid (lane-dense (1, width) output) ----
    y = _conv1x1(d, w_ref, b_ref, layout["dfin"])
    o_ref[...] = jax.nn.sigmoid(y).astype(o_ref.dtype)


# ---------------------------------------------------------------------------
# Host-side wrapper
# ---------------------------------------------------------------------------
def deep_ca_resnet_forward(params, x_nchw, *, ch_nums=(8, 16),
                           samples_per_block=None):
    N, Cin, H, W = x_nchw.shape
    assert H % 2 == 0 and W % 2 == 0
    HW = H * W
    # Default: fold the whole batch into lanes (best on single-TC v5e/v6e).
    # On v7x with N >= 2, pass samples_per_block = N // 2 to use both cores.
    spb = N if samples_per_block is None else samples_per_block
    assert N % spb == 0
    nblk = N // spb
    width = spb * HW
    assert width % 128 == 0, "samples_per_block * H * W must be lane aligned"
    hw2 = (H // 2) * (W // 2)
    width2 = _round_up(spb * hw2, 128)
    cin_pad = _round_up(Cin, 8)
    c1, c2 = ch_nums

    # NCHW -> (nblk, Cin_pad, spb*HW): channels-first, batch folded into lanes.
    x = x_nchw.astype(jnp.float32).reshape(nblk, spb, Cin, HW)
    x = jnp.transpose(x, (0, 2, 1, 3)).reshape(nblk, Cin, width)
    if cin_pad != Cin:
        x = jnp.pad(x, ((0, 0), (0, cin_pad - Cin), (0, 0)))

    # Constant inputs (DMA'd once, reused by every grid step).
    wslab, bslab, layout = _pack_params(params, Cin, ch_nums)
    mf = _tap_masks(H, W, spb, width)
    mh = _tap_masks(H // 2, W // 2, spb, width2)
    dmat = _down_matrix(H, W, spb, width2)
    umat = _up_matrix(H, W, spb, width2)
    consts = (wslab, bslab, mf, mh, dmat, umat)

    # Advisory cost estimate so XLA can schedule around the custom call.
    conv_flops = 0
    for ci, co in [(cin_pad, c1), (c1, c1), (c1, c1), (c1, c2), (c2, c1), (c1, c1)]:
        conv_flops += 2 * co * 9 * ci * width          # full-res 3x3 convs
    conv_flops += 2 * c2 * 9 * c2 * width2             # half-res 3x3 conv
    conv_flops += 2 * c2 * c1 * width2                 # 1x1 shortcut
    conv_flops += 2 * 1 * c1 * width                   # final 1x1
    conv_flops += 2 * (c1 + c2) * width * width2       # stride-2 selections
    conv_flops += 2 * c2 * width2 * width              # nearest upsample
    bytes_acc = (x.size * 4 + nblk * width * 4 + wslab.size * 2 + bslab.size * 4
                 + (mf.size + mh.size) * 4 + (dmat.size + umat.size) * 2)
    cost = pl.CostEstimate(flops=int(nblk * conv_flops),
                           transcendentals=int(nblk * width),
                           bytes_accessed=int(bytes_acc))

    kernel = functools.partial(_deep_ca_resnet_kernel, W=W, layout=layout)
    const_specs = [pl.BlockSpec(a.shape, lambda g: (0, 0)) for a in consts]
    out = pl.pallas_call(
        kernel,
        out_shape=jax.ShapeDtypeStruct((nblk, 1, width), jnp.float32),
        grid=(nblk,),
        in_specs=[pl.BlockSpec((None, cin_pad, width), lambda g: (g, 0, 0))]
                 + const_specs,
        out_specs=pl.BlockSpec((None, 1, width), lambda g: (g, 0, 0)),
        compiler_params=pltpu.CompilerParams(
            dimension_semantics=("parallel",)),
        cost_estimate=cost,
    )(x, *consts)

    out = out.reshape(nblk, 1, spb, HW).transpose(0, 2, 1, 3)
    return out.reshape(N, 1, H, W)        # NCHW, PyTorch convention


# ---------------------------------------------------------------------------
# Parameters (deterministic init)
# ---------------------------------------------------------------------------
def _init_conv3x3(key, cin, cout):
    fan_in = 9 * cin
    w = jax.random.normal(key, (9, cout, cin), jnp.float32) * (2.0 / fan_in) ** 0.5
    return {"w": w, "b": jnp.zeros((cout, 1), jnp.float32)}


def _init_conv1x1(key, cin, cout):
    w = jax.random.normal(key, (cout, cin), jnp.float32) * (2.0 / cin) ** 0.5
    return {"w": w, "b": jnp.zeros((cout, 1), jnp.float32)}


def init_params(key, in_channels=4, ch_nums=(8, 16)):
    keys = jax.random.split(key, 9)
    c1, c2 = ch_nums
    return {
        "stem":     _init_conv3x3(keys[0], in_channels, c1),
        "s1_conv1": _init_conv3x3(keys[1], c1, c1),
        "s1_conv2": _init_conv3x3(keys[2], c1, c1),
        "s2_conv1": _init_conv3x3(keys[3], c1, c2),
        "s2_conv2": _init_conv3x3(keys[4], c2, c2),
        "s2_down":  _init_conv1x1(keys[5], c1, c2),
        "d_conv1":  _init_conv3x3(keys[6], c2, c1),
        "d_conv2":  _init_conv3x3(keys[7], c1, c1),
        "d_final":  _init_conv1x1(keys[8], c1, 1),
    }


# ---------------------------------------------------------------------------
if __name__ == "__main__":
    key = jax.random.PRNGKey(0)
    k_in, k_par = jax.random.split(key)
    x = jax.random.normal(k_in, (2, 4, 16, 16), jnp.float32)   # NCHW
    params = init_params(k_par, in_channels=4, ch_nums=(8, 16))

    fwd = jax.jit(deep_ca_resnet_forward)
    y = jax.block_until_ready(fwd(params, x))

    assert y.shape == (2, 1, 16, 16), y.shape
    assert bool(jnp.all((y >= 0.0) & (y <= 1.0)))   # sigmoid range
    assert bool(jnp.all(jnp.isfinite(y)))
    print("KERNEL_OK")
</pallas_src>

<mosaic_0001>
module attributes {stable_mosaic.version = 11 : i64} {
  func.func @_deep_ca_resnet_kernel(%arg0: i32, %arg1: memref<1x8x512xf32, #tpu.memory_space<vmem>>, %arg2: memref<144x144xbf16, #tpu.memory_space<vmem>>, %arg3: memref<96x1xf32, #tpu.memory_space<vmem>>, %arg4: memref<9x512xf32, #tpu.memory_space<vmem>>, %arg5: memref<9x128xf32, #tpu.memory_space<vmem>>, %arg6: memref<512x128xbf16, #tpu.memory_space<vmem>>, %arg7: memref<128x512xbf16, #tpu.memory_space<vmem>>, %arg8: memref<1x1x512xf32, #tpu.memory_space<vmem>>) attributes {dimension_semantics = [#tpu.dimension_semantics<parallel>], iteration_bounds = array<i64: 1>, scalar_prefetch = 0 : i64, scratch_operands = 0 : i64, tpu.core_type = #tpu.core_type<tc>, window_params = [{transform_indices = @transform_0, window_bounds = array<i64: 1, 8, 512>}, {pipeline_mode = #tpu.pipeline_mode<synchronous>, transform_indices = @transform_1, window_bounds = array<i64: 144, 144>}, {pipeline_mode = #tpu.pipeline_mode<synchronous>, transform_indices = @transform_2, window_bounds = array<i64: 96, 1>}, {pipeline_mode = #tpu.pipeline_mode<synchronous>, transform_indices = @transform_3, window_bounds = array<i64: 9, 512>}, {pipeline_mode = #tpu.pipeline_mode<synchronous>, transform_indices = @transform_4, window_bounds = array<i64: 9, 128>}, {pipeline_mode = #tpu.pipeline_mode<synchronous>, transform_indices = @transform_5, window_bounds = array<i64: 512, 128>}, {pipeline_mode = #tpu.pipeline_mode<synchronous>, transform_indices = @transform_6, window_bounds = array<i64: 128, 512>}, {transform_indices = @transform_7, window_bounds = array<i64: 1, 1, 512>}]} {
    %c0 = arith.constant 0 : index
    %c0_0 = arith.constant 0 : index
    %0 = vector.load %arg4[%c0, %c0_0] : memref<9x512xf32, #tpu.memory_space<vmem>>, vector<9x512xf32>
    %c0_1 = arith.constant 0 : index
    %c0_2 = arith.constant 0 : index
    %1 = vector.load %arg5[%c0_1, %c0_2] : memref<9x128xf32, #tpu.memory_space<vmem>>, vector<9x128xf32>
    %c0_3 = arith.constant 0 : index
    %c0_4 = arith.constant 0 : index
    %2 = vector.load %arg6[%c0_3, %c0_4] : memref<512x128xbf16, #tpu.memory_space<vmem>>, vector<512x128xbf16>
    %c0_5 = arith.constant 0 : index
    %c0_6 = arith.constant 0 : index
    %3 = vector.load %arg7[%c0_5, %c0_6] : memref<128x512xbf16, #tpu.memory_space<vmem>>, vector<128x512xbf16>
    %c0_7 = arith.constant 0 : index
    %c0_8 = arith.constant 0 : index
    %c0_9 = arith.constant 0 : index
    %4 = vector.load %arg1[%c0_7, %c0_8, %c0_9] : memref<1x8x512xf32, #tpu.memory_space<vmem>>, vector<1x8x512xf32>
    %5 = vector.shape_cast %4 : vector<1x8x512xf32> to vector<8x512xf32>
    %c17_i32 = arith.constant 17 : i32
    %6 = tpu.dynamic_rotate %5 by %c17_i32 dim 1 : vector<8x512xf32>, i32 -> vector<8x512xf32>
    %7 = vector.extract_strided_slice %0 {offsets = [0, 0], sizes = [1, 512], strides = [1, 1]} : vector<9x512xf32> to vector<1x512xf32>
    %8 = vector.broadcast %7 : vector<1x512xf32> to vector<8x512xf32>
    %9 = arith.mulf %6, %8 : vector<8x512xf32>
    %c16_i32 = arith.constant 16 : i32
    %10 = tpu.dynamic_rotate %5 by %c16_i32 dim 1 : vector<8x512xf32>, i32 -> vector<8x512xf32>
    %11 = vector.extract_strided_slice %0 {offsets = [1, 0], sizes = [1, 512], strides = [1, 1]} : vector<9x512xf32> to vector<1x512xf32>
    %12 = vector.broadcast %11 : vector<1x512xf32> to vector<8x512xf32>
    %13 = arith.mulf %10, %12 : vector<8x512xf32>
    %c15_i32 = arith.constant 15 : i32
    %14 = tpu.dynamic_rotate %5 by %c15_i32 dim 1 : vector<8x512xf32>, i32 -> vector<8x512xf32>
    %15 = vector.extract_strided_slice %0 {offsets = [2, 0], sizes = [1, 512], strides = [1, 1]} : vector<9x512xf32> to vector<1x512xf32>
    %16 = vector.broadcast %15 : vector<1x512xf32> to vector<8x512xf32>
    %17 = arith.mulf %14, %16 : vector<8x512xf32>
    %c1_i32 = arith.constant 1 : i32
    %18 = tpu.dynamic_rotate %5 by %c1_i32 dim 1 : vector<8x512xf32>, i32 -> vector<8x512xf32>
    %19 = vector.extract_strided_slice %0 {offsets = [3, 0], sizes = [1, 512], strides = [1, 1]} : vector<9x512xf32> to vector<1x512xf32>
    %20 = vector.broadcast %19 : vector<1x512xf32> to vector<8x512xf32>
    %21 = arith.mulf %18, %20 : vector<8x512xf32>
    %22 = vector.extract_strided_slice %0 {offsets = [4, 0], sizes = [1, 512], strides = [1, 1]} : vector<9x512xf32> to vector<1x512xf32>
    %23 = vector.broadcast %22 : vector<1x512xf32> to vector<8x512xf32>
    %24 = arith.mulf %5, %23 : vector<8x512xf32>
    %c511_i32 = arith.constant 511 : i32
    %25 = tpu.dynamic_rotate %5 by %c511_i32 dim 1 : vector<8x512xf32>, i32 -> vector<8x512xf32>
    %26 = vector.extract_strided_slice %0 {offsets = [5, 0], sizes = [1, 512], strides = [1, 1]} : vector<9x512xf32> to vector<1x512xf32>
    %27 = vector.broadcast %26 : vector<1x512xf32> to vector<8x512xf32>
    %28 = arith.mulf %25, %27 : vector<8x512xf32>
    %c497_i32 = arith.constant 497 : i32
    %29 = tpu.dynamic_rotate %5 by %c497_i32 dim 1 : vector<8x512xf32>, i32 -> vector<8x512xf32>
    %30 = vector.extract_strided_slice %0 {offsets = [6, 0], sizes = [1, 512], strides = [1, 1]} : vector<9x512xf32> to vector<1x512xf32>
    %31 = vector.broadcast %30 : vector<1x512xf32> to vector<8x512xf32>
    %32 = arith.mulf %29, %31 : vector<8x512xf32>
    %c496_i32 = arith.constant 496 : i32
    %33 = tpu.dynamic_rotate %5 by %c496_i32 dim 1 : vector<8x512xf32>, i32 -> vector<8x512xf32>
    %34 = vector.extract_strided_slice %0 {offsets = [7, 0], sizes = [1, 512], strides = [1, 1]} : vector<9x512xf32> to vector<1x512xf32>
    %35 = vector.broadcast %34 : vector<1x512xf32> to vector<8x512xf32>
    %36 = arith.mulf %33, %35 : vector<8x512xf32>
    %c495_i32 = arith.constant 495 : i32
    %37 = tpu.dynamic_rotate %5 by %c495_i32 dim 1 : vector<8x512xf32>, i32 -> vector<8x512xf32>
    %38 = vector.extract_strided_slice %0 {offsets = [8, 0], sizes = [1, 512], strides = [1, 1]} : vector<9x512xf32> to vector<1x512xf32>
    %39 = vector.broadcast %38 : vector<1x512xf32> to vector<8x512xf32>
    %40 = arith.mulf %37, %39 : vector<8x512xf32>
    %41 = tpu.concatenate %9, %13, %17, %21, %24, %28, %32, %36, %40 in 0 : vector<8x512xf32>, vector<8x512xf32>, vector<8x512xf32>, vector<8x512xf32>, vector<8x512xf32>, vector<8x512xf32>, vector<8x512xf32>, vector<8x512xf32>, vector<8x512xf32> -> vector<72x512xf32>
    %42 = arith.truncf %41 : vector<72x512xf32> to vector<72x512xbf16>
    %c0_10 = arith.constant 0 : index
    %c0_11 = arith.constant 0 : index
    %43 = vector.load %arg2[%c0_10, %c0_11] : memref<144x144xbf16, #tpu.memory_space<vmem>>, vector<8x72xbf16>
    %c0_12 = arith.constant 0 : index
    %c0_13 = arith.constant 0 : index
    %44 = vector.load %arg3[%c0_12, %c0_13] : memref<96x1xf32, #tpu.memory_space<vmem>>, vector<8x1xf32>
    %cst = arith.constant dense<0.000000e+00> : vector<8x512xf32>
    %45 = tpu.matmul %43, %42, %cst {dimension_numbers = #tpu.dot_dimension_numbers<[1], [0], [0], [1], [0, 0, 1, 1], [], []>} : vector<8x72xbf16>, vector<72x512xbf16>, vector<8x512xf32> -> vector<8x512xf32>
    %46 = vector.broadcast %44 : vector<8x1xf32> to vector<8x512xf32>
    %47 = arith.addf %45, %46 : vector<8x512xf32>
    %cst_14 = arith.constant 0.000000e+00 : f32
    %48 = vector.broadcast %cst_14 : f32 to vector<8x512xf32>
    %49 = arith.maximumf %47, %48 : vector<8x512xf32>
    %c17_i32_15 = arith.constant 17 : i32
    %50 = tpu.dynamic_rotate %49 by %c17_i32_15 dim 1 : vector<8x512xf32>, i32 -> vector<8x512xf32>
    %51 = vector.extract_strided_slice %0 {offsets = [0, 0], sizes = [1, 512], strides = [1, 1]} : vector<9x512xf32> to vector<1x512xf32>
    %52 = vector.broadcast %51 : vector<1x512xf32> to vector<8x512xf32>
    %53 = arith.mulf %50, %52 : vector<8x512xf32>
    %c16_i32_16 = arith.constant 16 : i32
    %54 = tpu.dynamic_rotate %49 by %c16_i32_16 dim 1 : vector<8x512xf32>, i32 -> vector<8x512xf32>
    %55 = vector.extract_strided_slice %0 {offsets = [1, 0], sizes = [1, 512], strides = [1, 1]} : vector<9x512xf32> to vector<1x512xf32>
    %56 = vector.broadcast %55 : vector<1x512xf32> to vector<8x512xf32>
    %57 = arith.mulf %54, %56 : vector<8x512xf32>
    %c15_i32_17 = arith.constant 15 : i32
    %58 = tpu.dynamic_rotate %49 by %c15_i32_17 dim 1 : vector<8x512xf32>, i32 -> vector<8x512xf32>
    %59 = vector.extract_strided_slice %0 {offsets = [2, 0], sizes = [1, 512], strides = [1, 1]} : vector<9x512xf32> to vector<1x512xf32>
    %60 = vector.broadcast %59 : vector<1x512xf32> to vector<8x512xf32>
    %61 = arith.mulf %58, %60 : vector<8x512xf32>
    %c1_i32_18 = arith.constant 1 : i32
    %62 = tpu.dynamic_rotate %49 by %c1_i32_18 dim 1 : vector<8x512xf32>, i32 -> vector<8x512xf32>
    %63 = vector.extract_strided_slice %0 {offsets = [3, 0], sizes = [1, 512], strides = [1, 1]} : vector<9x512xf32> to vector<1x512xf32>
    %64 = vector.broadcast %63 : vector<1x512xf32> to vector<8x512xf32>
    %65 = arith.mulf %62, %64 : vector<8x512xf32>
    %66 = vector.extract_strided_slice %0 {offsets = [4, 0], sizes = [1, 512], strides = [1, 1]} : vector<9x512xf32> to vector<1x512xf32>
    %67 = vector.broadcast %66 : vector<1x512xf32> to vector<8x512xf32>
    %68 = arith.mulf %49, %67 : vector<8x512xf32>
    %c511_i32_19 = arith.constant 511 : i32
    %69 = tpu.dynamic_rotate %49 by %c511_i32_19 dim 1 : vector<8x512xf32>, i32 -> vector<8x512xf32>
    %70 = vector.extract_strided_slice %0 {offsets = [5, 0], sizes = [1, 512], strides = [1, 1]} : vector<9x512xf32> to vector<1x512xf32>
    %71 = vector.broadcast %70 : vector<1x512xf32> to vector<8x512xf32>
    %72 = arith.mulf %69, %71 : vector<8x512xf32>
    %c497_i32_20 = arith.constant 497 : i32
    %73 = tpu.dynamic_rotate %49 by %c497_i32_20 dim 1 : vector<8x512xf32>, i32 -> vector<8x512xf32>
    %74 = vector.extract_strided_slice %0 {offsets = [6, 0], sizes = [1, 512], strides = [1, 1]} : vector<9x512xf32> to vector<1x512xf32>
    %75 = vector.broadcast %74 : vector<1x512xf32> to vector<8x512xf32>
    %76 = arith.mulf %73, %75 : vector<8x512xf32>
    %c496_i32_21 = arith.constant 496 : i32
    %77 = tpu.dynamic_rotate %49 by %c496_i32_21 dim 1 : vector<8x512xf32>, i32 -> vector<8x512xf32>
    %78 = vector.extract_strided_slice %0 {offsets = [7, 0], sizes = [1, 512], strides = [1, 1]} : vector<9x512xf32> to vector<1x512xf32>
    %79 = vector.broadcast %78 : vector<1x512xf32> to vector<8x512xf32>
    %80 = arith.mulf %77, %79 : vector<8x512xf32>
    %c495_i32_22 = arith.constant 495 : i32
    %81 = tpu.dynamic_rotate %49 by %c495_i32_22 dim 1 : vector<8x512xf32>, i32 -> vector<8x512xf32>
    %82 = vector.extract_strided_slice %0 {offsets = [8, 0], sizes = [1, 512], strides = [1, 1]} : vector<9x512xf32> to vector<1x512xf32>
    %83 = vector.broadcast %82 : vector<1x512xf32> to vector<8x512xf32>
    %84 = arith.mulf %81, %83 : vector<8x512xf32>
    %85 = tpu.concatenate %53, %57, %61, %65, %68, %72, %76, %80, %84 in 0 : vector<8x512xf32>, vector<8x512xf32>, vector<8x512xf32>, vector<8x512xf32>, vector<8x512xf32>, vector<8x512xf32>, vector<8x512xf32>, vector<8x512xf32>, vector<8x512xf32> -> vector<72x512xf32>
    %86 = arith.truncf %85 : vector<72x512xf32> to vector<72x512xbf16>
    %c16 = arith.constant 16 : index
    %c0_23 = arith.constant 0 : index
    %87 = vector.load %arg2[%c16, %c0_23] : memref<144x144xbf16, #tpu.memory_space<vmem>>, vector<8x72xbf16>
    %c8 = arith.constant 8 : index
    %c0_24 = arith.constant 0 : index
    %88 = vector.load %arg3[%c8, %c0_24] : memref<96x1xf32, #tpu.memory_space<vmem>>, vector<8x1xf32>
    %cst_25 = arith.constant dense<0.000000e+00> : vector<8x512xf32>
    %89 = tpu.matmul %87, %86, %cst_25 {dimension_numbers = #tpu.dot_dimension_numbers<[1], [0], [0], [1], [0, 0, 1, 1], [], []>} : vector<8x72xbf16>, vector<72x512xbf16>, vector<8x512xf32> -> vector<8x512xf32>
    %90 = vector.broadcast %88 : vector<8x1xf32> to vector<8x512xf32>
    %91 = arith.addf %89, %90 : vector<8x512xf32>
    %cst_26 = arith.constant 0.000000e+00 : f32
    %92 = vector.broadcast %cst_26 : f32 to vector<8x512xf32>
    %93 = arith.maximumf %91, %92 : vector<8x512xf32>
    %c17_i32_27 = arith.constant 17 : i32
    %94 = tpu.dynamic_rotate %93 by %c17_i32_27 dim 1 : vector<8x512xf32>, i32 -> vector<8x512xf32>
    %95 = vector.extract_strided_slice %0 {offsets = [0, 0], sizes = [1, 512], strides = [1, 1]} : vector<9x512xf32> to vector<1x512xf32>
    %96 = vector.broadcast %95 : vector<1x512xf32> to vector<8x512xf32>
    %97 = arith.mulf %94, %96 : vector<8x512xf32>
    %c16_i32_28 = arith.constant 16 : i32
    %98 = tpu.dynamic_rotate %93 by %c16_i32_28 dim 1 : vector<8x512xf32>, i32 -> vector<8x512xf32>
    %99 = vector.extract_strided_slice %0 {offsets = [1, 0], sizes = [1, 512], strides = [1, 1]} : vector<9x512xf32> to vector<1x512xf32>
    %100 = vector.broadcast %99 : vector<1x512xf32> to vector<8x512xf32>
    %101 = arith.mulf %98, %100 : vector<8x512xf32>
    %c15_i32_29 = arith.constant 15 : i32
    %102 = tpu.dynamic_rotate %93 by %c15_i32_29 dim 1 : vector<8x512xf32>, i32 -> vector<8x512xf32>
    %103 = vector.extract_strided_slice %0 {offsets = [2, 0], sizes = [1, 512], strides = [1, 1]} : vector<9x512xf32> to vector<1x512xf32>
    %104 = vector.broadcast %103 : vector<1x512xf32> to vector<8x512xf32>
    %105 = arith.mulf %102, %104 : vector<8x512xf32>
    %c1_i32_30 = arith.constant 1 : i32
    %106 = tpu.dynamic_rotate %93 by %c1_i32_30 dim 1 : vector<8x512xf32>, i32 -> vector<8x512xf32>
    %107 = vector.extract_strided_slice %0 {offsets = [3, 0], sizes = [1, 512], strides = [1, 1]} : vector<9x512xf32> to vector<1x512xf32>
    %108 = vector.broadcast %107 : vector<1x512xf32> to vector<8x512xf32>
    %109 = arith.mulf %106, %108 : vector<8x512xf32>
    %110 = vector.extract_strided_slice %0 {offsets = [4, 0], sizes = [1, 512], strides = [1, 1]} : vector<9x512xf32> to vector<1x512xf32>
    %111 = vector.broadcast %110 : vector<1x512xf32> to vector<8x512xf32>
    %112 = arith.mulf %93, %111 : vector<8x512xf32>
    %c511_i32_31 = arith.constant 511 : i32
    %113 = tpu.dynamic_rotate %93 by %c511_i32_31 dim 1 : vector<8x512xf32>, i32 -> vector<8x512xf32>
    %114 = vector.extract_strided_slice %0 {offsets = [5, 0], sizes = [1, 512], strides = [1, 1]} : vector<9x512xf32> to vector<1x512xf32>
    %115 = vector.broadcast %114 : vector<1x512xf32> to vector<8x512xf32>
    %116 = arith.mulf %113, %115 : vector<8x512xf32>
    %c497_i32_32 = arith.constant 497 : i32
    %117 = tpu.dynamic_rotate %93 by %c497_i32_32 dim 1 : vector<8x512xf32>, i32 -> vector<8x512xf32>
    %118 = vector.extract_strided_slice %0 {offsets = [6, 0], sizes = [1, 512], strides = [1, 1]} : vector<9x512xf32> to vector<1x512xf32>
    %119 = vector.broadcast %118 : vector<1x512xf32> to vector<8x512xf32>
    %120 = arith.mulf %117, %119 : vector<8x512xf32>
    %c496_i32_33 = arith.constant 496 : i32
    %121 = tpu.dynamic_rotate %93 by %c496_i32_33 dim 1 : vector<8x512xf32>, i32 -> vector<8x512xf32>
    %122 = vector.extract_strided_slice %0 {offsets = [7, 0], sizes = [1, 512], strides = [1, 1]} : vector<9x512xf32> to vector<1x512xf32>
    %123 = vector.broadcast %122 : vector<1x512xf32> to vector<8x512xf32>
    %124 = arith.mulf %121, %123 : vector<8x512xf32>
    %c495_i32_34 = arith.constant 495 : i32
    %125 = tpu.dynamic_rotate %93 by %c495_i32_34 dim 1 : vector<8x512xf32>, i32 -> vector<8x512xf32>
    %126 = vector.extract_strided_slice %0 {offsets = [8, 0], sizes = [1, 512], strides = [1, 1]} : vector<9x512xf32> to vector<1x512xf32>
    %127 = vector.broadcast %126 : vector<1x512xf32> to vector<8x512xf32>
    %128 = arith.mulf %125, %127 : vector<8x512xf32>
    %129 = tpu.concatenate %97, %101, %105, %109, %112, %116, %120, %124, %128 in 0 : vector<8x512xf32>, vector<8x512xf32>, vector<8x512xf32>, vector<8x512xf32>, vector<8x512xf32>, vector<8x512xf32>, vector<8x512xf32>, vector<8x512xf32>, vector<8x512xf32> -> vector<72x512xf32>
    %130 = arith.truncf %129 : vector<72x512xf32> to vector<72x512xbf16>
    %c32 = arith.constant 32 : index
    %c0_35 = arith.constant 0 : index
    %131 = vector.load %arg2[%c32, %c0_35] : memref<144x144xbf16, #tpu.memory_space<vmem>>, vector<8x72xbf16>
    %c16_36 = arith.constant 16 : index
    %c0_37 = arith.constant 0 : index
    %132 = vector.load %arg3[%c16_36, %c0_37] : memref<96x1xf32, #tpu.memory_space<vmem>>, vector<8x1xf32>
    %cst_38 = arith.constant dense<0.000000e+00> : vector<8x512xf32>
    %133 = tpu.matmul %131, %130, %cst_38 {dimension_numbers = #tpu.dot_dimension_numbers<[1], [0], [0], [1], [0, 0, 1, 1], [], []>} : vector<8x72xbf16>, vector<72x512xbf16>, vector<8x512xf32> -> vector<8x512xf32>
    %134 = vector.broadcast %132 : vector<8x1xf32> to vector<8x512xf32>
    %135 = arith.addf %133, %134 : vector<8x512xf32>
    %136 = arith.addf %135, %49 : vector<8x512xf32>
    %cst_39 = arith.constant 0.000000e+00 : f32
    %137 = vector.broadcast %cst_39 : f32 to vector<8x512xf32>
    %138 = arith.maximumf %136, %137 : vector<8x512xf32>
    %c17_i32_40 = arith.constant 17 : i32
    %139 = tpu.dynamic_rotate %138 by %c17_i32_40 dim 1 : vector<8x512xf32>, i32 -> vector<8x512xf32>
    %140 = vector.extract_strided_slice %0 {offsets = [0, 0], sizes = [1, 512], strides = [1, 1]} : vector<9x512xf32> to vector<1x512xf32>
    %141 = vector.broadcast %140 : vector<1x512xf32> to vector<8x512xf32>
    %142 = arith.mulf %139, %141 : vector<8x512xf32>
    %c16_i32_41 = arith.constant 16 : i32
    %143 = tpu.dynamic_rotate %138 by %c16_i32_41 dim 1 : vector<8x512xf32>, i32 -> vector<8x512xf32>
    %144 = vector.extract_strided_slice %0 {offsets = [1, 0], sizes = [1, 512], strides = [1, 1]} : vector<9x512xf32> to vector<1x512xf32>
    %145 = vector.broadcast %144 : vector<1x512xf32> to vector<8x512xf32>
    %146 = arith.mulf %143, %145 : vector<8x512xf32>
    %c15_i32_42 = arith.constant 15 : i32
    %147 = tpu.dynamic_rotate %138 by %c15_i32_42 dim 1 : vector<8x512xf32>, i32 -> vector<8x512xf32>
    %148 = vector.extract_strided_slice %0 {offsets = [2, 0], sizes = [1, 512], strides = [1, 1]} : vector<9x512xf32> to vector<1x512xf32>
    %149 = vector.broadcast %148 : vector<1x512xf32> to vector<8x512xf32>
    %150 = arith.mulf %147, %149 : vector<8x512xf32>
    %c1_i32_43 = arith.constant 1 : i32
    %151 = tpu.dynamic_rotate %138 by %c1_i32_43 dim 1 : vector<8x512xf32>, i32 -> vector<8x512xf32>
    %152 = vector.extract_strided_slice %0 {offsets = [3, 0], sizes = [1, 512], strides = [1, 1]} : vector<9x512xf32> to vector<1x512xf32>
    %153 = vector.broadcast %152 : vector<1x512xf32> to vector<8x512xf32>
    %154 = arith.mulf %151, %153 : vector<8x512xf32>
    %155 = vector.extract_strided_slice %0 {offsets = [4, 0], sizes = [1, 512], strides = [1, 1]} : vector<9x512xf32> to vector<1x512xf32>
    %156 = vector.broadcast %155 : vector<1x512xf32> to vector<8x512xf32>
    %157 = arith.mulf %138, %156 : vector<8x512xf32>
    %c511_i32_44 = arith.constant 511 : i32
    %158 = tpu.dynamic_rotate %138 by %c511_i32_44 dim 1 : vector<8x512xf32>, i32 -> vector<8x512xf32>
    %159 = vector.extract_strided_slice %0 {offsets = [5, 0], sizes = [1, 512], strides = [1, 1]} : vector<9x512xf32> to vector<1x512xf32>
    %160 = vector.broadcast %159 : vector<1x512xf32> to vector<8x512xf32>
    %161 = arith.mulf %158, %160 : vector<8x512xf32>
    %c497_i32_45 = arith.constant 497 : i32
    %162 = tpu.dynamic_rotate %138 by %c497_i32_45 dim 1 : vector<8x512xf32>, i32 -> vector<8x512xf32>
    %163 = vector.extract_strided_slice %0 {offsets = [6, 0], sizes = [1, 512], strides = [1, 1]} : vector<9x512xf32> to vector<1x512xf32>
    %164 = vector.broadcast %163 : vector<1x512xf32> to vector<8x512xf32>
    %165 = arith.mulf %162, %164 : vector<8x512xf32>
    %c496_i32_46 = arith.constant 496 : i32
    %166 = tpu.dynamic_rotate %138 by %c496_i32_46 dim 1 : vector<8x512xf32>, i32 -> vector<8x512xf32>
    %167 = vector.extract_strided_slice %0 {offsets = [7, 0], sizes = [1, 512], strides = [1, 1]} : vector<9x512xf32> to vector<1x512xf32>
    %168 = vector.broadcast %167 : vector<1x512xf32> to vector<8x512xf32>
    %169 = arith.mulf %166, %168 : vector<8x512xf32>
    %c495_i32_47 = arith.constant 495 : i32
    %170 = tpu.dynamic_rotate %138 by %c495_i32_47 dim 1 : vector<8x512xf32>, i32 -> vector<8x512xf32>
    %171 = vector.extract_strided_slice %0 {offsets = [8, 0], sizes = [1, 512], strides = [1, 1]} : vector<9x512xf32> to vector<1x512xf32>
    %172 = vector.broadcast %171 : vector<1x512xf32> to vector<8x512xf32>
    %173 = arith.mulf %170, %172 : vector<8x512xf32>
    %174 = tpu.concatenate %142, %146, %150, %154, %157, %161, %165, %169, %173 in 0 : vector<8x512xf32>, vector<8x512xf32>, vector<8x512xf32>, vector<8x512xf32>, vector<8x512xf32>, vector<8x512xf32>, vector<8x512xf32>, vector<8x512xf32>, vector<8x512xf32> -> vector<72x512xf32>
    %175 = arith.truncf %174 : vector<72x512xf32> to vector<72x512xbf16>
    %c48 = arith.constant 48 : index
    %c0_48 = arith.constant 0 : index
    %176 = vector.load %arg2[%c48, %c0_48] : memref<144x144xbf16, #tpu.memory_space<vmem>>, vector<16x72xbf16>
    %c24 = arith.constant 24 : index
    %c0_49 = arith.constant 0 : index
    %177 = vector.load %arg3[%c24, %c0_49] : memref<96x1xf32, #tpu.memory_space<vmem>>, vector<16x1xf32>
    %cst_50 = arith.constant dense<0.000000e+00> : vector<16x512xf32>
    %178 = tpu.matmul %176, %175, %cst_50 {dimension_numbers = #tpu.dot_dimension_numbers<[1], [0], [0], [1], [0, 0, 1, 1], [], []>} : vector<16x72xbf16>, vector<72x512xbf16>, vector<16x512xf32> -> vector<16x512xf32>
    %179 = vector.broadcast %177 : vector<16x1xf32> to vector<16x512xf32>
    %180 = arith.addf %178, %179 : vector<16x512xf32>
    %cst_51 = arith.constant 0.000000e+00 : f32
    %181 = vector.broadcast %cst_51 : f32 to vector<16x512xf32>
    %182 = arith.maximumf %180, %181 : vector<16x512xf32>
    %183 = arith.truncf %182 : vector<16x512xf32> to vector<16x512xbf16>
    %cst_52 = arith.constant dense<0.000000e+00> : vector<16x128xf32>
    %184 = tpu.matmul %183, %2, %cst_52 {dimension_numbers = #tpu.dot_dimension_numbers<[1], [0], [0], [1], [0, 0, 1, 1], [], []>} : vector<16x512xbf16>, vector<512x128xbf16>, vector<16x128xf32> -> vector<16x128xf32>
    %c9_i32 = arith.constant 9 : i32
    %185 = tpu.dynamic_rotate %184 by %c9_i32 dim 1 : vector<16x128xf32>, i32 -> vector<16x128xf32>
    %186 = vector.extract_strided_slice %1 {offsets = [0, 0], sizes = [1, 128], strides = [1, 1]} : vector<9x128xf32> to vector<1x128xf32>
    %187 = vector.broadcast %186 : vector<1x128xf32> to vector<16x128xf32>
    %188 = arith.mulf %185, %187 : vector<16x128xf32>
    %c8_i32 = arith.constant 8 : i32
    %189 = tpu.dynamic_rotate %184 by %c8_i32 dim 1 : vector<16x128xf32>, i32 -> vector<16x128xf32>
    %190 = vector.extract_strided_slice %1 {offsets = [1, 0], sizes = [1, 128], strides = [1, 1]} : vector<9x128xf32> to vector<1x128xf32>
    %191 = vector.broadcast %190 : vector<1x128xf32> to vector<16x128xf32>
    %192 = arith.mulf %189, %191 : vector<16x128xf32>
    %c7_i32 = arith.constant 7 : i32
    %193 = tpu.dynamic_rotate %184 by %c7_i32 dim 1 : vector<16x128xf32>, i32 -> vector<16x128xf32>
    %194 = vector.extract_strided_slice %1 {offsets = [2, 0], sizes = [1, 128], strides = [1, 1]} : vector<9x128xf32> to vector<1x128xf32>
    %195 = vector.broadcast %194 : vector<1x128xf32> to vector<16x128xf32>
    %196 = arith.mulf %193, %195 : vector<16x128xf32>
    %c1_i32_53 = arith.constant 1 : i32
    %197 = tpu.dynamic_rotate %184 by %c1_i32_53 dim 1 : vector<16x128xf32>, i32 -> vector<16x128xf32>
    %198 = vector.extract_strided_slice %1 {offsets = [3, 0], sizes = [1, 128], strides = [1, 1]} : vector<9x128xf32> to vector<1x128xf32>
    %199 = vector.broadcast %198 : vector<1x128xf32> to vector<16x128xf32>
    %200 = arith.mulf %197, %199 : vector<16x128xf32>
    %201 = vector.extract_strided_slice %1 {offsets = [4, 0], sizes = [1, 128], strides = [1, 1]} : vector<9x128xf32> to vector<1x128xf32>
    %202 = vector.broadcast %201 : vector<1x128xf32> to vector<16x128xf32>
    %203 = arith.mulf %184, %202 : vector<16x128xf32>
    %c127_i32 = arith.constant 127 : i32
    %204 = tpu.dynamic_rotate %184 by %c127_i32 dim 1 : vector<16x128xf32>, i32 -> vector<16x128xf32>
    %205 = vector.extract_strided_slice %1 {offsets = [5, 0], sizes = [1, 128], strides = [1, 1]} : vector<9x128xf32> to vector<1x128xf32>
    %206 = vector.broadcast %205 : vector<1x128xf32> to vector<16x128xf32>
    %207 = arith.mulf %204, %206 : vector<16x128xf32>
    %c121_i32 = arith.constant 121 : i32
    %208 = tpu.dynamic_rotate %184 by %c121_i32 dim 1 : vector<16x128xf32>, i32 -> vector<16x128xf32>
    %209 = vector.extract_strided_slice %1 {offsets = [6, 0], sizes = [1, 128], strides = [1, 1]} : vector<9x128xf32> to vector<1x128xf32>
    %210 = vector.broadcast %209 : vector<1x128xf32> to vector<16x128xf32>
    %211 = arith.mulf %208, %210 : vector<16x128xf32>
    %c120_i32 = arith.constant 120 : i32
    %212 = tpu.dynamic_rotate %184 by %c120_i32 dim 1 : vector<16x128xf32>, i32 -> vector<16x128xf32>
    %213 = vector.extract_strided_slice %1 {offsets = [7, 0], sizes = [1, 128], strides = [1, 1]} : vector<9x128xf32> to vector<1x128xf32>
    %214 = vector.broadcast %213 : vector<1x128xf32> to vector<16x128xf32>
    %215 = arith.mulf %212, %214 : vector<16x128xf32>
    %c119_i32 = arith.constant 119 : i32
    %216 = tpu.dynamic_rotate %184 by %c119_i32 dim 1 : vector<16x128xf32>, i32 -> vector<16x128xf32>
    %217 = vector.extract_strided_slice %1 {offsets = [8, 0], sizes = [1, 128], strides = [1, 1]} : vector<9x128xf32> to vector<1x128xf32>
    %218 = vector.broadcast %217 : vector<1x128xf32> to vector<16x128xf32>
    %219 = arith.mulf %216, %218 : vector<16x128xf32>
    %220 = tpu.concatenate %188, %192, %196, %200, %203, %207, %211, %215, %219 in 0 : vector<16x128xf32>, vector<16x128xf32>, vector<16x128xf32>, vector<16x128xf32>, vector<16x128xf32>, vector<16x128xf32>, vector<16x128xf32>, vector<16x128xf32>, vector<16x128xf32> -> vector<144x128xf32>
    %221 = arith.truncf %220 : vector<144x128xf32> to vector<144x128xbf16>
    %c64 = arith.constant 64 : index
    %c0_54 = arith.constant 0 : index
    %222 = vector.load %arg2[%c64, %c0_54] : memref<144x144xbf16, #tpu.memory_space<vmem>>, vector<16x144xbf16>
    %c40 = arith.constant 40 : index
    %c0_55 = arith.constant 0 : index
    %223 = vector.load %arg3[%c40, %c0_55] : memref<96x1xf32, #tpu.memory_space<vmem>>, vector<16x1xf32>
    %cst_56 = arith.constant dense<0.000000e+00> : vector<16x128xf32>
    %224 = tpu.matmul %222, %221, %cst_56 {dimension_numbers = #tpu.dot_dimension_numbers<[1], [0], [0], [1], [0, 0, 1, 1], [], []>} : vector<16x144xbf16>, vector<144x128xbf16>, vector<16x128xf32> -> vector<16x128xf32>
    %225 = vector.broadcast %223 : vector<16x1xf32> to vector<16x128xf32>
    %226 = arith.addf %224, %225 : vector<16x128xf32>
    %227 = arith.truncf %138 : vector<8x512xf32> to vector<8x512xbf16>
    %cst_57 = arith.constant dense<0.000000e+00> : vector<8x128xf32>
    %228 = tpu.matmul %227, %2, %cst_57 {dimension_numbers = #tpu.dot_dimension_numbers<[1], [0], [0], [1], [0, 0, 1, 1], [], []>} : vector<8x512xbf16>, vector<512x128xbf16>, vector<8x128xf32> -> vector<8x128xf32>
    %c80 = arith.constant 80 : index
    %c0_58 = arith.constant 0 : index
    %229 = vector.load %arg2[%c80, %c0_58] : memref<144x144xbf16, #tpu.memory_space<vmem>>, vector<16x8xbf16>
    %c56 = arith.constant 56 : index
    %c0_59 = arith.constant 0 : index
    %230 = vector.load %arg3[%c56, %c0_59] : memref<96x1xf32, #tpu.memory_space<vmem>>, vector<16x1xf32>
    %231 = arith.truncf %228 : vector<8x128xf32> to vector<8x128xbf16>
    %cst_60 = arith.constant dense<0.000000e+00> : vector<16x128xf32>
    %232 = tpu.matmul %229, %231, %cst_60 {dimension_numbers = #tpu.dot_dimension_numbers<[1], [0], [0], [1], [0, 0, 1, 1], [], []>} : vector<16x8xbf16>, vector<8x128xbf16>, vector<16x128xf32> -> vector<16x128xf32>
    %233 = vector.broadcast %230 : vector<16x1xf32> to vector<16x128xf32>
    %234 = arith.addf %232, %233 : vector<16x128xf32>
    %235 = arith.addf %226, %234 : vector<16x128xf32>
    %cst_61 = arith.constant 0.000000e+00 : f32
    %236 = vector.broadcast %cst_61 : f32 to vector<16x128xf32>
    %237 = arith.maximumf %235, %236 : vector<16x128xf32>
    %238 = arith.truncf %237 : vector<16x128xf32> to vector<16x128xbf16>
    %cst_62 = arith.constant dense<0.000000e+00> : vector<16x512xf32>
    %239 = tpu.matmul %238, %3, %cst_62 {dimension_numbers = #tpu.dot_dimension_numbers<[1], [0], [0], [1], [0, 0, 1, 1], [], []>} : vector<16x128xbf16>, vector<128x512xbf16>, vector<16x512xf32> -> vector<16x512xf32>
    %c17_i32_63 = arith.constant 17 : i32
    %240 = tpu.dynamic_rotate %239 by %c17_i32_63 dim 1 : vector<16x512xf32>, i32 -> vector<16x512xf32>
    %241 = vector.extract_strided_slice %0 {offsets = [0, 0], sizes = [1, 512], strides = [1, 1]} : vector<9x512xf32> to vector<1x512xf32>
    %242 = vector.broadcast %241 : vector<1x512xf32> to vector<16x512xf32>
    %243 = arith.mulf %240, %242 : vector<16x512xf32>
    %c16_i32_64 = arith.constant 16 : i32
    %244 = tpu.dynamic_rotate %239 by %c16_i32_64 dim 1 : vector<16x512xf32>, i32 -> vector<16x512xf32>
    %245 = vector.extract_strided_slice %0 {offsets = [1, 0], sizes = [1, 512], strides = [1, 1]} : vector<9x512xf32> to vector<1x512xf32>
    %246 = vector.broadcast %245 : vector<1x512xf32> to vector<16x512xf32>
    %247 = arith.mulf %244, %246 : vector<16x512xf32>
    %c15_i32_65 = arith.constant 15 : i32
    %248 = tpu.dynamic_rotate %239 by %c15_i32_65 dim 1 : vector<16x512xf32>, i32 -> vector<16x512xf32>
    %249 = vector.extract_strided_slice %0 {offsets = [2, 0], sizes = [1, 512], strides = [1, 1]} : vector<9x512xf32> to vector<1x512xf32>
    %250 = vector.broadcast %249 : vector<1x512xf32> to vector<16x512xf32>
    %251 = arith.mulf %248, %250 : vector<16x512xf32>
    %c1_i32_66 = arith.constant 1 : i32
    %252 = tpu.dynamic_rotate %239 by %c1_i32_66 dim 1 : vector<16x512xf32>, i32 -> vector<16x512xf32>
    %253 = vector.extract_strided_slice %0 {offsets = [3, 0], sizes = [1, 512], strides = [1, 1]} : vector<9x512xf32> to vector<1x512xf32>
    %254 = vector.broadcast %253 : vector<1x512xf32> to vector<16x512xf32>
    %255 = arith.mulf %252, %254 : vector<16x512xf32>
    %256 = vector.extract_strided_slice %0 {offsets = [4, 0], sizes = [1, 512], strides = [1, 1]} : vector<9x512xf32> to vector<1x512xf32>
    %257 = vector.broadcast %256 : vector<1x512xf32> to vector<16x512xf32>
    %258 = arith.mulf %239, %257 : vector<16x512xf32>
    %c511_i32_67 = arith.constant 511 : i32
    %259 = tpu.dynamic_rotate %239 by %c511_i32_67 dim 1 : vector<16x512xf32>, i32 -> vector<16x512xf32>
    %260 = vector.extract_strided_slice %0 {offsets = [5, 0], sizes = [1, 512], strides = [1, 1]} : vector<9x512xf32> to vector<1x512xf32>
    %261 = vector.broadcast %260 : vector<1x512xf32> to vector<16x512xf32>
    %262 = arith.mulf %259, %261 : vector<16x512xf32>
    %c497_i32_68 = arith.constant 497 : i32
    %263 = tpu.dynamic_rotate %239 by %c497_i32_68 dim 1 : vector<16x512xf32>, i32 -> vector<16x512xf32>
    %264 = vector.extract_strided_slice %0 {offsets = [6, 0], sizes = [1, 512], strides = [1, 1]} : vector<9x512xf32> to vector<1x512xf32>
    %265 = vector.broadcast %264 : vector<1x512xf32> to vector<16x512xf32>
    %266 = arith.mulf %263, %265 : vector<16x512xf32>
    %c496_i32_69 = arith.constant 496 : i32
    %267 = tpu.dynamic_rotate %239 by %c496_i32_69 dim 1 : vector<16x512xf32>, i32 -> vector<16x512xf32>
    %268 = vector.extract_strided_slice %0 {offsets = [7, 0], sizes = [1, 512], strides = [1, 1]} : vector<9x512xf32> to vector<1x512xf32>
    %269 = vector.broadcast %268 : vector<1x512xf32> to vector<16x512xf32>
    %270 = arith.mulf %267, %269 : vector<16x512xf32>
    %c495_i32_70 = arith.constant 495 : i32
    %271 = tpu.dynamic_rotate %239 by %c495_i32_70 dim 1 : vector<16x512xf32>, i32 -> vector<16x512xf32>
    %272 = vector.extract_strided_slice %0 {offsets = [8, 0], sizes = [1, 512], strides = [1, 1]} : vector<9x512xf32> to vector<1x512xf32>
    %273 = vector.broadcast %272 : vector<1x512xf32> to vector<16x512xf32>
    %274 = arith.mulf %271, %273 : vector<16x512xf32>
    %275 = tpu.concatenate %243, %247, %251, %255, %258, %262, %266, %270, %274 in 0 : vector<16x512xf32>, vector<16x512xf32>, vector<16x512xf32>, vector<16x512xf32>, vector<16x512xf32>, vector<16x512xf32>, vector<16x512xf32>, vector<16x512xf32>, vector<16x512xf32> -> vector<144x512xf32>
    %276 = arith.truncf %275 : vector<144x512xf32> to vector<144x512xbf16>
    %c96 = arith.constant 96 : index
    %c0_71 = arith.constant 0 : index
    %277 = vector.load %arg2[%c96, %c0_71] : memref<144x144xbf16, #tpu.memory_space<vmem>>, vector<8x144xbf16>
    %c72 = arith.constant 72 : index
    %c0_72 = arith.constant 0 : index
    %278 = vector.load %arg3[%c72, %c0_72] : memref<96x1xf32, #tpu.memory_space<vmem>>, vector<8x1xf32>
    %cst_73 = arith.constant dense<0.000000e+00> : vector<8x512xf32>
    %279 = tpu.matmul %277, %276, %cst_73 {dimension_numbers = #tpu.dot_dimension_numbers<[1], [0], [0], [1], [0, 0, 1, 1], [], []>} : vector<8x144xbf16>, vector<144x512xbf16>, vector<8x512xf32> -> vector<8x512xf32>
    %280 = vector.broadcast %278 : vector<8x1xf32> to vector<8x512xf32>
    %281 = arith.addf %279, %280 : vector<8x512xf32>
    %cst_74 = arith.constant 0.000000e+00 : f32
    %282 = vector.broadcast %cst_74 : f32 to vector<8x512xf32>
    %283 = arith.maximumf %281, %282 : vector<8x512xf32>
    %284 = arith.addf %283, %138 : vector<8x512xf32>
    %cst_75 = arith.constant 0.000000e+00 : f32
    %285 = vector.broadcast %cst_75 : f32 to vector<8x512xf32>
    %286 = arith.maximumf %284, %285 : vector<8x512xf32>
    %c17_i32_76 = arith.constant 17 : i32
    %287 = tpu.dynamic_rotate %286 by %c17_i32_76 dim 1 : vector<8x512xf32>, i32 -> vector<8x512xf32>
    %288 = vector.extract_strided_slice %0 {offsets = [0, 0], sizes = [1, 512], strides = [1, 1]} : vector<9x512xf32> to vector<1x512xf32>
    %289 = vector.broadcast %288 : vector<1x512xf32> to vector<8x512xf32>
    %290 = arith.mulf %287, %289 : vector<8x512xf32>
    %c16_i32_77 = arith.constant 16 : i32
    %291 = tpu.dynamic_rotate %286 by %c16_i32_77 dim 1 : vector<8x512xf32>, i32 -> vector<8x512xf32>
    %292 = vector.extract_strided_slice %0 {offsets = [1, 0], sizes = [1, 512], strides = [1, 1]} : vector<9x512xf32> to vector<1x512xf32>
    %293 = vector.broadcast %292 : vector<1x512xf32> to vector<8x512xf32>
    %294 = arith.mulf %291, %293 : vector<8x512xf32>
    %c15_i32_78 = arith.constant 15 : i32
    %295 = tpu.dynamic_rotate %286 by %c15_i32_78 dim 1 : vector<8x512xf32>, i32 -> vector<8x512xf32>
    %296 = vector.extract_strided_slice %0 {offsets = [2, 0], sizes = [1, 512], strides = [1, 1]} : vector<9x512xf32> to vector<1x512xf32>
    %297 = vector.broadcast %296 : vector<1x512xf32> to vector<8x512xf32>
    %298 = arith.mulf %295, %297 : vector<8x512xf32>
    %c1_i32_79 = arith.constant 1 : i32
    %299 = tpu.dynamic_rotate %286 by %c1_i32_79 dim 1 : vector<8x512xf32>, i32 -> vector<8x512xf32>
    %300 = vector.extract_strided_slice %0 {offsets = [3, 0], sizes = [1, 512], strides = [1, 1]} : vector<9x512xf32> to vector<1x512xf32>
    %301 = vector.broadcast %300 : vector<1x512xf32> to vector<8x512xf32>
    %302 = arith.mulf %299, %301 : vector<8x512xf32>
    %303 = vector.extract_strided_slice %0 {offsets = [4, 0], sizes = [1, 512], strides = [1, 1]} : vector<9x512xf32> to vector<1x512xf32>
    %304 = vector.broadcast %303 : vector<1x512xf32> to vector<8x512xf32>
    %305 = arith.mulf %286, %304 : vector<8x512xf32>
    %c511_i32_80 = arith.constant 511 : i32
    %306 = tpu.dynamic_rotate %286 by %c511_i32_80 dim 1 : vector<8x512xf32>, i32 -> vector<8x512xf32>
    %307 = vector.extract_strided_slice %0 {offsets = [5, 0], sizes = [1, 512], strides = [1, 1]} : vector<9x512xf32> to vector<1x512xf32>
    %308 = vector.broadcast %307 : vector<1x512xf32> to vector<8x512xf32>
    %309 = arith.mulf %306, %308 : vector<8x512xf32>
    %c497_i32_81 = arith.constant 497 : i32
    %310 = tpu.dynamic_rotate %286 by %c497_i32_81 dim 1 : vector<8x512xf32>, i32 -> vector<8x512xf32>
    %311 = vector.extract_strided_slice %0 {offsets = [6, 0], sizes = [1, 512], strides = [1, 1]} : vector<9x512xf32> to vector<1x512xf32>
    %312 = vector.broadcast %311 : vector<1x512xf32> to vector<8x512xf32>
    %313 = arith.mulf %310, %312 : vector<8x512xf32>
    %c496_i32_82 = arith.constant 496 : i32
    %314 = tpu.dynamic_rotate %286 by %c496_i32_82 dim 1 : vector<8x512xf32>, i32 -> vector<8x512xf32>
    %315 = vector.extract_strided_slice %0 {offsets = [7, 0], sizes = [1, 512], strides = [1, 1]} : vector<9x512xf32> to vector<1x512xf32>
    %316 = vector.broadcast %315 : vector<1x512xf32> to vector<8x512xf32>
    %317 = arith.mulf %314, %316 : vector<8x512xf32>
    %c495_i32_83 = arith.constant 495 : i32
    %318 = tpu.dynamic_rotate %286 by %c495_i32_83 dim 1 : vector<8x512xf32>, i32 -> vector<8x512xf32>
    %319 = vector.extract_strided_slice %0 {offsets = [8, 0], sizes = [1, 512], strides = [1, 1]} : vector<9x512xf32> to vector<1x512xf32>
    %320 = vector.broadcast %319 : vector<1x512xf32> to vector<8x512xf32>
    %321 = arith.mulf %318, %320 : vector<8x512xf32>
    %322 = tpu.concatenate %290, %294, %298, %302, %305, %309, %313, %317, %321 in 0 : vector<8x512xf32>, vector<8x512xf32>, vector<8x512xf32>, vector<8x512xf32>, vector<8x512xf32>, vector<8x512xf32>, vector<8x512xf32>, vector<8x512xf32>, vector<8x512xf32> -> vector<72x512xf32>
    %323 = arith.truncf %322 : vector<72x512xf32> to vector<72x512xbf16>
    %c112 = arith.constant 112 : index
    %c0_84 = arith.constant 0 : index
    %324 = vector.load %arg2[%c112, %c0_84] : memref<144x144xbf16, #tpu.memory_space<vmem>>, vector<8x72xbf16>
    %c80_85 = arith.constant 80 : index
    %c0_86 = arith.constant 0 : index
    %325 = vector.load %arg3[%c80_85, %c0_86] : memref<96x1xf32, #tpu.memory_space<vmem>>, vector<8x1xf32>
    %cst_87 = arith.constant dense<0.000000e+00> : vector<8x512xf32>
    %326 = tpu.matmul %324, %323, %cst_87 {dimension_numbers = #tpu.dot_dimension_numbers<[1], [0], [0], [1], [0, 0, 1, 1], [], []>} : vector<8x72xbf16>, vector<72x512xbf16>, vector<8x512xf32> -> vector<8x512xf32>
    %327 = vector.broadcast %325 : vector<8x1xf32> to vector<8x512xf32>
    %328 = arith.addf %326, %327 : vector<8x512xf32>
    %cst_88 = arith.constant 0.000000e+00 : f32
    %329 = vector.broadcast %cst_88 : f32 to vector<8x512xf32>
    %330 = arith.maximumf %328, %329 : vector<8x512xf32>
    %c128 = arith.constant 128 : index
    %c0_89 = arith.constant 0 : index
    %331 = vector.load %arg2[%c128, %c0_89] : memref<144x144xbf16, #tpu.memory_space<vmem>>, vector<1x8xbf16>
    %c88 = arith.constant 88 : index
    %c0_90 = arith.constant 0 : index
    %332 = vector.load %arg3[%c88, %c0_90] : memref<96x1xf32, #tpu.memory_space<vmem>>, vector<1x1xf32>
    %333 = arith.truncf %330 : vector<8x512xf32> to vector<8x512xbf16>
    %cst_91 = arith.constant dense<0.000000e+00> : vector<1x512xf32>
    %334 = tpu.matmul %331, %333, %cst_91 {dimension_numbers = #tpu.dot_dimension_numbers<[1], [0], [0], [1], [0, 0, 1, 1], [], []>} : vector<1x8xbf16>, vector<8x512xbf16>, vector<1x512xf32> -> vector<1x512xf32>
    %335 = vector.broadcast %332 : vector<1x1xf32> to vector<1x512xf32>
    %336 = arith.addf %334, %335 : vector<1x512xf32>
    %337 = arith.negf %336 : vector<1x512xf32>
    %338 = math.exp %337 : vector<1x512xf32>
    %cst_92 = arith.constant 1.000000e+00 : f32
    %339 = vector.broadcast %cst_92 : f32 to vector<1x512xf32>
    %340 = arith.addf %339, %338 : vector<1x512xf32>
    %341 = arith.divf %339, %340 : vector<1x512xf32>
    %c0_93 = arith.constant 0 : index
    %c0_94 = arith.constant 0 : index
    %c0_95 = arith.constant 0 : index
    %342 = vector.load %arg8[%c0_93, %c0_94, %c0_95] : memref<1x1x512xf32, #tpu.memory_space<vmem>>, vector<1x1x512xf32>
    %343 = vector.shape_cast %342 : vector<1x1x512xf32> to vector<1x512xf32>
    %344 = vector.shape_cast %341 : vector<1x512xf32> to vector<1x1x512xf32>
    tpu.vector_store %arg8[%c0_93, %c0_94, %c0_95], %344 {strides = array<i32>} : memref<1x1x512xf32, #tpu.memory_space<vmem>>, vector<1x1x512xf32>,
    return
  }
  func.func @transform_0(%arg0: i32) -> (i32, i32, i32) {
    %c0_i32 = arith.constant 0 : i32
    %c0_i32_0 = arith.constant 0 : i32
    %c0_i32_1 = arith.constant 0 : i32
    return %arg0, %c0_i32, %c0_i32_0 : i32, i32, i32
  }
  func.func @transform_1(%arg0: i32) -> (i32, i32) {
    %c0_i32 = arith.constant 0 : i32
    %c0_i32_0 = arith.constant 0 : i32
    %c0_i32_1 = arith.constant 0 : i32
    return %c0_i32, %c0_i32_0 : i32, i32
  }
  func.func @transform_2(%arg0: i32) -> (i32, i32) {
    %c0_i32 = arith.constant 0 : i32
    %c0_i32_0 = arith.constant 0 : i32
    %c0_i32_1 = arith.constant 0 : i32
    return %c0_i32, %c0_i32_0 : i32, i32
  }
  func.func @transform_3(%arg0: i32) -> (i32, i32) {
    %c0_i32 = arith.constant 0 : i32
    %c0_i32_0 = arith.constant 0 : i32
    %c0_i32_1 = arith.constant 0 : i32
    return %c0_i32, %c0_i32_0 : i32, i32
  }
  func.func @transform_4(%arg0: i32) -> (i32, i32) {
    %c0_i32 = arith.constant 0 : i32
    %c0_i32_0 = arith.constant 0 : i32
    %c0_i32_1 = arith.constant 0 : i32
    return %c0_i32, %c0_i32_0 : i32, i32
  }
  func.func @transform_5(%arg0: i32) -> (i32, i32) {
    %c0_i32 = arith.constant 0 : i32
    %c0_i32_0 = arith.constant 0 : i32
    %c0_i32_1 = arith.constant 0 : i32
    return %c0_i32, %c0_i32_0 : i32, i32
  }
  func.func @transform_6(%arg0: i32) -> (i32, i32) {
    %c0_i32 = arith.constant 0 : i32
    %c0_i32_0 = arith.constant 0 : i32
    %c0_i32_1 = arith.constant 0 : i32
    return %c0_i32, %c0_i32_0 : i32, i32
  }
  func.func @transform_7(%arg0: i32) -> (i32, i32, i32) {
    %c0_i32 = arith.constant 0 : i32
    %c0_i32_0 = arith.constant 0 : i32
    %c0_i32_1 = arith.constant 0 : i32
    return %arg0, %c0_i32, %c0_i32_0 : i32, i32, i32
  }
}

</mosaic_0001>

<bundles_post_ra>
// kernel: deep_ca_resnet_forward.1
= control target key start
LH: loop header
LB: loop body
LE: loop exit
PB: predicated region body
PF: predicated region fallthrough
CT: control target
= control target key end

     0   :  { %s3082_s30 = smov 111   ;;  %s3083_s8 = smov 113   ;;  %v5534_v6 = vlaneseq  ;;  %vm346_vm1 = vcmask 1043456   ;;  %vm342_vm9 = vcmask 588800   ;;  %vm1472_vm10 = vcmask 130048   ;;  %s5526_s0 = inlined_call_operand.vmem [shape: f32[1,8,512], index: 0, kind: input, shape index: {}]   ;;  %s5527_s3 = inlined_call_operand.vmem [shape: f32[9,512], index: 3, kind: input, shape index: {}]   ;;  %s5528_s2 = inlined_call_operand.vmem [shape: f32[96,1], index: 2, kind: input, shape index: {}]   ;;  %s5529_s1 = inlined_call_operand.vmem [shape: bf16[144,144], index: 1, kind: input, shape index: {}]   ;;  %s5530_s5 = inlined_call_operand.vmem [shape: bf16[512,128], index: 5, kind: input, shape index: {}]   ;;  %s5531_s4 = inlined_call_operand.vmem [shape: f32[9,128], index: 4, kind: input, shape index: {}]   ;;  %s5532_s6 = inlined_call_operand.vmem [shape: bf16[128,512], index: 6, kind: input, shape index: {}]   ;;  %s5533_s7 = inlined_call_operand.vmem [shape: f32[1,1,512], index: 7, kind: output, shape index: {}]  }
   0x1   :  { %v3140_v0 = vld [vmem:[%s5526_s0 + $0x18] sm:$0xff]  ;;  %v3145_v1 = vld [vmem:[%s5526_s0 + $0x10] sm:$0xff]  ;;  %v3150_v2 = vld [vmem:[%s5526_s0] sm:$0xff]  ;;  %s3084_s9 = smov 112   ;;  %s3085_s12 = smov 127   ;;  %vm1580_vm11 = vcmask 64512  }
   0x2   :  { %300 = vrot.lane.b32.xlu1 %v3140_v0, %s3082_s30  ;;  %256 = vrot.lane.b32.xlu2 %v3145_v1, %s3083_s8  ;;  %v3173_v3 = vld [vmem:[%s5526_s0 + $0x8] sm:$0xff]  ;;  %s3086_s0 = smov 15   ;;  %s3087_s13 = smov 1   ;;  %v3224_v7 = vand.u32 127, %v5534_v6  ;;  %v3230_v9 = vld [vmem:[%s5527_s3 + $0x38] ss:$0 sm:$0xff] }
   0x3   :  { %294 = vrot.lane.b32.xlu0 %v3150_v2, %s3082_s30  ;;  %s3088_s14 = smov 17   ;;  %s3089_s15 = smov 16   ;;  %v3239_v16 = vld [vmem:[%s5527_s3 + $0x30] ss:$0 sm:$0xff]  ;;  %v3257_v23 = vld [vmem:[%s5527_s3 + $0x18] sm:$0xff]  ;;  %v3302_v47 = vld [vmem:[%s5527_s3] sm:$0xff] }
   0x4   :  { %vm302_vm0 = vcmp.lt.s32.totalorder %v3224_v7, 111  ;;  %v3251_v22 = vld [vmem:[%s5527_s3 + $0x10] sm:$0xff]  ;;  %vm260_vm2 = vcmp.lt.s32.totalorder %v3224_v7, 113  ;;  %vm281_vm3 = vcmp.lt.s32.totalorder %v3224_v7, 112  ;;  %v3271_v29 = vperm.slane %v3257_v23, 6  ;;  %v3311_v50 = vld [vmem:[%s5527_s3 + $0x8] sm:$0xff] }
   0x5   :  { %v3261_v25 = vperm.slane %v3251_v22, 6  ;;  %v3264_v26 = vperm.slane %v3251_v22, 7  ;;  %v3274_v30 = vperm.slane %v3257_v23, 7  ;;  %v3290_v43 = vld [vmem:[%s5527_s3 + $0x20] ss:$0 sm:$0xff]  ;;  %v3318_v54 = vperm.slane %v3302_v47, 7 }
   0x6   :  { %5612 = vst [vmem:[#allocation4_spill] sm:$0xff] %v3271_v29  ;;  %v3295_v44 = vld [vmem:[%s5527_s3 + $0x28] ss:$0 sm:$0xff]  ;;  %v3321_v55 = vperm.slane %v3251_v22, 4  ;;  %v3324_v56 = vperm.slane %v3257_v23, 4  ;;  %vm239_vm4 = vcmp.lt.s32.totalorder %v3224_v7, 127 }
   0x7   :  { %5610 = vst [vmem:[#allocation2_spill] sm:$0xff] %v3261_v25  ;;  %v3328_v59 = vperm.slane %v3311_v50, 7  ;;  %v3335_v62 = vperm.slane %v3302_v47, 6  ;;  %v3338_v63 = vperm.slane %v3311_v50, 6  ;;  %vm189_vm5 = vcmp.lt.s32.totalorder %v3224_v7, 15  ;;  %s3092_s10 = smov 121  }
   0x8   :  { %5611 = vst [vmem:[#allocation3_spill] sm:$0xff] %v3264_v26  ;;  %vm210_vm6 = vcmp.lt.s32.totalorder %v3224_v7, 1  ;;  %vm147_vm7 = vcmp.lt.s32.totalorder %v3224_v7, 17  ;;  %vm168_vm8 = vcmp.lt.s32.totalorder %v3224_v7, 16  ;;  %s3093_s11 = smov 8   ;;  %s3094_s16 = smov 119  }
   0x9   :  { %5613 = vst [vmem:[#allocation5_spill] sm:$0xff] %v3274_v30  ;;  %s3095_s17 = smov 7   ;;  %s3096_s22 = smov 9  }
   0xa   :  { %258 = vrot.lane.b32.xlu2 %v3140_v0, %s3083_s8  ;;  %252 = vrot.lane.b32.xlu1 %v3150_v2, %s3083_s8  ;;  %5614 = vst [vmem:[#allocation6_spill] sm:$0xff] %v3318_v54 }
   0xb   :  { %298 = vrot.lane.b32.xlu0 %v3145_v1, %s3082_s30  ;;  %5615 = vst [vmem:[#allocation7_spill] sm:$0xff] %v3321_v55 }
   0xc   :  { %5616 = vst [vmem:[#allocation8_spill] sm:$0xff] %v3324_v56 }
   0xd   :  { %5617 = vst [vmem:[#allocation9_spill] sm:$0xff] %v3328_v59 }
   0xe   :  { %5618 = vst [vmem:[#allocation10_spill] sm:$0xff] %v3335_v62 }
   0xf   :  { %5619 = vst [vmem:[#allocation11_spill] sm:$0xff] %v3338_v63 }
  0x12   :  { %279 = vrot.lane.b32.xlu2 %v3140_v0, %s3084_s9  ;;  %277 = vrot.lane.b32.xlu1 %v3145_v1, %s3084_s9 }
  0x13   :  { %273 = vrot.lane.b32.xlu0 %v3150_v2, %s3084_s9 }
  0x1a   :  { %235 = vrot.lane.b32.xlu2 %v3145_v1, %s3085_s12  ;;  %231 = vrot.lane.b32.xlu1 %v3150_v2, %s3085_s12 }
  0x1b   :  { %296 = vrot.lane.b32.xlu0 %v3173_v3, %s3082_s30 }
  0x22   :  { %275 = vrot.lane.b32.xlu2 %v3173_v3, %s3084_s9  ;;  %254 = vrot.lane.b32.xlu1 %v3173_v3, %s3083_s8 }
  0x23   :  { %237 = vrot.lane.b32.xlu0 %v3140_v0, %s3085_s12 }
  0x2a   :  { %187 = vrot.lane.b32.xlu2 %v3140_v0, %s3086_s0  ;;  %185 = vrot.lane.b32.xlu1 %v3145_v1, %s3086_s0 }
  0x2b   :  { %183 = vrot.lane.b32.xlu0 %v3173_v3, %s3086_s0 }
  0x32   :  { %208 = vrot.lane.b32.xlu2 %v3140_v0, %s3087_s13  ;;  %206 = vrot.lane.b32.xlu1 %v3145_v1, %s3087_s13 }
  0x33   :  { %204 = vrot.lane.b32.xlu0 %v3173_v3, %s3087_s13 }
  0x3a   :  { %141 = vrot.lane.b32.xlu2 %v3145_v1, %s3088_s14  ;;  %139 = vrot.lane.b32.xlu1 %v3173_v3, %s3088_s14 }
  0x3b   :  { %233 = vrot.lane.b32.xlu0 %v3173_v3, %s3085_s12 }
  0x42   :  { %164 = vrot.lane.b32.xlu2 %v3145_v1, %s3089_s15  ;;  %162 = vrot.lane.b32.xlu1 %v3173_v3, %s3089_s15 }
  0x43   :  { %143 = vrot.lane.b32.xlu0 %v3140_v0, %s3088_s14 }
  0x4a   :  { %202 = vrot.lane.b32.xlu2 %v3150_v2, %s3087_s13  ;;  %181 = vrot.lane.b32.xlu1 %v3150_v2, %s3086_s0 }
  0x4b   :  { %166 = vrot.lane.b32.xlu0 %v3140_v0, %s3089_s15 }
  0x52   :  { %160 = vrot.lane.b32.xlu1 %v3150_v2, %s3089_s15 }
  0x53   :  { %137 = vrot.lane.b32.xlu0 %v3150_v2, %s3088_s14 }
  0x5c   :  { %v3221_v4 = vpop.permute.xlu2 %256 }
  0x64   :  { %v259_v5 = vpop.permute.xlu2 %258 }
  0x65   :  { %v261_v27 = vsel %vm260_vm2, %v3221_v4, %v259_v5 }
  0x66   :  { %v271_v37 = vmul.f32 %v3261_v25, %v261_v27 }
  0x6c   :  { %v280_v8 = vpop.permute.xlu2 %279 }
  0x74   :  { %v301_v10 = vpop.permute.xlu1 %300  ;;  %v3241_v17 = vpop.permute.xlu2 %235 }
  0x75   :  { %v295_v11 = vpop.permute.xlu0 %294 }
  0x76   :  { %v306_v12 = vsel %vm302_vm0, %v301_v10, %v295_v11 }
  0x77   :  { %v314_v13 = vmul.f32 %v3230_v9, %v306_v12 }
  0x79   :  { %v334_v14 = vpack.c.bf16 %v314_v13, %v314_v13  ;;  %v229_v13 = vmul.f32 %v3321_v55, %v3145_v1 }
  0x7b   :  { %v357_v15 = vsel %vm346_vm1, %v334_v14, 0  ;;  %v230_v14 = vmul.f32 %v3324_v56, %v3140_v0 }
  0x7c   :  { %401 = vmatpush.bf16.msra.mxu3 %v357_v15  ;;  %v3243_v18 = vpop.permute.xlu1 %252  ;;  %v276_v35 = vpop.permute.xlu2 %275 }
  0x7d   :  { %v299_v19 = vpop.permute.xlu0 %298  ;;  %v264_v31 = vsel %vm260_vm2, %v259_v5, %v3243_v18 }
  0x7e   :  { %v303_v20 = vsel %vm302_vm0, %v299_v19, %v301_v10  ;;  %v272_v39 = vmul.f32 %v3271_v29, %v264_v31  ;;  %v3343_v10 = vperm.slane %v3251_v22, 5 }
  0x7f   :  { %v313_v21 = vmul.f32 %v3239_v16, %v303_v20 }
  0x80   :  { %5620 = vst [vmem:[#allocation12_spill] sm:$0xff] %v3343_v10 }
  0x81   :  { %v333_v24 = vpack.c.bf16 %v313_v21, %v313_v21 }
  0x83   :  { %v354_v28 = vsel %vm346_vm1, %v333_v24, 0 }
  0x84   :  { %388 = vmatpush.bf16.msra.mxu2 %v354_v28  ;;  %v278_v32 = vpop.permute.xlu1 %277  ;;  %v3315_v53 = vpop.permute.xlu2 %187 }
  0x85   :  { %v282_v33 = vsel %vm281_vm3, %v278_v32, %v280_v8  ;;  %v274_v34 = vpop.permute.xlu0 %273  ;;  %v283_v60 = vsel %vm281_vm3, %v276_v35, %v278_v32 }
  0x86   :  { %v285_v36 = vsel %vm281_vm3, %v280_v8, %v274_v34  ;;  %v292_v38 = vmul.f32 %v3264_v26, %v282_v33  ;;  %v284_v61 = vsel %vm281_vm3, %v274_v34, %v276_v35  ;;  %v291_v24 = vmul.f32 %v3328_v59, %v283_v60 }
  0x87   :  { %v293_v40 = vmul.f32 %v3274_v30, %v285_v36  ;;  %v290_v21 = vmul.f32 %v3318_v54, %v284_v61 }
  0x88   :  { %v329_v41 = vpack.c.bf16 %v292_v38, %v271_v37  ;;  %v3377_v38 = vperm.slane %v3257_v23, 2 }
  0x89   :  { %v330_v42 = vpack.c.bf16 %v293_v40, %v272_v39  ;;  %v3380_v39 = vperm.slane %v3257_v23, 3 }
  0x8a   :  { %389 = vmatpush.bf16.msra.mxu2 %v329_v41  ;;  %5622 = vst [vmem:[#allocation14_spill] sm:$0xff] %v3377_v38  ;;  %v3386_v41 = vperm.slane %v3251_v22, 2 }
  0x8b   :  { %402 = vmatpush.bf16.msra.mxu3 %v330_v42  ;;  %5623 = vst [vmem:[#allocation15_spill] sm:$0xff] %v3380_v39  ;;  %v3389_v42 = vperm.slane %v3251_v22, 3 }
  0x8c   :  { %v3297_v45 = vpop.permute.xlu1 %231  ;;  %v3370_v35 = vpop.permute.xlu2 %208  ;;  %5624 = vst [vmem:[#allocation16_spill] sm:$0xff] %v3386_v41 }
  0x8d   :  { %v297_v46 = vpop.permute.xlu0 %296  ;;  %5625 = vst [vmem:[#allocation17_spill] sm:$0xff] %v3389_v42 }
  0x8e   :  { %v305_v48 = vsel %vm302_vm0, %v295_v11, %v297_v46  ;;  %v304_v49 = vsel %vm302_vm0, %v297_v46, %v299_v19  ;;  %v3346_v11 = vperm.slane %v3257_v23, 5 }
  0x8f   :  { %v311_v51 = vmul.f32 %v3290_v43, %v305_v48  ;;  %v312_v52 = vmul.f32 %v3295_v44, %v304_v49 }
  0x90   :  { %5621 = vst [vmem:[#allocation13_spill] sm:$0xff] %v3346_v11 }
  0x91   :  { %v331_v57 = vpack.c.bf16 %v311_v51, %v311_v51  ;;  %v332_v58 = vpack.c.bf16 %v312_v52, %v312_v52 }
  0x93   :  { %v348_v5 = vsel %vm346_vm1, %v331_v57, 0  ;;  %v351_v8 = vsel %vm346_vm1, %v332_v58, 0 }
  0x94   :  { %362 = vmatpush.bf16.msra.mxu0 %v348_v5  ;;  %375 = vmatpush.bf16.msra.mxu1 %v351_v8  ;;  %v255_v12 = vpop.permute.xlu1 %254  ;;  %v3391_v46 = vpop.permute.xlu2 %141 }
  0x95   :  { %v262_v15 = vsel %vm260_vm2, %v255_v12, %v3221_v4  ;;  %v263_v19 = vsel %vm260_vm2, %v3243_v18, %v255_v12  ;;  %v238_v20 = vpop.permute.xlu0 %237 }
  0x96   :  { %v240_v1 = vsel %vm239_vm4, %v3241_v17, %v238_v20  ;;  %v243_v0 = vsel %vm239_vm4, %v238_v20, %v3297_v45  ;;  %v269_v27 = vmul.f32 %v3335_v62, %v263_v19  ;;  %v270_v4 = vmul.f32 %v3338_v63, %v262_v15 }
  0x97   :  { %v250_v28 = vmul.f32 %v3343_v10, %v240_v1  ;;  %v251_v18 = vmul.f32 %v3346_v11, %v243_v0  ;;  %v3412_v15 = vperm.slane %v3302_v47, 5  ;;  %v3415_v19 = vperm.slane %v3311_v50, 5 }
  0x98   :  { %v327_v31 = vpack.c.bf16 %v290_v21, %v269_v27  ;;  %v328_v32 = vpack.c.bf16 %v291_v24, %v270_v4 }
  0x99   :  { %v325_v33 = vpack.c.bf16 %v250_v28, %v229_v13  ;;  %v326_v34 = vpack.c.bf16 %v251_v18, %v230_v14  ;;  %v3406_v13 = vperm.slane %v3302_v47, 4  ;;  %v3409_v14 = vperm.slane %v3311_v50, 4  ;;  %5628 = vst [vmem:[#allocation20_spill] sm:$0xff] %v3412_v15  ;;  %v336_v28 = vld [vmem:[%s5528_s2] sm:$0xff] }
  0x9a   :  { %363 = vmatpush.bf16.msra.mxu0 %v327_v31  ;;  %376 = vmatpush.bf16.msra.mxu1 %v328_v32  ;;  %5629 = vst [vmem:[#allocation21_spill] sm:$0xff] %v3415_v19  ;;  %v3090_v31 = vmov 0   ;;  %v3440_v32 = vperm.slane %v3251_v22, 1 }
  0x9b   :  { %390 = vmatpush.bf16.msra.mxu2 %v325_v33  ;;  %403 = vmatpush.bf16.msra.mxu3 %v326_v34  ;;  %5626 = vst [vmem:[#allocation18_spill] sm:$0xff] %v3406_v13  ;;  %v227_v24 = vmul.f32 %v3406_v13, %v3150_v2  ;;  %v228_v1 = vmul.f32 %v3409_v14, %v3173_v3 }
  0x9c   :  { %v186_v36 = vpop.permute.xlu1 %185  ;;  %5627 = vst [vmem:[#allocation19_spill] sm:$0xff] %v3409_v14  ;;  %v165_v0 = vpop.permute.xlu2 %164  ;;  %3050 = vset.pattern.permute.xlu2 %v3090_v31  ;;  %3051 = vset.pattern.permute.xlu0 %v3090_v31 }
  0x9d   :  { %v3372_v37 = vpop.permute.xlu0 %183  ;;  %v190_v40 = vsel %vm189_vm5, %v186_v36, %v3315_v53  ;;  %339 = vperm.xlu2 %3050, %v336_v28   ;;  %3052 = vset.pattern.permute.xlu1 %v3090_v31  ;;  %5631 = vst [vmem:[#allocation23_spill] sm:$0xff] %v3440_v32 }
  0x9e   :  { %v191_v48 = vsel %vm189_vm5, %v3372_v37, %v186_v36  ;;  %v201_v58 = vmul.f32 %v3377_v38, %v190_v40 }
  0x9f   :  { %v200_v61 = vmul.f32 %v3386_v41, %v191_v48 }
  0xa4   :  { %v207_v49 = vpop.permute.xlu1 %206 }
  0xa5   :  { %v211_v51 = vsel %vm210_vm6, %v207_v49, %v3370_v35  ;;  %v205_v52 = vpop.permute.xlu0 %204 }
  0xa6   :  { %v212_v57 = vsel %vm210_vm6, %v205_v52, %v207_v49  ;;  %v222_v60 = vmul.f32 %v3380_v39, %v211_v51  ;;  %v203_v51 = vpop.permute.xlu2 %202 }
  0xa7   :  { %v221_v5 = vmul.f32 %v3389_v42, %v212_v57 }
  0xa8   :  { %v322_v8 = vpack.c.bf16 %v222_v60, %v201_v58  ;;  %v3454_v58 = vperm.slane %v3311_v50, 3  ;;  %v214_v60 = vsel %vm210_vm6, %v3370_v35, %v203_v51  ;;  %v3474_v35 = vperm.slane %v3257_v23, 1 }
  0xa9   :  { %v321_v12 = vpack.c.bf16 %v221_v5, %v200_v61  ;;  %v3460_v61 = vperm.slane %v3302_v47, 2  ;;  %v3463_v5 = vperm.slane %v3311_v50, 2 }
  0xaa   :  { %404 = vmatpush.bf16.msra.mxu3 %v322_v8  ;;  %5633 = vst [vmem:[#allocation25_spill] sm:$0xff] %v3454_v58  ;;  %v335_v8 = vld [vmem:[%s5529_s1] sm:$0xf] }
  0xab   :  { %391 = vmatpush.bf16.msra.mxu2 %v321_v12  ;;  %5634 = vst [vmem:[#allocation26_spill] sm:$0xff] %v3460_v61  ;;  %v213_v12 = vsel %vm210_vm6, %v203_v51, %v205_v52 }
  0xac   :  { %v3417_v20 = vpop.permute.xlu1 %139  ;;  %5635 = vst [vmem:[#allocation27_spill] sm:$0xff] %v3463_v5 }
  0xad   :  { %v234_v21 = vpop.permute.xlu0 %233  ;;  %v149_v33 = vsel %vm147_vm7, %v3417_v20, %v3391_v46  ;;  %5637 = vst [vmem:[#allocation29_spill] sm:$0xff] %v3474_v35 }
  0xae   :  { %v241_v27 = vsel %vm239_vm4, %v234_v21, %v3241_v17  ;;  %v242_v4 = vsel %vm239_vm4, %v3297_v45, %v234_v21  ;;  %v3437_v45 = vperm.slane %v3251_v22, 0  ;;  %v3451_v22 = vperm.slane %v3302_v47, 3 }
  0xaf   :  { %v248_v18 = vmul.f32 %v3412_v15, %v242_v4  ;;  %v249_v2 = vmul.f32 %v3415_v19, %v241_v27  ;;  %v3471_v21 = vperm.slane %v3257_v23, 0 }
  0xb0   :  { %5630 = vst [vmem:[#allocation22_spill] sm:$0xff] %v3437_v45  ;;  %v158_v48 = vmul.f32 %v3437_v45, %v149_v33  ;;  %v219_v28 = vmul.f32 %v3451_v22, %v214_v60  ;;  %v3495_v33 = vperm.slane %v3302_v47, 1 }
  0xb1   :  { %v323_v3 = vpack.c.bf16 %v248_v18, %v227_v24  ;;  %v324_v17 = vpack.c.bf16 %v249_v2, %v228_v1  ;;  %5632 = vst [vmem:[#allocation24_spill] sm:$0xff] %v3451_v22  ;;  %v220_v2 = vmul.f32 %v3454_v58, %v213_v12 }
  0xb2   :  { %5636 = vst [vmem:[#allocation28_spill] sm:$0xff] %v3471_v21 }
  0xb3   :  { %364 = vmatpush.bf16.msra.mxu0 %v323_v3  ;;  %377 = vmatpush.bf16.msra.mxu1 %v324_v17  ;;  %5638 = vst [vmem:[#allocation30_spill] sm:$0xff] %v3495_v33 }
  0xb4   :  { %v163_v34 = vpop.permute.xlu1 %162 }
  0xb5   :  { %v170_v36 = vsel %vm168_vm8, %v163_v34, %v165_v0  ;;  %v144_v40 = vpop.permute.xlu0 %143 }
  0xb6   :  { %v179_v49 = vmul.f32 %v3440_v32, %v170_v36  ;;  %v148_v24 = vsel %vm147_vm7, %v3391_v46, %v144_v40  ;;  %v3501_v36 = vperm.slane %v3302_v47, 0 }
  0xb8   :  { %v317_v57 = vpack.c.bf16 %v179_v49, %v158_v48  ;;  %5640 = vst [vmem:[#allocation32_spill] sm:$0xff] %v3501_v36  ;;  %v3504_v48 = vperm.slane %v3311_v50, 0 }
  0xba   :  { %392 = vmatpush.bf16.msra.mxu2 %v317_v57  ;;  %5641 = vst [vmem:[#allocation33_spill] sm:$0xff] %v3504_v48 }
  0xbc   :  { %v182_v1 = vpop.permute.xlu1 %181 }
  0xbd   :  { %v192_v27 = vsel %vm189_vm5, %v182_v1, %v3372_v37  ;;  %v193_v4 = vsel %vm189_vm5, %v3315_v53, %v182_v1  ;;  %v167_v52 = vpop.permute.xlu0 %166  ;;  %2663 = vmatmul.msk.bf16.vlgmr.msra.gmra.mxu2 %vm342_vm9, %v335_v8  ;;  %v159_v37 = vmul.f32 %v3471_v21, %v148_v24 }
  0xbe   :  { %v169_v23 = vsel %vm168_vm8, %v165_v0, %v167_v52  ;;  %v198_v18 = vmul.f32 %v3460_v61, %v193_v4  ;;  %v199_v46 = vmul.f32 %v3463_v5, %v192_v27  ;;  %v3498_v0 = vperm.slane %v3311_v50, 1 }
  0xbf   :  { %v180_v31 = vmul.f32 %v3474_v35, %v169_v23 }
  0xc0   :  { %v319_v3 = vpack.c.bf16 %v219_v28, %v198_v18  ;;  %v320_v53 = vpack.c.bf16 %v220_v2, %v199_v46  ;;  %5639 = vst [vmem:[#allocation31_spill] sm:$0xff] %v3498_v0 }
  0xc1   :  { %v318_v17 = vpack.c.bf16 %v180_v31, %v159_v37 }
  0xc2   :  { %365 = vmatpush.bf16.msra.mxu0 %v319_v3  ;;  %378 = vmatpush.bf16.msra.mxu1 %v320_v53 }
  0xc3   :  { %405 = vmatpush.bf16.msra.mxu3 %v318_v17 }
  0xc4   :  { %v161_v49 = vpop.permute.xlu1 %160 }
  0xc5   :  { %v171_v51 = vsel %vm168_vm8, %v161_v49, %v163_v34  ;;  %v172_v57 = vsel %vm168_vm8, %v167_v52, %v161_v49  ;;  %v138_v60 = vpop.permute.xlu0 %137 }
  0xc6   :  { %v150_v12 = vsel %vm147_vm7, %v138_v60, %v3417_v20  ;;  %v151_v24 = vsel %vm147_vm7, %v144_v40, %v138_v60  ;;  %2664 = vmatmul.msk.bf16.vlgmr.msra.gmra.mxu3 %vm342_vm9, %v335_v8  ;;  %v177_v47 = vmul.f32 %v3495_v33, %v172_v57  ;;  %v178_v50 = vmul.f32 %v3498_v0, %v171_v51  ;;  %v568_v60 = vld [vmem:[%s5528_s2 + $0x8] sm:$0xff] }
  0xc7   :  { %v156_v1 = vmul.f32 %v3501_v36, %v151_v24  ;;  %v157_v34 = vmul.f32 %v3504_v48, %v150_v12 }
  0xc9   :  { %v315_v27 = vpack.c.bf16 %v177_v47, %v156_v1  ;;  %v316_v4 = vpack.c.bf16 %v178_v50, %v157_v34 }
  0xcb   :  { %366 = vmatpush.bf16.msra.mxu0 %v315_v27  ;;  %379 = vmatpush.bf16.msra.mxu1 %v316_v4 }
  0xce   :  { %2661 = vmatmul.msk.bf16.vlgmr.msra.gmra.mxu0 %vm342_vm9, %v335_v8  ;;  %2662 = vmatmul.msk.bf16.vlgmr.msra.gmra.mxu1 %vm342_vm9, %v335_v8 }
  0xf7   :  { %v340_v52 = vpop.permute.xlu2 %339 }
 0x140   :  { %v394_v20 = vpop.f32.mrf.mxu2 }
 0x141   :  { %v395_v51 = vadd.f32 %v394_v20, %v340_v52 }
 0x143   :  { %v3552_v57 = vmax.f32 %v395_v51, 0.0 }
 0x148   :  { %v396_v40 = vpop.f32.mrf.mxu2 }
 0x149   :  { %v407_v28 = vpop.f32.mrf.mxu3 }
 0x14a   :  { %v408_v3 = vadd.f32 %v407_v28, %v340_v52 }
 0x14b   :  { %v368_v23 = vpop.f32.mrf.mxu0  ;;  %v381_v18 = vpop.f32.mrf.mxu1 }
 0x14c   :  { %v369_v46 = vadd.f32 %v368_v23, %v340_v52  ;;  %v382_v2 = vadd.f32 %v381_v18, %v340_v52  ;;  %v3532_v49 = vmax.f32 %v408_v3, 0.0 }
 0x14e   :  { %v3522_v37 = vmax.f32 %v369_v46, 0.0  ;;  %v3524_v31 = vmax.f32 %v382_v2, 0.0 }
 0x150   :  { %5642 = vst [vmem:[#allocation34_spill] sm:$0xff] %v3522_v37  ;;  %517 = vrot.lane.b32.xlu2 %v3524_v31, %s3084_s9  ;;  %483 = vrot.lane.b32.xlu1 %v3522_v37, %s3085_s12 }
 0x151   :  { %531 = vrot.lane.b32.xlu0 %v3522_v37, %s3082_s30  ;;  %v409_v8 = vpop.f32.mrf.mxu3 }
 0x153   :  { %v370_v53 = vpop.f32.mrf.mxu0  ;;  %v383_v17 = vpop.f32.mrf.mxu1 }
 0x158   :  { %537 = vrot.lane.b32.xlu2 %v3532_v49, %s3082_s30  ;;  %501 = vrot.lane.b32.xlu1 %v3524_v31, %s3083_s8 }
 0x159   :  { %499 = vrot.lane.b32.xlu0 %v3522_v37, %s3083_s8 }
 0x160   :  { %505 = vrot.lane.b32.xlu2 %v3532_v49, %s3083_s8  ;;  %417 = vrot.lane.b32.xlu1 %v3524_v31, %s3088_s14 }
 0x161   :  { %515 = vrot.lane.b32.xlu0 %v3522_v37, %s3084_s9 }
 0x168   :  { %521 = vrot.lane.b32.xlu2 %v3532_v49, %s3084_s9  ;;  %433 = vrot.lane.b32.xlu1 %v3524_v31, %s3089_s15 }
 0x169   :  { %533 = vrot.lane.b32.xlu0 %v3524_v31, %s3082_s30 }
 0x170   :  { %487 = vrot.lane.b32.xlu2 %v3552_v57, %s3085_s12  ;;  %535 = vrot.lane.b32.xlu1 %v3552_v57, %s3082_s30 }
 0x171   :  { %449 = vrot.lane.b32.xlu0 %v3524_v31, %s3086_s0 }
 0x178   :  { %453 = vrot.lane.b32.xlu2 %v3532_v49, %s3086_s0  ;;  %503 = vrot.lane.b32.xlu1 %v3552_v57, %s3083_s8 }
 0x179   :  { %465 = vrot.lane.b32.xlu0 %v3524_v31, %s3087_s13 }
 0x180   :  { %469 = vrot.lane.b32.xlu2 %v3532_v49, %s3087_s13  ;;  %519 = vrot.lane.b32.xlu1 %v3552_v57, %s3084_s9 }
 0x181   :  { %485 = vrot.lane.b32.xlu0 %v3524_v31, %s3085_s12 }
 0x188   :  { %419 = vrot.lane.b32.xlu2 %v3552_v57, %s3088_s14  ;;  %451 = vrot.lane.b32.xlu1 %v3552_v57, %s3086_s0 }
 0x189   :  { %489 = vrot.lane.b32.xlu0 %v3532_v49, %s3085_s12 }
 0x190   :  { %435 = vrot.lane.b32.xlu2 %v3552_v57, %s3089_s15  ;;  %467 = vrot.lane.b32.xlu1 %v3552_v57, %s3087_s13 }
 0x191   :  { %421 = vrot.lane.b32.xlu0 %v3532_v49, %s3088_s14 }
 0x198   :  { %463 = vrot.lane.b32.xlu2 %v3522_v37, %s3087_s13  ;;  %447 = vrot.lane.b32.xlu1 %v3522_v37, %s3086_s0 }
 0x199   :  { %437 = vrot.lane.b32.xlu0 %v3532_v49, %s3089_s15 }
 0x1a0   :  { %571 = vperm.xlu2 %3050, %v568_v60   ;;  %431 = vrot.lane.b32.xlu1 %v3522_v37, %s3089_s15 }
 0x1a1   :  { %415 = vrot.lane.b32.xlu0 %v3522_v37, %s3088_s14 }
 0x1aa   :  { %v518_v12 = vpop.permute.xlu2 %517 }
 0x1b2   :  { %v538_v24 = vpop.permute.xlu2 %537 }
 0x1ba   :  { %v506_v47 = vpop.permute.xlu2 %505 }
 0x1c2   :  { %v3597_v50 = vpop.permute.xlu1 %483  ;;  %v522_v20 = vpop.permute.xlu2 %521 }
 0x1c3   :  { %v532_v1 = vpop.permute.xlu0 %531 }
 0x1c4   :  { %v542_v34 = vsel %vm302_vm0, %v538_v24, %v532_v1 }
 0x1c5   :  { %v546_v27 = vmul.f32 %v3230_v9, %v542_v34 }
 0x1c7   :  { %v566_v4 = vpack.c.bf16 %v546_v27, %v546_v27 }
 0x1c9   :  { %v587_v40 = vsel %vm346_vm1, %v566_v4, 0 }
 0x1ca   :  { %631 = vmatpush.bf16.msrb.mxu3 %v587_v40  ;;  %v502_v52 = vpop.permute.xlu1 %501  ;;  %v3607_v46 = vpop.permute.xlu2 %487 }
 0x1cb   :  { %v500_v28 = vpop.permute.xlu0 %499 }
 0x1cc   :  { %v510_v23 = vsel %vm260_vm2, %v506_v47, %v500_v28 }
 0x1cd   :  { %v514_v3 = vmul.f32 %v510_v23, %v3271_v29  ;;  %v509_v23 = vsel %vm260_vm2, %v500_v28, %v502_v52 }
 0x1d2   :  { %v3605_v18 = vpop.permute.xlu1 %417  ;;  %v3617_v27 = vpop.permute.xlu2 %453 }
 0x1d3   :  { %v516_v2 = vpop.permute.xlu0 %515 }
 0x1d4   :  { %v526_v8 = vsel %vm281_vm3, %v522_v20, %v516_v2  ;;  %v525_v4 = vsel %vm281_vm3, %v516_v2, %v518_v12 }
 0x1d5   :  { %v530_v53 = vmul.f32 %v526_v8, %v3274_v30  ;;  %v527_v8 = vmul.f32 %v525_v4, %v3318_v54 }
 0x1d7   :  { %v562_v17 = vpack.c.bf16 %v530_v53, %v514_v3 }
 0x1d9   :  { %632 = vmatpush.bf16.msrb.mxu3 %v562_v17  ;;  %v511_v17 = vmul.f32 %v509_v23, %v3335_v62 }
 0x1da   :  { %v3613_v51 = vpop.permute.xlu1 %433 }
 0x1db   :  { %v534_v60 = vpop.permute.xlu0 %533 }
 0x1dc   :  { %v541_v34 = vsel %vm302_vm0, %v532_v1, %v534_v60 }
 0x1dd   :  { %v543_v40 = vmul.f32 %v3290_v43, %v541_v34  ;;  %v559_v34 = vpack.c.bf16 %v527_v8, %v511_v17 }
 0x1df   :  { %v563_v6 = vpack.c.bf16 %v543_v40, %v543_v40 }
 0x1e1   :  { %v578_v3 = vsel %vm346_vm1, %v563_v6, 0 }
 0x1e2   :  { %592 = vmatpush.bf16.msrb.mxu0 %v578_v3  ;;  %v536_v53 = vpop.permute.xlu1 %535  ;;  %v470_v3 = vpop.permute.xlu2 %469 }
 0x1e3   :  { %v539_v1 = vsel %vm302_vm0, %v536_v53, %v538_v24  ;;  %v540_v2 = vsel %vm302_vm0, %v534_v60, %v536_v53  ;;  %v3631_v30 = vpop.permute.xlu0 %449 }
 0x1e4   :  { %v544_v28 = vmul.f32 %v3295_v44, %v540_v2  ;;  %v545_v40 = vmul.f32 %v3239_v16, %v539_v1 }
 0x1e6   :  { %593 = vmatpush.bf16.msrb.mxu0 %v559_v34  ;;  %v564_v4 = vpack.c.bf16 %v544_v28, %v544_v28  ;;  %v565_v6 = vpack.c.bf16 %v545_v40, %v545_v40 }
 0x1e8   :  { %v581_v54 = vsel %vm346_vm1, %v564_v4, 0  ;;  %v584_v23 = vsel %vm346_vm1, %v565_v6, 0 }
 0x1e9   :  { %605 = vmatpush.bf16.msrb.mxu1 %v581_v54  ;;  %618 = vmatpush.bf16.msrb.mxu2 %v584_v23 }
 0x1ea   :  { %v504_v24 = vpop.permute.xlu1 %503  ;;  %v420_v53 = vpop.permute.xlu2 %419 }
 0x1eb   :  { %v466_v62 = vpop.permute.xlu0 %465  ;;  %v507_v60 = vsel %vm260_vm2, %v504_v24, %v506_v47  ;;  %v508_v8 = vsel %vm260_vm2, %v502_v52, %v504_v24 }
 0x1ec   :  { %v512_v54 = vmul.f32 %v508_v8, %v3338_v63  ;;  %v513_v28 = vmul.f32 %v507_v60, %v3261_v25  ;;  %v480_v8 = vmul.f32 %v3524_v31, %v3409_v14 }
 0x1f2   :  { %v520_v17 = vpop.permute.xlu1 %519 }
 0x1f3   :  { %v523_v1 = vsel %vm281_vm3, %v520_v17, %v522_v20  ;;  %v524_v2 = vsel %vm281_vm3, %v518_v12, %v520_v17  ;;  %v486_v34 = vpop.permute.xlu0 %485  ;;  %v479_v12 = vmul.f32 %v3522_v37, %v3406_v13 }
 0x1f4   :  { %v492_v47 = vsel %vm239_vm4, %v486_v34, %v3607_v46  ;;  %v493_v52 = vsel %vm239_vm4, %v3597_v50, %v486_v34  ;;  %v528_v40 = vmul.f32 %v524_v2, %v3328_v59  ;;  %v529_v20 = vmul.f32 %v523_v1, %v3264_v26  ;;  %v436_v34 = vpop.permute.xlu2 %435 }
 0x1f5   :  { %v495_v4 = vmul.f32 %v493_v52, %v3412_v15  ;;  %v496_v24 = vmul.f32 %v492_v47, %v3415_v19  ;;  %v482_v52 = vmul.f32 %v3532_v49, %v3324_v56 }
 0x1f6   :  { %v560_v6 = vpack.c.bf16 %v528_v40, %v512_v54  ;;  %v561_v23 = vpack.c.bf16 %v529_v20, %v513_v28  ;;  %v481_v28 = vmul.f32 %v3552_v57, %v3321_v55 }
 0x1f7   :  { %v555_v60 = vpack.c.bf16 %v495_v4, %v479_v12  ;;  %v556_v2 = vpack.c.bf16 %v496_v24, %v480_v8 }
 0x1f8   :  { %606 = vmatpush.bf16.msrb.mxu1 %v560_v6  ;;  %619 = vmatpush.bf16.msrb.mxu2 %v561_v23 }
 0x1f9   :  { %594 = vmatpush.bf16.msrb.mxu0 %v555_v60 }
 0x1fa   :  { %v452_v17 = vpop.permute.xlu1 %451 }
 0x1fb   :  { %v490_v1 = vpop.permute.xlu0 %489 }
 0x1fc   :  { %v491_v37 = vsel %vm239_vm4, %v3607_v46, %v490_v1  ;;  %v494_v54 = vsel %vm239_vm4, %v490_v1, %v3597_v50  ;;  %607 = vmatpush.bf16.msrb.mxu1 %v556_v2  ;;  %v455_v46 = vsel %vm189_vm5, %v452_v17, %v3617_v27  ;;  %v456_v50 = vsel %vm189_vm5, %v3631_v30, %v452_v17 }
 0x1fd   :  { %v497_v47 = vmul.f32 %v491_v37, %v3343_v10  ;;  %v498_v40 = vmul.f32 %v494_v54, %v3346_v11  ;;  %v440_v37 = vsel %vm168_vm8, %v3613_v51, %v436_v34  ;;  %v461_v60 = vmul.f32 %v456_v50, %v3386_v41  ;;  %v464_v54 = vpop.permute.xlu2 %463 }
 0x1fe   :  { %v462_v17 = vmul.f32 %v455_v46, %v3377_v38  ;;  %v424_v1 = vsel %vm147_vm7, %v3605_v18, %v420_v53 }
 0x1ff   :  { %v557_v20 = vpack.c.bf16 %v497_v47, %v481_v28  ;;  %v558_v12 = vpack.c.bf16 %v498_v40, %v482_v52  ;;  %v445_v52 = vmul.f32 %v440_v37, %v3440_v32  ;;  %v474_v40 = vsel %vm210_vm6, %v470_v3, %v464_v54 }
 0x201   :  { %620 = vmatpush.bf16.msrb.mxu2 %v557_v20  ;;  %633 = vmatpush.bf16.msrb.mxu3 %v558_v12  ;;  %v429_v20 = vmul.f32 %v424_v1, %v3437_v45  ;;  %v473_v12 = vsel %vm210_vm6, %v464_v54, %v466_v62 }
 0x202   :  { %v468_v4 = vpop.permute.xlu1 %467 }
 0x203   :  { %v471_v6 = vsel %vm210_vm6, %v468_v4, %v470_v3  ;;  %v472_v23 = vsel %vm210_vm6, %v466_v62, %v468_v4  ;;  %v422_v24 = vpop.permute.xlu0 %421  ;;  %v549_v4 = vpack.c.bf16 %v445_v52, %v429_v20  ;;  %v567_v62 = vld [vmem:[%s5529_s1 + $0x10] sm:$0xf] }
 0x204   :  { %v477_v8 = vmul.f32 %v472_v23, %v3389_v42  ;;  %v478_v2 = vmul.f32 %v471_v6, %v3380_v39  ;;  %v423_v46 = vsel %vm147_vm7, %v420_v53, %v422_v24  ;;  %v475_v23 = vmul.f32 %v474_v40, %v3451_v22 }
 0x206   :  { %v553_v28 = vpack.c.bf16 %v477_v8, %v461_v60  ;;  %v554_v47 = vpack.c.bf16 %v478_v2, %v462_v17  ;;  %v430_v17 = vmul.f32 %v423_v46, %v3471_v21 }
 0x208   :  { %621 = vmatpush.bf16.msrb.mxu2 %v553_v28  ;;  %634 = vmatpush.bf16.msrb.mxu3 %v554_v47 }
 0x20a   :  { %v448_v50 = vpop.permute.xlu1 %447 }
 0x20b   :  { %v457_v6 = vsel %vm189_vm5, %v448_v50, %v3631_v30  ;;  %v458_v3 = vsel %vm189_vm5, %v3617_v27, %v448_v50  ;;  %v438_v37 = vpop.permute.xlu0 %437  ;;  %v476_v30 = vmul.f32 %v473_v12, %v3454_v58 }
 0x20c   :  { %v439_v60 = vsel %vm168_vm8, %v436_v34, %v438_v37  ;;  %622 = vmatpush.bf16.msrb.mxu2 %v549_v4  ;;  %v459_v53 = vmul.f32 %v458_v3, %v3460_v61  ;;  %v460_v8 = vmul.f32 %v457_v6, %v3463_v5  ;;  %v572_v3 = vpop.permute.xlu2 %571 }
 0x20d   :  { %v446_v27 = vmul.f32 %v439_v60, %v3474_v35 }
 0x20e   :  { %v551_v2 = vpack.c.bf16 %v475_v23, %v459_v53  ;;  %v552_v1 = vpack.c.bf16 %v476_v30, %v460_v8 }
 0x20f   :  { %2667 = vmatmul.msk.bf16.vlgmr.msrb.gmra.mxu2 %vm342_vm9, %v567_v62  ;;  %v550_v34 = vpack.c.bf16 %v446_v27, %v430_v17 }
 0x210   :  { %595 = vmatpush.bf16.msrb.mxu0 %v551_v2  ;;  %608 = vmatpush.bf16.msrb.mxu1 %v552_v1 }
 0x211   :  { %635 = vmatpush.bf16.msrb.mxu3 %v550_v34 }
 0x212   :  { %v432_v54 = vpop.permute.xlu1 %431 }
 0x213   :  { %v441_v28 = vsel %vm168_vm8, %v432_v54, %v3613_v51  ;;  %v442_v47 = vsel %vm168_vm8, %v438_v37, %v432_v54  ;;  %v416_v52 = vpop.permute.xlu0 %415 }
 0x214   :  { %v425_v40 = vsel %vm147_vm7, %v416_v52, %v3605_v18  ;;  %v426_v20 = vsel %vm147_vm7, %v422_v24, %v416_v52  ;;  %2668 = vmatmul.msk.bf16.vlgmr.msrb.gmra.mxu3 %vm342_vm9, %v567_v62  ;;  %v443_v12 = vmul.f32 %v442_v47, %v3495_v33  ;;  %v444_v46 = vmul.f32 %v441_v28, %v3498_v0  ;;  %v798_v47 = vld [vmem:[%s5528_s2 + $0x10] sm:$0xff] }
 0x215   :  { %v427_v50 = vmul.f32 %v426_v20, %v3501_v36  ;;  %v428_v51 = vmul.f32 %v425_v40, %v3504_v48 }
 0x217   :  { %v547_v4 = vpack.c.bf16 %v443_v12, %v427_v50  ;;  %v548_v6 = vpack.c.bf16 %v444_v46, %v428_v51 }
 0x219   :  { %596 = vmatpush.bf16.msrb.mxu0 %v547_v4  ;;  %609 = vmatpush.bf16.msrb.mxu1 %v548_v6 }
 0x21c   :  { %2665 = vmatmul.msk.bf16.vlgmr.msrb.gmra.mxu0 %vm342_vm9, %v567_v62  ;;  %2666 = vmatmul.msk.bf16.vlgmr.msrb.gmra.mxu1 %vm342_vm9, %v567_v62 }
 0x292   :  { %v624_v18 = vpop.f32.mrf.mxu2 }
 0x293   :  { %v625_v54 = vadd.f32 %v624_v18, %v572_v3 }
 0x295   :  { %v3766_v28 = vmax.f32 %v625_v54, 0.0 }
 0x297   :  { %v637_v24 = vpop.f32.mrf.mxu3 }
 0x298   :  { %v638_v27 = vadd.f32 %v637_v24, %v572_v3 }
 0x299   :  { %v598_v37 = vpop.f32.mrf.mxu0  ;;  %v611_v23 = vpop.f32.mrf.mxu1 }
 0x29a   :  { %v599_v60 = vadd.f32 %v598_v37, %v572_v3  ;;  %v612_v53 = vadd.f32 %v611_v23, %v572_v3  ;;  %v626_v8 = vpop.f32.mrf.mxu2  ;;  %v3746_v34 = vmax.f32 %v638_v27, 0.0 }
 0x29c   :  { %v3736_v30 = vmax.f32 %v599_v60, 0.0  ;;  %v3738_v17 = vmax.f32 %v612_v53, 0.0 }
 0x29e   :  { %747 = vrot.lane.b32.xlu2 %v3738_v17, %s3084_s9  ;;  %713 = vrot.lane.b32.xlu1 %v3736_v30, %s3085_s12 }
 0x29f   :  { %761 = vrot.lane.b32.xlu0 %v3736_v30, %s3082_s30  ;;  %v639_v62 = vpop.f32.mrf.mxu3 }
 0x2a1   :  { %v600_v2 = vpop.f32.mrf.mxu0  ;;  %v613_v1 = vpop.f32.mrf.mxu1 }
 0x2a6   :  { %767 = vrot.lane.b32.xlu2 %v3746_v34, %s3082_s30  ;;  %679 = vrot.lane.b32.xlu1 %v3738_v17, %s3086_s0 }
 0x2a7   :  { %729 = vrot.lane.b32.xlu0 %v3736_v30, %s3083_s8 }
 0x2ae   :  { %735 = vrot.lane.b32.xlu2 %v3746_v34, %s3083_s8  ;;  %695 = vrot.lane.b32.xlu1 %v3738_v17, %s3087_s13 }
 0x2af   :  { %745 = vrot.lane.b32.xlu0 %v3736_v30, %s3084_s9 }
 0x2b6   :  { %751 = vrot.lane.b32.xlu2 %v3746_v34, %s3084_s9  ;;  %731 = vrot.lane.b32.xlu1 %v3738_v17, %s3083_s8 }
 0x2b7   :  { %763 = vrot.lane.b32.xlu0 %v3738_v17, %s3082_s30 }
 0x2be   :  { %717 = vrot.lane.b32.xlu2 %v3766_v28, %s3085_s12  ;;  %765 = vrot.lane.b32.xlu1 %v3766_v28, %s3082_s30 }
 0x2bf   :  { %647 = vrot.lane.b32.xlu0 %v3738_v17, %s3088_s14 }
 0x2c6   :  { %681 = vrot.lane.b32.xlu2 %v3766_v28, %s3086_s0  ;;  %733 = vrot.lane.b32.xlu1 %v3766_v28, %s3083_s8 }
 0x2c7   :  { %663 = vrot.lane.b32.xlu0 %v3738_v17, %s3089_s15 }
 0x2ce   :  { %697 = vrot.lane.b32.xlu2 %v3766_v28, %s3087_s13  ;;  %749 = vrot.lane.b32.xlu1 %v3766_v28, %s3084_s9 }
 0x2cf   :  { %719 = vrot.lane.b32.xlu0 %v3746_v34, %s3085_s12 }
 0x2d6   :  { %651 = vrot.lane.b32.xlu2 %v3746_v34, %s3088_s14  ;;  %677 = vrot.lane.b32.xlu1 %v3736_v30, %s3086_s0 }
 0x2d7   :  { %683 = vrot.lane.b32.xlu0 %v3746_v34, %s3086_s0 }
 0x2de   :  { %667 = vrot.lane.b32.xlu2 %v3746_v34, %s3089_s15  ;;  %649 = vrot.lane.b32.xlu1 %v3766_v28, %s3088_s14 }
 0x2df   :  { %699 = vrot.lane.b32.xlu0 %v3746_v34, %s3087_s13 }
 0x2e6   :  { %693 = vrot.lane.b32.xlu2 %v3736_v30, %s3087_s13  ;;  %665 = vrot.lane.b32.xlu1 %v3766_v28, %s3089_s15 }
 0x2e7   :  { %715 = vrot.lane.b32.xlu0 %v3738_v17, %s3085_s12 }
 0x2ee   :  { %801 = vperm.xlu2 %3050, %v798_v47   ;;  %661 = vrot.lane.b32.xlu1 %v3736_v30, %s3089_s15 }
 0x2ef   :  { %645 = vrot.lane.b32.xlu0 %v3736_v30, %s3088_s14 }
 0x2f8   :  { %v748_v52 = vpop.permute.xlu2 %747 }
 0x300   :  { %v768_v40 = vpop.permute.xlu2 %767 }
 0x308   :  { %v736_v46 = vpop.permute.xlu2 %735 }
 0x310   :  { %v3811_v20 = vpop.permute.xlu1 %713  ;;  %v752_v3 = vpop.permute.xlu2 %751 }
 0x311   :  { %v762_v12 = vpop.permute.xlu0 %761 }
 0x312   :  { %v772_v50 = vsel %vm302_vm0, %v768_v40, %v762_v12 }
 0x313   :  { %v776_v51 = vmul.f32 %v3230_v9, %v772_v50  ;;  %v5643_v9 = vld [vmem:[#allocation5_spill] sm:$0xff] }
 0x315   :  { %v796_v4 = vpack.c.bf16 %v776_v51, %v776_v51 }
 0x317   :  { %v817_v6 = vsel %vm346_vm1, %v796_v4, 0 }
 0x318   :  { %861 = vmatpush.bf16.msra.mxu3 %v817_v6  ;;  %v3817_v18 = vpop.permute.xlu1 %679  ;;  %v3827_v2 = vpop.permute.xlu2 %717 }
 0x319   :  { %v730_v24 = vpop.permute.xlu0 %729 }
 0x31a   :  { %v740_v37 = vsel %vm260_vm2, %v736_v46, %v730_v24 }
 0x31b   :  { %v744_v8 = vmul.f32 %v740_v37, %v3271_v29  ;;  %v5644_v37 = vld [vmem:[#allocation10_spill] sm:$0xff] }
 0x320   :  { %v3821_v23 = vpop.permute.xlu1 %695 }
 0x321   :  { %v746_v60 = vpop.permute.xlu0 %745 }
 0x322   :  { %v756_v53 = vsel %vm281_vm3, %v752_v3, %v746_v60  ;;  %v755_v4 = vsel %vm281_vm3, %v746_v60, %v748_v52 }
 0x323   :  { %v760_v62 = vmul.f32 %v756_v53, %v5643_v9 }
 0x325   :  { %v792_v27 = vpack.c.bf16 %v760_v62, %v744_v8  ;;  %v682_v62 = vpop.permute.xlu2 %681 }
 0x327   :  { %862 = vmatpush.bf16.msra.mxu3 %v792_v27  ;;  %v5645_v27 = vld [vmem:[#allocation6_spill] sm:$0xff] }
 0x328   :  { %v732_v1 = vpop.permute.xlu1 %731  ;;  %v757_v9 = vmul.f32 %v755_v4, %v5645_v27 }
 0x329   :  { %v764_v54 = vpop.permute.xlu0 %763  ;;  %v739_v50 = vsel %vm260_vm2, %v730_v24, %v732_v1 }
 0x32a   :  { %v771_v47 = vsel %vm302_vm0, %v762_v12, %v764_v54  ;;  %v741_v53 = vmul.f32 %v739_v50, %v5644_v37 }
 0x32b   :  { %v773_v51 = vmul.f32 %v3290_v43, %v771_v47 }
 0x32c   :  { %v789_v50 = vpack.c.bf16 %v757_v9, %v741_v53 }
 0x32d   :  { %v793_v6 = vpack.c.bf16 %v773_v51, %v773_v51 }
 0x32f   :  { %v808_v8 = vsel %vm346_vm1, %v793_v6, 0 }
 0x330   :  { %822 = vmatpush.bf16.msra.mxu0 %v808_v8  ;;  %v766_v29 = vpop.permute.xlu1 %765 }
 0x331   :  { %v769_v12 = vsel %vm302_vm0, %v766_v29, %v768_v40  ;;  %v770_v24 = vsel %vm302_vm0, %v764_v54, %v766_v29  ;;  %v3843_v43 = vpop.permute.xlu0 %647  ;;  %v698_v29 = vpop.permute.xlu2 %697 }
 0x332   :  { %v774_v60 = vmul.f32 %v3295_v44, %v770_v24  ;;  %v775_v47 = vmul.f32 %v3239_v16, %v769_v12 }
 0x334   :  { %v794_v51 = vpack.c.bf16 %v774_v60, %v774_v60  ;;  %v795_v6 = vpack.c.bf16 %v775_v47, %v775_v47  ;;  %823 = vmatpush.bf16.msra.mxu0 %v789_v50 }
 0x336   :  { %v811_v4 = vsel %vm346_vm1, %v794_v51, 0  ;;  %v814_v8 = vsel %vm346_vm1, %v795_v6, 0 }
 0x337   :  { %835 = vmatpush.bf16.msra.mxu1 %v811_v4  ;;  %848 = vmatpush.bf16.msra.mxu2 %v814_v8 }
 0x338   :  { %v734_v40 = vpop.permute.xlu1 %733 }
 0x339   :  { %v3849_v37 = vpop.permute.xlu0 %663  ;;  %v738_v54 = vsel %vm260_vm2, %v732_v1, %v734_v40  ;;  %v737_v16 = vsel %vm260_vm2, %v734_v40, %v736_v46  ;;  %v3871_v51 = vpop.permute.xlu2 %651  ;;  %v702_v40 = vsel %vm210_vm6, %v3821_v23, %v698_v29 }
 0x33a   :  { %v742_v9 = vmul.f32 %v738_v54, %v3338_v63  ;;  %v743_v60 = vmul.f32 %v737_v16, %v3261_v25  ;;  %v711_v16 = vmul.f32 %v3766_v28, %v3321_v55 }
 0x340   :  { %v750_v44 = vpop.permute.xlu1 %749 }
 0x341   :  { %v753_v53 = vsel %vm281_vm3, %v750_v44, %v752_v3  ;;  %v754_v12 = vsel %vm281_vm3, %v748_v52, %v750_v44  ;;  %v720_v24 = vpop.permute.xlu0 %719  ;;  %v712_v3 = vmul.f32 %v3746_v34, %v3324_v56  ;;  %v686_v34 = vsel %vm189_vm5, %v3817_v18, %v682_v62 }
 0x342   :  { %v758_v47 = vmul.f32 %v754_v12, %v3328_v59  ;;  %v759_v50 = vmul.f32 %v753_v53, %v3264_v26  ;;  %v721_v46 = vsel %vm239_vm4, %v3827_v2, %v720_v24  ;;  %v724_v1 = vsel %vm239_vm4, %v720_v24, %v3811_v20 }
 0x343   :  { %v727_v52 = vmul.f32 %v721_v46, %v3343_v10  ;;  %v728_v6 = vmul.f32 %v724_v1, %v3346_v11  ;;  %v707_v44 = vmul.f32 %v702_v40, %v3389_v42  ;;  %v691_v24 = vmul.f32 %v686_v34, %v3386_v41 }
 0x344   :  { %v790_v4 = vpack.c.bf16 %v758_v47, %v742_v9  ;;  %v791_v8 = vpack.c.bf16 %v759_v50, %v743_v60  ;;  %v668_v47 = vpop.permute.xlu2 %667 }
 0x345   :  { %v788_v54 = vpack.c.bf16 %v728_v6, %v712_v3  ;;  %v787_v9 = vpack.c.bf16 %v727_v52, %v711_v16  ;;  %v783_v60 = vpack.c.bf16 %v707_v44, %v691_v24  ;;  %v709_v16 = vmul.f32 %v3736_v30, %v3406_v13 }
 0x346   :  { %836 = vmatpush.bf16.msra.mxu1 %v790_v4  ;;  %849 = vmatpush.bf16.msra.mxu2 %v791_v8 }
 0x347   :  { %863 = vmatpush.bf16.msra.mxu3 %v788_v54 }
 0x348   :  { %v678_v53 = vpop.permute.xlu1 %677 }
 0x349   :  { %v684_v12 = vpop.permute.xlu0 %683  ;;  %v687_v40 = vsel %vm189_vm5, %v678_v53, %v3817_v18 }
 0x34a   :  { %850 = vmatpush.bf16.msra.mxu2 %v787_v9  ;;  %v685_v50 = vsel %vm189_vm5, %v682_v62, %v684_v12 }
 0x34b   :  { %v692_v3 = vmul.f32 %v685_v50, %v3377_v38 }
 0x34c   :  { %v694_v62 = vpop.permute.xlu2 %693 }
 0x34e   :  { %851 = vmatpush.bf16.msra.mxu2 %v783_v60 }
 0x350   :  { %v650_v28 = vpop.permute.xlu1 %649 }
 0x351   :  { %v700_v46 = vpop.permute.xlu0 %699  ;;  %v654_v52 = vsel %vm147_vm7, %v3843_v43, %v650_v28  ;;  %v653_v8 = vsel %vm147_vm7, %v650_v28, %v3871_v51 }
 0x352   :  { %v701_v1 = vsel %vm210_vm6, %v698_v29, %v700_v46  ;;  %v659_v29 = vmul.f32 %v654_v52, %v3437_v45  ;;  %v660_v34 = vmul.f32 %v653_v8, %v3471_v21  ;;  %v704_v44 = vsel %vm210_vm6, %v700_v46, %v694_v62 }
 0x353   :  { %v708_v6 = vmul.f32 %v701_v1, %v3380_v39  ;;  %v703_v46 = vsel %vm210_vm6, %v694_v62, %v3821_v23  ;;  %v690_v52 = vmul.f32 %v687_v40, %v3463_v5  ;;  %v797_v62 = vld [vmem:[%s5529_s1 + $0x20] sm:$0xf] }
 0x354   :  { %v706_v23 = vmul.f32 %v703_v46, %v3454_v58  ;;  %v802_v46 = vpop.permute.xlu2 %801 }
 0x355   :  { %v784_v4 = vpack.c.bf16 %v708_v6, %v692_v3  ;;  %v710_v6 = vmul.f32 %v3738_v17, %v3409_v14 }
 0x357   :  { %864 = vmatpush.bf16.msra.mxu3 %v784_v4 }
 0x358   :  { %v666_v54 = vpop.permute.xlu1 %665 }
 0x359   :  { %v669_v9 = vsel %vm168_vm8, %v666_v54, %v668_v47  ;;  %v670_v24 = vsel %vm168_vm8, %v3849_v37, %v666_v54  ;;  %v716_v60 = vpop.permute.xlu0 %715 }
 0x35a   :  { %v675_v18 = vmul.f32 %v670_v24, %v3440_v32  ;;  %v676_v50 = vmul.f32 %v669_v9, %v3474_v35  ;;  %v722_v30 = vsel %vm239_vm4, %v716_v60, %v3827_v2  ;;  %v723_v28 = vsel %vm239_vm4, %v3811_v20, %v716_v60 }
 0x35b   :  { %v725_v1 = vmul.f32 %v723_v28, %v3412_v15  ;;  %v726_v3 = vmul.f32 %v722_v30, %v3415_v19  ;;  %v688_v2 = vsel %vm189_vm5, %v684_v12, %v678_v53  ;;  %v705_v20 = vmul.f32 %v704_v44, %v3451_v22 }
 0x35c   :  { %v779_v4 = vpack.c.bf16 %v675_v18, %v659_v29  ;;  %v780_v8 = vpack.c.bf16 %v676_v50, %v660_v34  ;;  %v689_v17 = vmul.f32 %v688_v2, %v3460_v61  ;;  %v782_v53 = vpack.c.bf16 %v706_v23, %v690_v52 }
 0x35d   :  { %v785_v54 = vpack.c.bf16 %v725_v1, %v709_v16  ;;  %v786_v9 = vpack.c.bf16 %v726_v3, %v710_v6  ;;  %v5646_v6 = vld [vmem:[#allocation34_spill] sm:$0xff] }
 0x35e   :  { %852 = vmatpush.bf16.msra.mxu2 %v779_v4  ;;  %865 = vmatpush.bf16.msra.mxu3 %v780_v8  ;;  %v781_v34 = vpack.c.bf16 %v705_v20, %v689_v17 }
 0x35f   :  { %824 = vmatpush.bf16.msra.mxu0 %v785_v54  ;;  %837 = vmatpush.bf16.msra.mxu1 %v786_v9 }
 0x360   :  { %v662_v40 = vpop.permute.xlu1 %661 }
 0x361   :  { %v671_v12 = vsel %vm168_vm8, %v662_v40, %v3849_v37  ;;  %v672_v29 = vsel %vm168_vm8, %v668_v47, %v662_v40  ;;  %v646_v16 = vpop.permute.xlu0 %645  ;;  %2671 = vmatmul.msk.bf16.vlgmr.msra.gmra.mxu2 %vm342_vm9, %v797_v62  ;;  %2672 = vmatmul.msk.bf16.vlgmr.msra.gmra.mxu3 %vm342_vm9, %v797_v62 }
 0x362   :  { %v673_v44 = vmul.f32 %v672_v29, %v3495_v33  ;;  %v674_v24 = vmul.f32 %v671_v12, %v3498_v0  ;;  %v655_v60 = vsel %vm147_vm7, %v646_v16, %v3843_v43  ;;  %v656_v37 = vsel %vm147_vm7, %v3871_v51, %v646_v16 }
 0x363   :  { %v657_v47 = vmul.f32 %v656_v37, %v3501_v36  ;;  %v658_v18 = vmul.f32 %v655_v60, %v3504_v48  ;;  %825 = vmatpush.bf16.msra.mxu0 %v781_v34  ;;  %838 = vmatpush.bf16.msra.mxu1 %v782_v53 }
 0x365   :  { %v777_v50 = vpack.c.bf16 %v673_v44, %v657_v47  ;;  %v778_v30 = vpack.c.bf16 %v674_v24, %v658_v18  ;;  %v3074_v24 = vld [vmem:[%s5527_s3 + $0x20] ss:$0 sm:$0xff] }
 0x367   :  { %826 = vmatpush.bf16.msra.mxu0 %v777_v50  ;;  %839 = vmatpush.bf16.msra.mxu1 %v778_v30 }
 0x36a   :  { %2669 = vmatmul.msk.bf16.vlgmr.msra.gmra.mxu0 %vm342_vm9, %v797_v62  ;;  %2670 = vmatmul.msk.bf16.vlgmr.msra.gmra.mxu1 %vm342_vm9, %v797_v62 }
 0x3e4   :  { %v854_v28 = vpop.f32.mrf.mxu2  ;;  %v867_v43 = vpop.f32.mrf.mxu3 }
 0x3e5   :  { %v855_v17 = vadd.f32 %v854_v28, %v802_v46  ;;  %v868_v40 = vadd.f32 %v867_v43, %v802_v46 }
 0x3e7   :  { %v828_v1 = vpop.f32.mrf.mxu0  ;;  %v841_v3 = vpop.f32.mrf.mxu1  ;;  %v874_v53 = vadd.f32 %v868_v40, %v3532_v49  ;;  %v1033_v49 = vld [vmem:[%s5528_s2 + $0x18] sm:$0xff] }
 0x3e8   :  { %v829_v51 = vadd.f32 %v828_v1, %v802_v46  ;;  %v842_v4 = vadd.f32 %v841_v3, %v802_v46 }
 0x3e9   :  { %v3982_v29 = vmax.f32 %v874_v53, 0.0 }
 0x3ea   :  { %v871_v52 = vadd.f32 %v829_v51, %v5646_v6  ;;  %v872_v23 = vadd.f32 %v842_v4, %v3524_v31  ;;  %v873_v31 = vadd.f32 %v855_v17, %v3552_v57  ;;  %v5651_v4 = vld [vmem:[#allocation10_spill] sm:$0xff] }
 0x3eb   :  { %5650 = vst [vmem:[#allocation37_spill] sm:$0xff] %v3982_v29 }
 0x3ec   :  { %v3955_v2 = vmax.f32 %v871_v52, 0.0  ;;  %v856_v8 = vpop.f32.mrf.mxu2  ;;  %v869_v20 = vpop.f32.mrf.mxu3  ;;  %v3964_v62 = vmax.f32 %v872_v23, 0.0  ;;  %v3980_v12 = vmax.f32 %v873_v31, 0.0  ;;  %v3075_v31 = vld [vmem:[%s5527_s3 + $0x28] ss:$0 sm:$0xff] }
 0x3ee   :  { %5647 = vst [vmem:[#allocation34_spill] sm:$0xff] %v3955_v2  ;;  %947 = vrot.lane.b32.xlu0 %v3955_v2, %s3085_s12  ;;  %963 = vrot.lane.b32.xlu1 %v3955_v2, %s3083_s8 }
 0x3ef   :  { %995 = vrot.lane.b32.xlu2 %v3955_v2, %s3082_s30  ;;  %v830_v54 = vpop.f32.mrf.mxu0  ;;  %v843_v9 = vpop.f32.mrf.mxu1  ;;  %5648 = vst [vmem:[#allocation35_spill] sm:$0xff] %v3964_v62 }
 0x3f0   :  { %5649 = vst [vmem:[#allocation36_spill] sm:$0xff] %v3980_v12 }
 0x3f6   :  { %929 = vrot.lane.b32.xlu0 %v3964_v62, %s3087_s13  ;;  %913 = vrot.lane.b32.xlu1 %v3964_v62, %s3086_s0 }
 0x3f7   :  { %979 = vrot.lane.b32.xlu2 %v3955_v2, %s3084_s9 }
 0x3fe   :  { %881 = vrot.lane.b32.xlu0 %v3964_v62, %s3088_s14  ;;  %965 = vrot.lane.b32.xlu1 %v3964_v62, %s3083_s8 }
 0x3ff   :  { %997 = vrot.lane.b32.xlu2 %v3964_v62, %s3082_s30 }
 0x406   :  { %999 = vrot.lane.b32.xlu0 %v3980_v12, %s3082_s30  ;;  %1001 = vrot.lane.b32.xlu1 %v3982_v29, %s3082_s30 }
 0x407   :  { %981 = vrot.lane.b32.xlu2 %v3964_v62, %s3084_s9 }
 0x40e   :  { %967 = vrot.lane.b32.xlu0 %v3980_v12, %s3083_s8  ;;  %969 = vrot.lane.b32.xlu1 %v3982_v29, %s3083_s8 }
 0x40f   :  { %897 = vrot.lane.b32.xlu2 %v3964_v62, %s3089_s15 }
 0x416   :  { %985 = vrot.lane.b32.xlu0 %v3982_v29, %s3084_s9  ;;  %953 = vrot.lane.b32.xlu1 %v3982_v29, %s3085_s12 }
 0x417   :  { %983 = vrot.lane.b32.xlu2 %v3980_v12, %s3084_s9 }
 0x41e   :  { %951 = vrot.lane.b32.xlu0 %v3980_v12, %s3085_s12  ;;  %931 = vrot.lane.b32.xlu1 %v3980_v12, %s3087_s13 }
 0x41f   :  { %915 = vrot.lane.b32.xlu2 %v3980_v12, %s3086_s0 }
 0x426   :  { %933 = vrot.lane.b32.xlu0 %v3982_v29, %s3087_s13  ;;  %883 = vrot.lane.b32.xlu1 %v3980_v12, %s3088_s14 }
 0x427   :  { %917 = vrot.lane.b32.xlu2 %v3982_v29, %s3086_s0 }
 0x42e   :  { %899 = vrot.lane.b32.xlu0 %v3980_v12, %s3089_s15  ;;  %911 = vrot.lane.b32.xlu1 %v3955_v2, %s3086_s0 }
 0x42f   :  { %901 = vrot.lane.b32.xlu2 %v3982_v29, %s3089_s15 }
 0x436   :  { %949 = vrot.lane.b32.xlu0 %v3964_v62, %s3085_s12  ;;  %885 = vrot.lane.b32.xlu1 %v3982_v29, %s3088_s14 }
 0x437   :  { %927 = vrot.lane.b32.xlu2 %v3955_v2, %s3087_s13 }
 0x43e   :  { %879 = vrot.lane.b32.xlu0 %v3955_v2, %s3088_s14  ;;  %895 = vrot.lane.b32.xlu1 %v3955_v2, %s3089_s15 }
 0x43f   :  { %1037 = vperm.xlu2 %3050, %v1033_v49   ;;  %v3076_v49 = vld [vmem:[%s5527_s3 + $0x30] ss:$0 sm:$0xff] }
 0x449   :  { %v996_v57 = vpop.permute.xlu2 %995 }
 0x451   :  { %v980_v16 = vpop.permute.xlu2 %979 }
 0x459   :  { %v998_v34 = vpop.permute.xlu2 %997 }
 0x45a   :  { %v1005_v44 = vsel %vm302_vm0, %v996_v57, %v998_v34 }
 0x45b   :  { %v1007_v60 = vmul.f32 %v3074_v24, %v1005_v44 }
 0x45d   :  { %v1027_v37 = vpack.c.bf16 %v1007_v60, %v1007_v60 }
 0x45f   :  { %v1054_v47 = vsel %vm346_vm1, %v1027_v37, 0 }
 0x460   :  { %1068 = vmatpush.bf16.msrb.mxu0 %v1054_v47  ;;  %v4039_v18 = vpop.permute.xlu0 %947  ;;  %v964_v50 = vpop.permute.xlu1 %963 }
 0x461   :  { %v982_v30 = vpop.permute.xlu2 %981 }
 0x462   :  { %v989_v46 = vsel %vm281_vm3, %v980_v16, %v982_v30 }
 0x463   :  { %v991_v6 = vmul.f32 %v989_v46, %v5645_v27 }
 0x468   :  { %v4041_v28 = vpop.permute.xlu0 %929  ;;  %v4043_v43 = vpop.permute.xlu1 %913 }
 0x469   :  { %v4052_v52 = vpop.permute.xlu2 %897 }
 0x470   :  { %v4047_v1 = vpop.permute.xlu0 %881  ;;  %v966_v3 = vpop.permute.xlu1 %965 }
 0x471   :  { %v973_v51 = vsel %vm260_vm2, %v964_v50, %v966_v3  ;;  %v984_v60 = vpop.permute.xlu2 %983 }
 0x472   :  { %v975_v8 = vmul.f32 %v973_v51, %v5651_v4 }
 0x474   :  { %v1023_v20 = vpack.c.bf16 %v991_v6, %v975_v8  ;;  %v988_v8 = vsel %vm281_vm3, %v982_v30, %v984_v60 }
 0x476   :  { %1069 = vmatpush.bf16.msrb.mxu0 %v1023_v20 }
 0x478   :  { %v1000_v54 = vpop.permute.xlu0 %999  ;;  %v1002_v9 = vpop.permute.xlu1 %1001 }
 0x479   :  { %v1004_v23 = vsel %vm302_vm0, %v998_v34, %v1000_v54  ;;  %v1003_v17 = vsel %vm302_vm0, %v1000_v54, %v1002_v9  ;;  %v1006_v40 = vsel %vm302_vm0, %v1002_v9, %v996_v57  ;;  %v3077_v34 = vld [vmem:[%s5527_s3 + $0x38] ss:$0 sm:$0xff] }
 0x47a   :  { %v1008_v53 = vmul.f32 %v3075_v31, %v1004_v23  ;;  %v1009_v44 = vmul.f32 %v3076_v49, %v1003_v17  ;;  %v1010_v24 = vmul.f32 %v3077_v34, %v1006_v40  ;;  %v992_v23 = vmul.f32 %v988_v8, %v3328_v59 }
 0x47c   :  { %v1028_v37 = vpack.c.bf16 %v1008_v53, %v1008_v53  ;;  %v1029_v47 = vpack.c.bf16 %v1009_v44, %v1009_v44  ;;  %v1030_v46 = vpack.c.bf16 %v1010_v24, %v1010_v24  ;;  %v916_v44 = vpop.permute.xlu2 %915 }
 0x47e   :  { %v1057_v57 = vsel %vm346_vm1, %v1028_v37, 0  ;;  %v1060_v51 = vsel %vm346_vm1, %v1029_v47, 0  ;;  %v1063_v6 = vsel %vm346_vm1, %v1030_v46, 0  ;;  %v5652_v47 = vld [vmem:[#allocation4_spill] sm:$0xff] }
 0x47f   :  { %1082 = vmatpush.bf16.msrb.mxu1 %v1057_v57  ;;  %1096 = vmatpush.bf16.msrb.mxu2 %v1060_v51 }
 0x480   :  { %1110 = vmatpush.bf16.msrb.mxu3 %v1063_v6  ;;  %v968_v20 = vpop.permute.xlu0 %967  ;;  %v970_v54 = vpop.permute.xlu1 %969 }
 0x481   :  { %v972_v9 = vsel %vm260_vm2, %v966_v3, %v968_v20  ;;  %v971_v31 = vsel %vm260_vm2, %v968_v20, %v970_v54  ;;  %v974_v30 = vsel %vm260_vm2, %v970_v54, %v964_v50  ;;  %v5653_v50 = vld [vmem:[#allocation5_spill] sm:$0xff] }
 0x482   :  { %v976_v17 = vmul.f32 %v972_v9, %v3338_v63  ;;  %v977_v37 = vmul.f32 %v971_v31, %v3261_v25  ;;  %v978_v46 = vmul.f32 %v974_v30, %v5652_v47  ;;  %v945_v31 = vmul.f32 %v3980_v12, %v3321_v55 }
 0x483   :  { %v920_v30 = vsel %vm189_vm5, %v4043_v43, %v916_v44 }
 0x484   :  { %v1024_v40 = vpack.c.bf16 %v992_v23, %v976_v17 }
 0x486   :  { %1083 = vmatpush.bf16.msrb.mxu1 %v1024_v40 }
 0x488   :  { %v986_v53 = vpop.permute.xlu0 %985  ;;  %v954_v49 = vpop.permute.xlu1 %953 }
 0x489   :  { %v987_v34 = vsel %vm281_vm3, %v984_v60, %v986_v53  ;;  %v990_v3 = vsel %vm281_vm3, %v986_v53, %v980_v16  ;;  %v958_v24 = vsel %vm239_vm4, %v954_v49, %v4039_v18  ;;  %v946_v16 = vmul.f32 %v3982_v29, %v3324_v56  ;;  %v918_v53 = vpop.permute.xlu2 %917 }
 0x48a   :  { %v993_v57 = vmul.f32 %v987_v34, %v3264_v26  ;;  %v994_v51 = vmul.f32 %v990_v3, %v5653_v50  ;;  %v962_v6 = vmul.f32 %v958_v24, %v3346_v11  ;;  %v919_v24 = vsel %vm189_vm5, %v916_v44, %v918_v53 }
 0x48c   :  { %v1025_v8 = vpack.c.bf16 %v993_v57, %v977_v37  ;;  %v1026_v20 = vpack.c.bf16 %v994_v51, %v978_v46  ;;  %v1022_v9 = vpack.c.bf16 %v962_v6, %v946_v16  ;;  %v926_v6 = vmul.f32 %v919_v24, %v3377_v38 }
 0x48e   :  { %1097 = vmatpush.bf16.msrb.mxu2 %v1025_v8  ;;  %1111 = vmatpush.bf16.msrb.mxu3 %v1026_v20  ;;  %v1034_v20 = vld [vmem:[%s5528_s2 + $0x20] sm:$0xff] }
 0x48f   :  { %1042 = vperm.xlu0 %3051, %v1034_v20  }
 0x490   :  { %v952_v60 = vpop.permute.xlu0 %951  ;;  %v932_v54 = vpop.permute.xlu1 %931 }
 0x491   :  { %v955_v23 = vsel %vm239_vm4, %v952_v60, %v954_v49  ;;  %v936_v17 = vsel %vm210_vm6, %v4041_v28, %v932_v54  ;;  %v925_v49 = vmul.f32 %v920_v30, %v3386_v41  ;;  %v2675_v30 = vld [vmem:[%s5529_s1 + $0x30] sm:$0xf] }
 0x492   :  { %v961_v40 = vmul.f32 %v955_v23, %v3343_v10  ;;  %1112 = vmatpush.bf16.msrb.mxu3 %v1022_v9  ;;  %v941_v34 = vmul.f32 %v936_v17, %v3389_v42  ;;  %v902_v9 = vpop.permute.xlu2 %901 }
 0x494   :  { %v1021_v3 = vpack.c.bf16 %v961_v40, %v945_v31  ;;  %v1017_v57 = vpack.c.bf16 %v941_v34, %v925_v49  ;;  %v3031_v34 = vld [vmem:[%s5529_s1 + $0x34] sm:$0xf0] }
 0x495   :  { %v4138_v24 = vor.u32 %v3031_v34, %v2675_v30 }
 0x496   :  { %1098 = vmatpush.bf16.msrb.mxu2 %v1021_v3  ;;  %v4136_v3 = vld [vmem:[%s5530_s5 + $0xb8] sm:$0xff] }
 0x498   :  { %v934_v37 = vpop.permute.xlu0 %933  ;;  %v884_v46 = vpop.permute.xlu1 %883 }
 0x499   :  { %v935_v51 = vsel %vm210_vm6, %v932_v54, %v934_v37  ;;  %v888_v44 = vsel %vm147_vm7, %v4047_v1, %v884_v46 }
 0x49a   :  { %v942_v8 = vmul.f32 %v935_v51, %v3380_v39  ;;  %1099 = vmatpush.bf16.msrb.mxu2 %v1017_v57  ;;  %v893_v40 = vmul.f32 %v888_v44, %v3437_v45  ;;  %v928_v57 = vpop.permute.xlu2 %927  ;;  %v943_v44 = vmul.f32 %v3955_v2, %v3406_v13 }
 0x49c   :  { %v1018_v16 = vpack.c.bf16 %v942_v8, %v926_v6  ;;  %v4146_v6 = vld [vmem:[%s5530_s5 + $0xb0] sm:$0xff] }
 0x49e   :  { %1113 = vmatpush.bf16.msrb.mxu3 %v1018_v16 }
 0x4a0   :  { %v900_v23 = vpop.permute.xlu0 %899  ;;  %v912_v17 = vpop.permute.xlu1 %911 }
 0x4a1   :  { %v904_v54 = vsel %vm168_vm8, %v4052_v52, %v900_v23  ;;  %v903_v51 = vsel %vm168_vm8, %v900_v23, %v902_v9  ;;  %v922_v8 = vsel %vm189_vm5, %v918_v53, %v912_v17  ;;  %v921_v23 = vsel %vm189_vm5, %v912_v17, %v4043_v43  ;;  %v4180_v17 = vld [vmem:[%s5530_s5 + $0xa8] sm:$0xff] }
 0x4a2   :  { %v909_v31 = vmul.f32 %v904_v54, %v3440_v32  ;;  %v944_v54 = vmul.f32 %v3964_v62, %v3409_v14  ;;  %v910_v30 = vmul.f32 %v903_v51, %v3474_v35  ;;  %v924_v51 = vmul.f32 %v921_v23, %v3463_v5 }
 0x4a4   :  { %v1013_v49 = vpack.c.bf16 %v909_v31, %v893_v40 }
 0x4a6   :  { %1100 = vmatpush.bf16.msrb.mxu2 %v1013_v49 }
 0x4a8   :  { %v950_v20 = vpop.permute.xlu0 %949  ;;  %v886_v16 = vpop.permute.xlu1 %885 }
 0x4a9   :  { %v956_v40 = vsel %vm239_vm4, %v950_v20, %v952_v60  ;;  %v957_v31 = vsel %vm239_vm4, %v4039_v18, %v950_v20  ;;  %v887_v53 = vsel %vm147_vm7, %v884_v46, %v886_v16  ;;  %2679 = vmatmul.msk.bf16.vlgmr.msrb.gmra.mxu2 %vm342_vm9, %v4138_v24  ;;  %v937_v60 = vsel %vm210_vm6, %v928_v57, %v4041_v28  ;;  %v4186_v28 = vld [vmem:[%s5530_s5 + $0xf8] sm:$0xff] }
 0x4aa   :  { %1353 = vmatpush.bf16.msra.mxu2 %v4136_v3  ;;  %v959_v34 = vmul.f32 %v957_v31, %v3412_v15  ;;  %v960_v49 = vmul.f32 %v956_v40, %v3415_v19  ;;  %v894_v43 = vmul.f32 %v887_v53, %v3471_v21  ;;  %v938_v18 = vsel %vm210_vm6, %v934_v37, %v928_v57 }
 0x4ab   :  { %v923_v46 = vmul.f32 %v922_v8, %v3460_v61  ;;  %v940_v37 = vmul.f32 %v937_v60, %v3454_v58  ;;  %v939_v57 = vmul.f32 %v938_v18, %v3451_v22 }
 0x4ac   :  { %v1019_v20 = vpack.c.bf16 %v959_v34, %v943_v44  ;;  %v1020_v40 = vpack.c.bf16 %v960_v49, %v944_v54  ;;  %v1014_v31 = vpack.c.bf16 %v910_v30, %v894_v43  ;;  %v4195_v54 = vld [vmem:[%s5530_s5 + $0xa0] sm:$0xff]  ;;  %v4200_v30 = vld [vmem:[%s5530_s5 + $0xf0] sm:$0xff] }
 0x4ad   :  { %v1015_v23 = vpack.c.bf16 %v939_v57, %v923_v46  ;;  %v1016_v44 = vpack.c.bf16 %v940_v37, %v924_v51  ;;  %v4241_v37 = vld [vmem:[%s5530_s5 + $0x90] sm:$0xff]  ;;  %v4246_v57 = vld [vmem:[%s5530_s5 + $0xe0] sm:$0xff] }
 0x4ae   :  { %1354 = vmatpush.bf16.msra.mxu2 %v4146_v6  ;;  %1070 = vmatpush.bf16.msrb.mxu0 %v1019_v20 }
 0x4af   :  { %1084 = vmatpush.bf16.msrb.mxu1 %v1020_v40  ;;  %1114 = vmatpush.bf16.msrb.mxu3 %v1014_v31  ;;  %v2974_v40 = vld [vmem:[%s5530_s5 + $0x38] sm:$0xff] }
 0x4b0   :  { %v880_v8 = vpop.permute.xlu0 %879  ;;  %v896_v53 = vpop.permute.xlu1 %895  ;;  %v2982_v31 = vld [vmem:[%s5530_s5 + $0x78] sm:$0xff] }
 0x4b1   :  { %v889_v34 = vsel %vm147_vm7, %v880_v8, %v4047_v1  ;;  %v890_v49 = vsel %vm147_vm7, %v886_v16, %v880_v8  ;;  %v905_v43 = vsel %vm168_vm8, %v896_v53, %v4052_v52  ;;  %v906_v60 = vsel %vm168_vm8, %v902_v9, %v896_v53  ;;  %v4223_v52 = vld [vmem:[%s5530_s5 + $0x98] sm:$0xff]  ;;  %v4228_v9 = vld [vmem:[%s5530_s5 + $0xe8] sm:$0xff]  ;;  %v2973_v8 = vld [vmem:[%s5530_s5 + $0x30] sm:$0xff] }
 0x4b2   :  { %1355 = vmatpush.bf16.msra.mxu2 %v4180_v17  ;;  %v891_v18 = vmul.f32 %v890_v49, %v3501_v36  ;;  %v892_v46 = vmul.f32 %v889_v34, %v3504_v48  ;;  %v907_v51 = vmul.f32 %v906_v60, %v3495_v33  ;;  %v908_v20 = vmul.f32 %v905_v43, %v3498_v0  ;;  %v2981_v53 = vld [vmem:[%s5530_s5 + $0x70] sm:$0xff]  ;;  %v2972_v49 = vld [vmem:[%s5530_s5 + $0x28] sm:$0xff] }
 0x4b3   :  { %1367 = vmatpush.bf16.msra.mxu3 %v4186_v28  ;;  %1071 = vmatpush.bf16.msrb.mxu0 %v1015_v23  ;;  %v4263_v23 = vld [vmem:[%s5530_s5 + $0x88] sm:$0xff]  ;;  %v4280_v34 = vld [vmem:[%s5530_s5 + $0xd0] sm:$0xff] }
 0x4b4   :  { %2680 = vmatmul.msk.bf16.vlgmr.msrb.gmra.mxu3 %vm342_vm9, %v4138_v24  ;;  %1085 = vmatpush.bf16.msrb.mxu1 %v1016_v44  ;;  %v1011_v1 = vpack.c.bf16 %v907_v51, %v891_v18  ;;  %v1012_v16 = vpack.c.bf16 %v908_v20, %v892_v46  ;;  %v4268_v44 = vld [vmem:[%s5530_s5 + $0xd8] sm:$0xff]  ;;  %v2980_v43 = vld [vmem:[%s5530_s5 + $0x68] sm:$0xff]  ;;  %v2971_v18 = vld [vmem:[%s5530_s5 + $0x20] sm:$0xff] }
 0x4b5   :  { %v4293_v60 = vld [vmem:[%s5530_s5 + $0xc8] sm:$0xff]  ;;  %v2979_v46 = vld [vmem:[%s5530_s5 + $0x60] sm:$0xff]  ;;  %v2970_v20 = vld [vmem:[%s5530_s5 + $0x18] sm:$0xff] }
 0x4b6   :  { %1356 = vmatpush.bf16.msra.mxu2 %v4195_v54  ;;  %v4305_v51 = vld [vmem:[%s5530_s5 + $0xc0] sm:$0xff] }
 0x4b7   :  { %1368 = vmatpush.bf16.msra.mxu3 %v4200_v30  ;;  %1072 = vmatpush.bf16.msrb.mxu0 %v1011_v1  ;;  %v2978_v1 = vld [vmem:[%s5530_s5 + $0x58] sm:$0xff] }
 0x4b8   :  { %1086 = vmatpush.bf16.msrb.mxu1 %v1012_v16  ;;  %v2969_v16 = vld [vmem:[%s5530_s5 + $0x10] sm:$0xff] }
 0x4ba   :  { %1357 = vmatpush.bf16.msra.mxu2 %v4223_v52  ;;  %2677 = vmatmul.msk.bf16.vlgmr.msrb.gmra.mxu0 %vm342_vm9, %v4138_v24 }
 0x4bb   :  { %1369 = vmatpush.bf16.msra.mxu3 %v4228_v9  ;;  %1325 = vmatpush.bf16.msra.mxu0 %v2974_v40 }
 0x4bc   :  { %1339 = vmatpush.bf16.msra.mxu1 %v2982_v31 }
 0x4bd   :  { %2678 = vmatmul.msk.bf16.vlgmr.msrb.gmra.mxu1 %vm342_vm9, %v4138_v24  ;;  %v4275_v24 = vld [vmem:[%s5530_s5 + $0x80] sm:$0xff] }
 0x4be   :  { %1358 = vmatpush.bf16.msra.mxu2 %v4241_v37 }
 0x4bf   :  { %1370 = vmatpush.bf16.msra.mxu3 %v4246_v57  ;;  %1326 = vmatpush.bf16.msra.mxu0 %v2973_v8 }
 0x4c0   :  { %1340 = vmatpush.bf16.msra.mxu1 %v2981_v53 }
 0x4c2   :  { %1359 = vmatpush.bf16.msra.mxu2 %v4263_v23 }
 0x4c3   :  { %1371 = vmatpush.bf16.msra.mxu3 %v4268_v44  ;;  %1327 = vmatpush.bf16.msra.mxu0 %v2972_v49 }
 0x4c4   :  { %1341 = vmatpush.bf16.msra.mxu1 %v2980_v43 }
 0x4c6   :  { %1360 = vmatpush.bf16.msra.mxu2 %v4275_v24 }
 0x4c7   :  { %1372 = vmatpush.bf16.msra.mxu3 %v4280_v34  ;;  %1328 = vmatpush.bf16.msra.mxu0 %v2971_v18 }
 0x4c8   :  { %1342 = vmatpush.bf16.msra.mxu1 %v2979_v46 }
 0x4ca   :  { %1508 = vmatpush.bf16.msrb.mxu2 %v2974_v40  ;;  %v2977_v40 = vld [vmem:[%s5530_s5 + $0x50] sm:$0xff] }
 0x4cb   :  { %1373 = vmatpush.bf16.msra.mxu3 %v4293_v60  ;;  %1329 = vmatpush.bf16.msra.mxu0 %v2970_v20 }
 0x4cc   :  { %1343 = vmatpush.bf16.msra.mxu1 %v2978_v1 }
 0x4ce   :  { %1509 = vmatpush.bf16.msrb.mxu2 %v2973_v8  ;;  %v2976_v8 = vld [vmem:[%s5530_s5 + $0x48] sm:$0xff] }
 0x4cf   :  { %1374 = vmatpush.bf16.msra.mxu3 %v4305_v51  ;;  %1330 = vmatpush.bf16.msra.mxu0 %v2969_v16 }
 0x4d0   :  { %1344 = vmatpush.bf16.msra.mxu1 %v2977_v40 }
 0x4d2   :  { %1510 = vmatpush.bf16.msrb.mxu2 %v2972_v49  ;;  %v2975_v49 = vld [vmem:[%s5530_s5 + $0x40] sm:$0xff] }
 0x4d3   :  { %1521 = vmatpush.bf16.msrb.mxu3 %v2982_v31  ;;  %v2968_v31 = vld [vmem:[%s5530_s5 + $0x8] sm:$0xff] }
 0x4d4   :  { %1331 = vmatpush.bf16.msra.mxu0 %v2968_v31  ;;  %1345 = vmatpush.bf16.msra.mxu1 %v2976_v8 }
 0x4d6   :  { %1511 = vmatpush.bf16.msrb.mxu2 %v2971_v18  ;;  %v1038_v18 = vpop.permute.xlu2 %1037 }
 0x4d7   :  { %1522 = vmatpush.bf16.msrb.mxu3 %v2981_v53  ;;  %v2967_v53 = vld [vmem:[%s5530_s5] sm:$0xff]  ;;  %s3091_s5 = smov 120  }
 0x4d8   :  { %1332 = vmatpush.bf16.msra.mxu0 %v2967_v53  ;;  %1346 = vmatpush.bf16.msra.mxu1 %v2975_v49 }
 0x4da   :  { %1512 = vmatpush.bf16.msrb.mxu2 %v2970_v20 }
 0x4db   :  { %1523 = vmatpush.bf16.msrb.mxu3 %v2980_v43 }
 0x4de   :  { %1513 = vmatpush.bf16.msrb.mxu2 %v2969_v16 }
 0x4df   :  { %1524 = vmatpush.bf16.msrb.mxu3 %v2979_v46 }
 0x4e2   :  { %1514 = vmatpush.bf16.msrb.mxu2 %v2968_v31 }
 0x4e3   :  { %1525 = vmatpush.bf16.msrb.mxu3 %v2978_v1 }
 0x4e6   :  { %1515 = vmatpush.bf16.msrb.mxu2 %v2967_v53 }
 0x4e7   :  { %1526 = vmatpush.bf16.msrb.mxu3 %v2977_v40 }
 0x4eb   :  { %1527 = vmatpush.bf16.msrb.mxu3 %v2976_v8 }
 0x4ef   :  { %1528 = vmatpush.bf16.msrb.mxu3 %v2975_v49 }
 0x501   :  { %v1043_v20 = vpop.permute.xlu0 %1042 }
 0x52c   :  { %v1102_v43 = vpop.f32.mrf.mxu2 }
 0x52d   :  { %v1103_v16 = vadd.f32 %v1102_v43, %v1038_v18 }
 0x52f   :  { %v1123_v35 = vmax.f32 %v1103_v16, 0.0 }
 0x534   :  { %v1104_v46 = vpop.f32.mrf.mxu2 }
 0x535   :  { %v1105_v31 = vadd.f32 %v1104_v46, %v1043_v20 }
 0x537   :  { %v1116_v21 = vpop.f32.mrf.mxu3  ;;  %v1127_v38 = vmax.f32 %v1105_v31, 0.0  ;;  %v1074_v45 = vpop.f32.mrf.mxu0 }
 0x538   :  { %v1117_v41 = vadd.f32 %v1116_v21, %v1038_v18  ;;  %v1075_v11 = vadd.f32 %v1074_v45, %v1038_v18 }
 0x539   :  { %v1131_v56 = vpack.c.bf16 %v1127_v38, %v1123_v35  ;;  %v1505_v38 = vpack.c.bf16 %v3964_v62, %v3964_v62 }
 0x53a   :  { %v1088_v32 = vpop.f32.mrf.mxu1  ;;  %v1124_v49 = vmax.f32 %v1117_v41, 0.0  ;;  %v1121_v36 = vmax.f32 %v1075_v11, 0.0 }
 0x53b   :  { %1361 = vmatmul.bf16.vlgmr.msra.gmra.mxu2 %v1131_v56  ;;  %v1089_v1 = vadd.f32 %v1088_v32, %v1038_v18  ;;  %v1504_v56 = vpack.c.bf16 %v3955_v2, %v3955_v2 }
 0x53d   :  { %v1122_v46 = vmax.f32 %v1089_v1, 0.0 }
 0x53f   :  { %v1118_v53 = vpop.f32.mrf.mxu3  ;;  %v1076_v55 = vpop.f32.mrf.mxu0 }
 0x540   :  { %v1119_v40 = vadd.f32 %v1118_v53, %v1043_v20  ;;  %v1077_v48 = vadd.f32 %v1076_v55, %v1043_v20 }
 0x542   :  { %v1090_v8 = vpop.f32.mrf.mxu1  ;;  %v1128_v10 = vmax.f32 %v1119_v40, 0.0  ;;  %v1125_v16 = vmax.f32 %v1077_v48, 0.0 }
 0x543   :  { %v1091_v43 = vadd.f32 %v1090_v8, %v1043_v20 }
 0x544   :  { %v1132_v25 = vpack.c.bf16 %v1128_v10, %v1124_v49  ;;  %v1129_v0 = vpack.c.bf16 %v1125_v16, %v1121_v36 }
 0x545   :  { %v1126_v31 = vmax.f32 %v1091_v43, 0.0 }
 0x546   :  { %1375 = vmatmul.bf16.vlgmr.msra.gmra.mxu3 %v1132_v25  ;;  %1333 = vmatmul.bf16.vlgmr.msra.gmra.mxu0 %v1129_v0  ;;  %v4341_v0 = vld [vmem:[%s5531_s4] sm:$0xff] }
 0x547   :  { %v1130_v33 = vpack.c.bf16 %v1126_v31, %v1122_v46  ;;  %v1409_v20 = vperm.slane %v4341_v0, 4 }
 0x549   :  { %1347 = vmatmul.bf16.vlgmr.msra.gmra.mxu1 %v1130_v33 }
 0x54b   :  { %1516 = vmatmul.bf16.vlgmr.msrb.gmra.mxu2 %v1504_v56  ;;  %v1451_v56 = vld [vmem:[%s5528_s2 + $0x28] sm:$0xff] }
 0x556   :  { %1529 = vmatmul.bf16.vlgmr.msrb.gmra.mxu3 %v1505_v38  ;;  %v1563_v38 = vld [vmem:[%s5528_s2 + $0x40] sm:$0xff] }
 0x5be   :  { %v1362_v55 = vpop.f32.mrf.mxu2 }
 0x5c3   :  { %v1334_v41 = vpop.f32.mrf.mxu0 }
 0x5c6   :  { %v1348_v11 = vpop.f32.mrf.mxu1  ;;  %v1364_v10 = vpop.f32.mrf.mxu2 }
 0x5c7   :  { %v1349_v45 = vadd.f32 %v1348_v11, %v1334_v41 }
 0x5c9   :  { %v1363_v32 = vadd.f32 %v1362_v55, %v1349_v45  ;;  %v1376_v21 = vpop.f32.mrf.mxu3  ;;  %v1562_v55 = vld [vmem:[%s5528_s2 + $0x38] sm:$0xff]  ;;  %v1430_v45 = vperm.slane %v4341_v0, 7 }
 0x5cb   :  { %v1377_v35 = vadd.f32 %v1376_v21, %v1363_v32  ;;  %v1336_v25 = vpop.f32.mrf.mxu0 }
 0x5cd   :  { %1402 = vrot.lane.b32.xlu2 %v1377_v35, %s3087_s13  ;;  %1412 = vrot.lane.b32.xlu0 %v1377_v35, %s3085_s12  ;;  %v4345_v40 = vmul.f32 %v1409_v20, %v1377_v35 }
 0x5ce   :  { %1426 = vrot.lane.b32.xlu1 %v1377_v35, %s3091_s5  ;;  %v1350_v33 = vpop.f32.mrf.mxu1  ;;  %v1517_v18 = vpop.f32.mrf.mxu2 }
 0x5cf   :  { %v1351_v36 = vadd.f32 %v1350_v33, %v1336_v25 }
 0x5d1   :  { %v1365_v48 = vadd.f32 %v1364_v10, %v1351_v36  ;;  %v1378_v53 = vpop.f32.mrf.mxu3  ;;  %v1423_v36 = vperm.slane %v4341_v0, 6 }
 0x5d3   :  { %v1379_v1 = vadd.f32 %v1378_v53, %v1365_v48 }
 0x5d5   :  { %1404 = vrot.lane.b32.xlu0 %v1379_v1, %s3087_s13  ;;  %1428 = vrot.lane.b32.xlu2 %v1379_v1, %s3091_s5  ;;  %v4347_v8 = vmul.f32 %v1409_v20, %v1379_v1 }
 0x5d6   :  { %1419 = vrot.lane.b32.xlu1 %v1377_v35, %s3092_s10  ;;  %v1519_v43 = vpop.f32.mrf.mxu2 }
 0x5d7   :  { %v1444_v49 = vpack.c.bf16 %v4347_v8, %v4345_v40  ;;  %v1416_v40 = vperm.slane %v4341_v0, 5 }
 0x5d9   :  { %v1530_v46 = vpop.f32.mrf.mxu3 }
 0x5da   :  { %v4351_v16 = vadd.f32 %v1530_v46, %v1517_v18 }
 0x5dd   :  { %1388 = vrot.lane.b32.xlu0 %v1377_v35, %s3093_s11  ;;  %1421 = vrot.lane.b32.xlu2 %v1379_v1, %s3092_s10 }
 0x5de   :  { %1414 = vrot.lane.b32.xlu1 %v1379_v1, %s3085_s12 }
 0x5e1   :  { %v1532_v31 = vpop.f32.mrf.mxu3 }
 0x5e5   :  { %1435 = vrot.lane.b32.xlu0 %v1379_v1, %s3094_s16  ;;  %1433 = vrot.lane.b32.xlu2 %v1377_v35, %s3094_s16 }
 0x5e6   :  { %1395 = vrot.lane.b32.xlu1 %v1377_v35, %s3095_s17 }
 0x5ed   :  { %1455 = vperm.xlu0 %3051, %v1451_v56   ;;  %1397 = vrot.lane.b32.xlu2 %v1379_v1, %s3095_s17 }
 0x5ee   :  { %1390 = vrot.lane.b32.xlu1 %v1379_v1, %s3093_s11 }
 0x5f5   :  { %1572 = vperm.xlu0 %3051, %v1563_v38   ;;  %1383 = vrot.lane.b32.xlu2 %v1379_v1, %s3096_s22 }
 0x5f6   :  { %1381 = vrot.lane.b32.xlu1 %v1377_v35, %s3096_s22 }
 0x5fd   :  { %1567 = vperm.xlu2 %3050, %v1562_v55   ;;  %v3057_v55 = vld [vmem:[%s5531_s4 + $0x8] ss:$0 sm:$0xff] }
 0x627   :  { %v1403_v41 = vpop.permute.xlu2 %1402 }
 0x62f   :  { %v1429_v11 = vpop.permute.xlu2 %1428 }
 0x630   :  { %v1432_v21 = vmul.f32 %v1430_v45, %v1429_v11  ;;  %v1406_v11 = vperm.slane %v4341_v0, 3 }
 0x637   :  { %v1422_v48 = vpop.permute.xlu2 %1421 }
 0x638   :  { %v1425_v20 = vmul.f32 %v1423_v36, %v1422_v48  ;;  %v1407_v48 = vmul.f32 %v1406_v11, %v1403_v41 }
 0x63f   :  { %v1413_v10 = vpop.permute.xlu0 %1412  ;;  %v1434_v43 = vpop.permute.xlu2 %1433 }
 0x640   :  { %v1427_v32 = vpop.permute.xlu1 %1426  ;;  %v1417_v31 = vmul.f32 %v1416_v40, %v1413_v10  ;;  %v2813_v10 = vld [vmem:[%s5529_s1 + $0x48] sm:$0xf0] }
 0x641   :  { %v1431_v25 = vmul.f32 %v1430_v45, %v1427_v32 }
 0x643   :  { %v1447_v33 = vpack.c.bf16 %v1432_v21, %v1431_v25  ;;  %v1438_v21 = vmul.f32 %v3057_v55, %v1434_v43 }
 0x645   :  { %1476 = vmatpush.bf16.msrb.mxu0 %v1447_v33 }
 0x647   :  { %v1405_v18 = vpop.permute.xlu0 %1404 }
 0x648   :  { %v1420_v35 = vpop.permute.xlu1 %1419  ;;  %v1408_v45 = vmul.f32 %v1406_v11, %v1405_v18  ;;  %v1385_v11 = vperm.slane %v4341_v0, 0 }
 0x649   :  { %v1424_v53 = vmul.f32 %v1423_v36, %v1420_v35  ;;  %v3032_v36 = vld [vmem:[%s5529_s1 + $0x44] sm:$0xf]  ;;  %v1399_v35 = vperm.slane %v4341_v0, 2 }
 0x64b   :  { %v1446_v1 = vpack.c.bf16 %v1425_v20, %v1424_v53  ;;  %v1398_v20 = vpop.permute.xlu2 %1397 }
 0x64c   :  { %v1401_v43 = vmul.f32 %v1399_v35, %v1398_v20 }
 0x64d   :  { %1477 = vmatpush.bf16.msrb.mxu0 %v1446_v1  ;;  %v1443_v1 = vpack.c.bf16 %v1408_v45, %v1407_v48  ;;  %v2947_v48 = vld [vmem:[%s5532_s6 + $0xf8] sm:$0xf0] }
 0x64f   :  { %v1389_v8 = vpop.permute.xlu0 %1388 }
 0x650   :  { %v1415_v46 = vpop.permute.xlu1 %1414 }
 0x651   :  { %v1418_v56 = vmul.f32 %v1416_v40, %v1415_v46  ;;  %v2816_v40 = vor.u32 %v3032_v36, %v2813_v10  ;;  %v1392_v46 = vperm.slane %v4341_v0, 1  ;;  %v3028_v10 = vld [vmem:[%s5532_s6 + $0xec] sm:$0xf] }
 0x653   :  { %v1445_v38 = vpack.c.bf16 %v1418_v56, %v1417_v31  ;;  %v1393_v56 = vmul.f32 %v1392_v46, %v1389_v8  ;;  %v3033_v8 = vld [vmem:[%s5529_s1 + $0x44] sm:$0xf0] }
 0x655   :  { %1478 = vmatpush.bf16.msrb.mxu0 %v1445_v38 }
 0x657   :  { %v1436_v32 = vpop.permute.xlu0 %1435 }
 0x658   :  { %v1439_v25 = vmul.f32 %v3057_v55, %v1436_v32  ;;  %v1396_v33 = vpop.permute.xlu1 %1395 }
 0x659   :  { %1479 = vmatpush.bf16.msrb.mxu0 %v1444_v49  ;;  %v1400_v18 = vmul.f32 %v1399_v35, %v1396_v33  ;;  %v1452_v49 = vld [vmem:[%s5528_s2 + $0x30] sm:$0xff]  ;;  %v2921_v35 = vld [vmem:[%s5532_s6 + $0xc0] sm:$0xf] }
 0x65a   :  { %v1448_v53 = vpack.c.bf16 %v1439_v25, %v1438_v21  ;;  %1460 = vperm.xlu1 %3052, %v1452_v49   ;;  %v3021_v49 = vld [vmem:[%s5532_s6 + $0xac] sm:$0xf0] }
 0x65b   :  { %v1442_v31 = vpack.c.bf16 %v1401_v43, %v1400_v18  ;;  %v3023_v18 = vld [vmem:[%s5532_s6 + $0xc4] sm:$0xf] }
 0x65c   :  { %1497 = vmatpush.bf16.msrb.mxu1 %v1448_v53  ;;  %v2950_v53 = vor.u32 %v3028_v10, %v2947_v48  ;;  %v3034_v10 = vld [vmem:[%s5529_s1 + $0x54] sm:$0xf0] }
 0x65d   :  { %1480 = vmatpush.bf16.msrb.mxu0 %v1443_v1  ;;  %v3025_v1 = vld [vmem:[%s5532_s6 + $0xcc] sm:$0xf0] }
 0x65e   :  { %v2922_v43 = vor.u32 %v3025_v1, %v2921_v35  ;;  %v2929_v35 = vld [vmem:[%s5532_s6 + $0xc8] sm:$0xf] }
 0x65f   :  { %2817 = vmatmul.msk.bf16.vlgmr.msrb.gmra.mxu1 %vm1472_vm10, %v2816_v40  ;;  %v2923_v40 = vld [vmem:[%s5532_s6 + $0xd0] sm:$0xf0] }
 0x660   :  { %1534 = vmatpush.bf16.msra.mxu1 %v4136_v3  ;;  %v1391_v41 = vpop.permute.xlu1 %1390  ;;  %v1384_v3 = vpop.permute.xlu2 %1383 }
 0x661   :  { %v1394_v38 = vmul.f32 %v1392_v46, %v1391_v41  ;;  %1481 = vmatpush.bf16.msrb.mxu0 %v1442_v31  ;;  %v1387_v32 = vmul.f32 %v1385_v11, %v1384_v3  ;;  %v2926_v46 = vor.u32 %v3023_v18, %v2923_v40  ;;  %v3024_v31 = vld [vmem:[%s5532_s6 + $0xcc] sm:$0xf]  ;;  %v3019_v3 = vld [vmem:[%s5532_s6 + $0xa4] sm:$0xf] }
 0x663   :  { %v1441_v55 = vpack.c.bf16 %v1394_v38, %v1393_v56  ;;  %v2931_v56 = vld [vmem:[%s5532_s6 + $0xd8] sm:$0xf0]  ;;  %v2905_v38 = vld [vmem:[%s5532_s6 + $0xa0] sm:$0xf] }
 0x664   :  { %1535 = vmatpush.bf16.msra.mxu1 %v4146_v6  ;;  %v2811_v6 = vld [vmem:[%s5529_s1 + $0x40] sm:$0xf] }
 0x665   :  { %1482 = vmatpush.bf16.msrb.mxu0 %v1441_v55  ;;  %v2812_v33 = vor.u32 %v3033_v8, %v2811_v6  ;;  %v2915_v6 = vld [vmem:[%s5532_s6 + $0xb8] sm:$0xf0] }
 0x668   :  { %1536 = vmatpush.bf16.msra.mxu1 %v4180_v17  ;;  %v1382_v45 = vpop.permute.xlu1 %1381  ;;  %v1506_v17 = vpack.c.bf16 %v3980_v12, %v3980_v12 }
 0x669   :  { %v1386_v21 = vmul.f32 %v1385_v11, %v1382_v45  ;;  %v2934_v11 = vor.u32 %v3024_v31, %v2931_v56  ;;  %v2907_v45 = vld [vmem:[%s5532_s6 + $0xb0] sm:$0xf0]  ;;  %v2897_v56 = vld [vmem:[%s5532_s6 + $0x88] sm:$0xf] }
 0x66a   :  { %v2910_v8 = vor.u32 %v3019_v3, %v2907_v45  ;;  %v3011_v3 = vld [vmem:[%s5532_s6 + $0x64] sm:$0xf] }
 0x66b   :  { %v1440_v25 = vpack.c.bf16 %v1387_v32, %v1386_v21  ;;  %v2906_v32 = vor.u32 %v3021_v49, %v2905_v38  ;;  %v3020_v21 = vld [vmem:[%s5532_s6 + $0xac] sm:$0xf]  ;;  %v3018_v38 = vld [vmem:[%s5532_s6 + $0x94] sm:$0xf0] }
 0x66c   :  { %1537 = vmatpush.bf16.msra.mxu1 %v4195_v54  ;;  %v2898_v49 = vor.u32 %v3018_v38, %v2897_v56  ;;  %v3001_v56 = vld [vmem:[%s5532_s6 + $0xc] sm:$0xf0]  ;;  %v2999_v38 = vld [vmem:[%s5532_s6 + $0x4] sm:$0xf] }
 0x66d   :  { %1483 = vmatpush.bf16.msrb.mxu0 %v1440_v25  ;;  %v2889_v25 = vld [vmem:[%s5532_s6 + $0x80] sm:$0xf] }
 0x670   :  { %1538 = vmatpush.bf16.msra.mxu1 %v4223_v52  ;;  %1484 = vmatmul.bf16.vlgmr.msrb.gmra.mxu0 %v2812_v33  ;;  %v3017_v33 = vld [vmem:[%s5532_s6 + $0x8c] sm:$0xf0] }
 0x671   :  { %1547 = vmatpush.bf16.msra.mxu0 %v4186_v28  ;;  %v1507_v28 = vpack.c.bf16 %v3982_v29, %v3982_v29 }
 0x674   :  { %1539 = vmatpush.bf16.msra.mxu1 %v4241_v37 }
 0x675   :  { %1548 = vmatpush.bf16.msra.mxu0 %v4200_v30  ;;  %v1456_v30 = vpop.permute.xlu0 %1455 }
 0x678   :  { %1540 = vmatpush.bf16.msra.mxu1 %v4263_v23 }
 0x679   :  { %1549 = vmatpush.bf16.msra.mxu0 %v4228_v9 }
 0x67c   :  { %1541 = vmatpush.bf16.msra.mxu1 %v4275_v24  ;;  %v3029_v24 = vld [vmem:[%s5532_s6 + $0xec] sm:$0xf0] }
 0x67d   :  { %1550 = vmatpush.bf16.msra.mxu0 %v4246_v57 }
 0x67f   :  { %1542 = vmatmul.bf16.vlgmr.msra.gmra.mxu1 %v1506_v17  ;;  %v2918_v17 = vor.u32 %v3020_v21, %v2915_v6  ;;  %v2881_v21 = vld [vmem:[%s5532_s6 + $0x68] sm:$0xf]  ;;  %v3014_v6 = vld [vmem:[%s5532_s6 + $0x74] sm:$0xf0] }
 0x681   :  { %1551 = vmatpush.bf16.msra.mxu0 %v4268_v44  ;;  %v2937_v44 = vld [vmem:[%s5532_s6 + $0xe0] sm:$0xf] }
 0x685   :  { %1552 = vmatpush.bf16.msra.mxu0 %v4280_v34  ;;  %v3027_v34 = vld [vmem:[%s5532_s6 + $0xe4] sm:$0xf] }
 0x689   :  { %1553 = vmatpush.bf16.msra.mxu0 %v4293_v60  ;;  %v2938_v60 = vor.u32 %v3029_v24, %v2937_v44 }
 0x68b   :  { %1766 = vmatpush.bf16.msra.mxu3 %v2938_v60  ;;  %v2945_v60 = vld [vmem:[%s5532_s6 + $0xe8] sm:$0xf] }
 0x68d   :  { %1554 = vmatpush.bf16.msra.mxu0 %v4305_v51  ;;  %v2939_v51 = vld [vmem:[%s5532_s6 + $0xf0] sm:$0xf0] }
 0x68e   :  { %v2942_v36 = vor.u32 %v3027_v34, %v2939_v51  ;;  %v3030_v51 = vld [vmem:[%s5532_s6 + $0xf4] sm:$0xf0] }
 0x68f   :  { %1767 = vmatpush.bf16.msra.mxu3 %v2922_v43  ;;  %v2913_v43 = vld [vmem:[%s5532_s6 + $0xa8] sm:$0xf] }
 0x690   :  { %1555 = vmatmul.bf16.vlgmr.msra.gmra.mxu0 %v1507_v28  ;;  %1780 = vmatpush.bf16.msrb.mxu1 %v2942_v36  ;;  %v3015_v28 = vld [vmem:[%s5532_s6 + $0x84] sm:$0xf]  ;;  %v2820_v36 = vld [vmem:[%s5529_s1 + $0x50] sm:$0xf] }
 0x691   :  { %1808 = vmatpush.bf16.msrb.mxu0 %v2950_v53  ;;  %v2821_v1 = vor.u32 %v3034_v10, %v2820_v36  ;;  %v2841_v36 = vld [vmem:[%s5532_s6 + $0x20] sm:$0xf]  ;;  %v3005_v10 = vld [vmem:[%s5532_s6 + $0x2c] sm:$0xf0] }
 0x693   :  { %1768 = vmatpush.bf16.msra.mxu3 %v2906_v32  ;;  %v2875_v32 = vld [vmem:[%s5532_s6 + $0x70] sm:$0xf0] }
 0x694   :  { %1781 = vmatpush.bf16.msrb.mxu1 %v2926_v46  ;;  %v3022_v46 = vld [vmem:[%s5532_s6 + $0xb4] sm:$0xf0] }
 0x695   :  { %1809 = vmatpush.bf16.msrb.mxu0 %v2934_v11  ;;  %v2914_v31 = vor.u32 %v3022_v46, %v2913_v43  ;;  %v3013_v11 = vld [vmem:[%s5532_s6 + $0x6c] sm:$0xf0]  ;;  %v2851_v43 = vld [vmem:[%s5532_s6 + $0x38] sm:$0xf0] }
 0x698   :  { %1782 = vmatpush.bf16.msrb.mxu1 %v2910_v8  ;;  %v2878_v8 = vor.u32 %v3011_v3, %v2875_v32  ;;  %v3002_v3 = vld [vmem:[%s5532_s6 + $0x14] sm:$0xf0] }
 0x699   :  { %1810 = vmatpush.bf16.msrb.mxu0 %v2918_v17  ;;  %v2883_v17 = vld [vmem:[%s5532_s6 + $0x78] sm:$0xf0] }
 0x6cc   :  { %v1461_v23 = vpop.permute.xlu1 %1460 }
 0x6dc   :  { %v1499_v54 = vpop.f32.mrf.mxu1 }
 0x6e4   :  { %v1501_v37 = vpop.f32.mrf.mxu1 }
 0x6ed   :  { %v1485_v52 = vpop.f32.mrf.mxu0 }
 0x6ee   :  { %v1486_v9 = vadd.f32 %v1485_v52, %v1456_v30  ;;  %v3016_v30 = vld [vmem:[%s5532_s6 + $0x8c] sm:$0xf]  ;;  %v2899_v52 = vld [vmem:[%s5532_s6 + $0x98] sm:$0xf0] }
 0x6f0   :  { %v4409_v57 = vadd.f32 %v1499_v54, %v1486_v9  ;;  %v2891_v54 = vld [vmem:[%s5532_s6 + $0x90] sm:$0xf0]  ;;  %v2890_v9 = vor.u32 %v3017_v33, %v2889_v25  ;;  %v2882_v25 = vor.u32 %v3014_v6, %v2881_v21  ;;  %v3012_v33 = vld [vmem:[%s5532_s6 + $0x6c] sm:$0xf]  ;;  %v2835_v6 = vld [vmem:[%s5532_s6 + $0x18] sm:$0xf0] }
 0x6f1   :  { %v3000_v21 = vld [vmem:[%s5532_s6 + $0xc] sm:$0xf] }
 0x6f2   :  { %1769 = vmatpush.bf16.msra.mxu3 %v2890_v9 }
 0x6f5   :  { %v1487_v0 = vpop.f32.mrf.mxu0 }
 0x6f6   :  { %v1488_v20 = vadd.f32 %v1487_v0, %v1461_v23  ;;  %v2902_v23 = vor.u32 %v3016_v30, %v2899_v52  ;;  %v3009_v30 = vld [vmem:[%s5532_s6 + $0x4c] sm:$0xf0]  ;;  %v3007_v52 = vld [vmem:[%s5532_s6 + $0x44] sm:$0xf] }
 0x6f8   :  { %v4444_v41 = vadd.f32 %v1501_v37, %v1488_v20  ;;  %v2894_v37 = vor.u32 %v3015_v28, %v2891_v54  ;;  %1811 = vmatpush.bf16.msrb.mxu0 %v2902_v23  ;;  %v3026_v20 = vld [vmem:[%s5532_s6 + $0xd4] sm:$0xf0]  ;;  %v2886_v28 = vor.u32 %v3012_v33, %v2883_v17  ;;  %v2857_v54 = vld [vmem:[%s5532_s6 + $0x40] sm:$0xf]  ;;  %v2865_v23 = vld [vmem:[%s5532_s6 + $0x48] sm:$0xf]  ;;  %v1568_v33 = vpop.permute.xlu2 %1567 }
 0x6f9   :  { %v2930_v18 = vor.u32 %v3026_v20, %v2929_v35  ;;  %v2858_v9 = vor.u32 %v3009_v30, %v2857_v54  ;;  %v2843_v35 = vld [vmem:[%s5532_s6 + $0x30] sm:$0xf0]  ;;  %v2849_v20 = vld [vmem:[%s5532_s6 + $0x28] sm:$0xf] }
 0x6fa   :  { %1783 = vmatpush.bf16.msrb.mxu1 %v2894_v37  ;;  %v2859_v37 = vld [vmem:[%s5532_s6 + $0x50] sm:$0xf0] }
 0x6fc   :  { %v1543_v55 = vpop.f32.mrf.mxu1  ;;  %1812 = vmatpush.bf16.msrb.mxu0 %v2886_v28  ;;  %v1573_v28 = vpop.permute.xlu0 %1572 }
 0x6fd   :  { %v1544_v24 = vadd.f32 %v1543_v55, %v4351_v16  ;;  %v2946_v16 = vor.u32 %v3030_v51, %v2945_v60  ;;  %v2873_v55 = vld [vmem:[%s5532_s6 + $0x60] sm:$0xf]  ;;  %v3008_v60 = vld [vmem:[%s5532_s6 + $0x4c] sm:$0xf]  ;;  %v2867_v51 = vld [vmem:[%s5532_s6 + $0x58] sm:$0xf0] }
 0x6fe   :  { %v2874_v45 = vor.u32 %v3013_v11, %v2873_v55  ;;  %1784 = vmatpush.bf16.msrb.mxu1 %v2878_v8  ;;  %v2827_v55 = vld [vmem:[%s5532_s6 + $0x10] sm:$0xf0]  ;;  %v2833_v11 = vld [vmem:[%s5532_s6 + $0x8] sm:$0xf]  ;;  %v2838_v8 = vor.u32 %v3000_v21, %v2835_v6 }
 0x6ff   :  { %v2834_v32 = vor.u32 %v3002_v3, %v2833_v11 }
 0x700   :  { %1770 = vmatpush.bf16.msra.mxu3 %v2874_v45  ;;  %v2830_v45 = vor.u32 %v2999_v38, %v2827_v55 }
 0x704   :  { %v1545_v44 = vpop.f32.mrf.mxu1  ;;  %1771 = vmatpush.bf16.msra.mxu3 %v2858_v9 }
 0x705   :  { %v3010_v44 = vld [vmem:[%s5532_s6 + $0x54] sm:$0xf0] }
 0x70d   :  { %v1556_v34 = vpop.f32.mrf.mxu0 }
 0x70e   :  { %v1557_v0 = vadd.f32 %v1556_v34, %v1544_v24  ;;  %v2862_v24 = vor.u32 %v3007_v52, %v2859_v37  ;;  %v2866_v34 = vor.u32 %v3010_v44, %v2865_v23 }
 0x710   :  { %v1564_v48 = vpack.c.bf16 %v1557_v0, %v1557_v0  ;;  %v2870_v0 = vor.u32 %v3008_v60, %v2867_v51  ;;  %1785 = vmatpush.bf16.msrb.mxu1 %v2862_v24 }
 0x712   :  { %v1585_v53 = vsel %vm346_vm1, %v1564_v48, 0  ;;  %v3003_v48 = vld [vmem:[%s5532_s6 + $0x24] sm:$0xf]  ;;  %1813 = vmatpush.bf16.msrb.mxu0 %v2870_v0 }
 0x713   :  { %1594 = vmatpush.bf16.msra.mxu2 %v1585_v53  ;;  %v3006_v53 = vld [vmem:[%s5532_s6 + $0x34] sm:$0xf0] }
 0x715   :  { %v1558_v40 = vpop.f32.mrf.mxu0 }
 0x716   :  { %2822 = vmatmul.msk.bf16.vlgmr.msra.gmra.mxu2 %vm1580_vm11, %v2821_v1  ;;  %v2846_v1 = vor.u32 %v3003_v48, %v2843_v35  ;;  %v3004_v40 = vld [vmem:[%s5532_s6 + $0x2c] sm:$0xf] }
 0x717   :  { %1794 = vmatpush.bf16.msrb.mxu2 %v2946_v16  ;;  %v2842_v16 = vor.u32 %v3005_v10, %v2841_v36  ;;  %v2854_v46 = vor.u32 %v3004_v40, %v2851_v43 }
 0x718   :  { %1786 = vmatpush.bf16.msrb.mxu1 %v2846_v1 }
 0x719   :  { %1772 = vmatpush.bf16.msra.mxu3 %v2842_v16  ;;  %1814 = vmatpush.bf16.msrb.mxu0 %v2854_v46 }
 0x71b   :  { %1795 = vmatpush.bf16.msrb.mxu2 %v2930_v18  ;;  %v2850_v18 = vor.u32 %v3006_v53, %v2849_v20 }
 0x71c   :  { %1787 = vmatpush.bf16.msrb.mxu1 %v2830_v45 }
 0x71d   :  { %1815 = vmatpush.bf16.msrb.mxu0 %v2838_v8 }
 0x71f   :  { %1796 = vmatpush.bf16.msrb.mxu2 %v2914_v31  ;;  %v2825_v31 = vld [vmem:[%s5532_s6] sm:$0xf] }
 0x723   :  { %1797 = vmatpush.bf16.msrb.mxu2 %v2898_v49  ;;  %v2826_v49 = vor.u32 %v3001_v56, %v2825_v31 }
 0x725   :  { %1773 = vmatpush.bf16.msra.mxu3 %v2826_v49 }
 0x727   :  { %1798 = vmatpush.bf16.msrb.mxu2 %v2882_v25 }
 0x72b   :  { %1799 = vmatpush.bf16.msrb.mxu2 %v2866_v34 }
 0x72f   :  { %1800 = vmatpush.bf16.msrb.mxu2 %v2850_v18 }
 0x733   :  { %1801 = vmatpush.bf16.msrb.mxu2 %v2834_v32 }
 0x799   :  { %v1596_v25 = vpop.f32.mrf.mxu2 }
 0x79a   :  { %v1597_v17 = vadd.f32 %v1596_v25, %v1568_v33 }
 0x79c   :  { %v1601_v30 = vadd.f32 %v1597_v17, %v4409_v57 }
 0x79e   :  { %v1603_v37 = vmax.f32 %v1601_v30, 0.0 }
 0x7a1   :  { %v1598_v54 = vpop.f32.mrf.mxu2 }
 0x7a2   :  { %v1599_v52 = vadd.f32 %v1598_v54, %v1573_v28 }
 0x7a4   :  { %v1602_v9 = vadd.f32 %v1599_v52, %v4444_v41 }
 0x7a6   :  { %v1604_v23 = vmax.f32 %v1602_v9, 0.0 }
 0x7a8   :  { %v1605_v44 = vpack.c.bf16 %v1604_v23, %v1603_v37 }
 0x7aa   :  { %1774 = vmatmul.bf16.vlgmr.msra.gmra.mxu3 %v1605_v44  ;;  %1788 = vmatmul.bf16.vlgmr.msrb.gmra.mxu1 %v1605_v44 }
 0x7ab   :  { %1802 = vmatmul.bf16.vlgmr.msrb.gmra.mxu2 %v1605_v44  ;;  %1816 = vmatmul.bf16.vlgmr.msrb.gmra.mxu0 %v1605_v44 }
 0x827   :  { %v4616_v24 = vpop.f32.mrf.mxu1 }
 0x828   :  { %v4618_v34 = vpop.f32.mrf.mxu0  ;;  %1922 = vrot.lane.b32.xlu0 %v4616_v24, %s3087_s13  ;;  %2026 = vrot.lane.b32.xlu1 %v4616_v24, %s3084_s9 }
 0x829   :  { %5654 = vst [vmem:[#allocation10_spill] sm:$0xff] %v4618_v34  ;;  %1930 = vrot.lane.b32.xlu2 %v4618_v34, %s3087_s13 }
 0x82d   :  { %v4646_v41 = vpop.f32.mrf.mxu3 }
 0x82e   :  { %v4644_v57 = vpop.f32.mrf.mxu2 }
 0x82f   :  { %5655 = vst [vmem:[#allocation38_spill] sm:$0xff] %v4644_v57  ;;  %v4680_v51 = vpop.f32.mrf.mxu1 }
 0x830   :  { %1890 = vrot.lane.b32.xlu0 %v4616_v24, %s3086_s0  ;;  %1994 = vrot.lane.b32.xlu1 %v4616_v24, %s3083_s8  ;;  %v4678_v60 = vpop.f32.mrf.mxu0 }
 0x831   :  { %2034 = vrot.lane.b32.xlu2 %v4618_v34, %s3084_s9  ;;  %5656 = vst [vmem:[#allocation39_spill] sm:$0xff] %v4678_v60 }
 0x835   :  { %v4708_v10 = vpop.f32.mrf.mxu3 }
 0x836   :  { %v4718_v16 = vpop.f32.mrf.mxu2 }
 0x837   :  { %5657 = vst [vmem:[#allocation40_spill] sm:$0xff] %v4718_v16 }
 0x838   :  { %1866 = vrot.lane.b32.xlu0 %v4618_v34, %s3089_s15  ;;  %1962 = vrot.lane.b32.xlu1 %v4616_v24, %s3085_s12 }
 0x839   :  { %1858 = vrot.lane.b32.xlu2 %v4616_v24, %s3089_s15 }
 0x840   :  { %1970 = vrot.lane.b32.xlu0 %v4618_v34, %s3085_s12  ;;  %1898 = vrot.lane.b32.xlu1 %v4618_v34, %s3086_s0 }
 0x841   :  { %1834 = vrot.lane.b32.xlu2 %v4618_v34, %s3088_s14 }
 0x848   :  { %2030 = vrot.lane.b32.xlu0 %v4644_v57, %s3084_s9  ;;  %2002 = vrot.lane.b32.xlu1 %v4618_v34, %s3083_s8 }
 0x849   :  { %2022 = vrot.lane.b32.xlu2 %v4646_v41, %s3084_s9 }
 0x850   :  { %1998 = vrot.lane.b32.xlu0 %v4644_v57, %s3083_s8  ;;  %1826 = vrot.lane.b32.xlu1 %v4616_v24, %s3088_s14 }
 0x851   :  { %1990 = vrot.lane.b32.xlu2 %v4646_v41, %s3083_s8 }
 0x858   :  { %1966 = vrot.lane.b32.xlu0 %v4644_v57, %s3085_s12  ;;  %2058 = vrot.lane.b32.xlu1 %v4616_v24, %s3082_s30 }
 0x859   :  { %1958 = vrot.lane.b32.xlu2 %v4646_v41, %s3085_s12 }
 0x860   :  { %1854 = vrot.lane.b32.xlu0 %v4646_v41, %s3089_s15  ;;  %1918 = vrot.lane.b32.xlu1 %v4646_v41, %s3087_s13 }
 0x861   :  { %1822 = vrot.lane.b32.xlu2 %v4646_v41, %s3088_s14 }
 0x868   :  { %2062 = vrot.lane.b32.xlu0 %v4644_v57, %s3082_s30  ;;  %1886 = vrot.lane.b32.xlu1 %v4646_v41, %s3086_s0 }
 0x869   :  { %2054 = vrot.lane.b32.xlu2 %v4646_v41, %s3082_s30 }
 0x870   :  { %1932 = vrot.lane.b32.xlu0 %v4678_v60, %s3087_s13  ;;  %1926 = vrot.lane.b32.xlu1 %v4644_v57, %s3087_s13 }
 0x871   :  { %2028 = vrot.lane.b32.xlu2 %v4680_v51, %s3084_s9 }
 0x878   :  { %2036 = vrot.lane.b32.xlu0 %v4678_v60, %s3084_s9  ;;  %1924 = vrot.lane.b32.xlu1 %v4680_v51, %s3087_s13 }
 0x879   :  { %1996 = vrot.lane.b32.xlu2 %v4680_v51, %s3083_s8 }
 0x880   :  { %1860 = vrot.lane.b32.xlu0 %v4680_v51, %s3089_s15  ;;  %1892 = vrot.lane.b32.xlu1 %v4680_v51, %s3086_s0 }
 0x881   :  { %1964 = vrot.lane.b32.xlu2 %v4680_v51, %s3085_s12 }
 0x883   :  { %v4700_v0 = vpop.permute.xlu2 %1930 }
 0x888   :  { %1836 = vrot.lane.b32.xlu0 %v4678_v60, %s3088_s14  ;;  %1868 = vrot.lane.b32.xlu1 %v4678_v60, %s3089_s15 }
 0x889   :  { %1900 = vrot.lane.b32.xlu2 %v4678_v60, %s3086_s0 }
 0x88b   :  { %v2035_v36 = vpop.permute.xlu2 %2034 }
 0x890   :  { %1972 = vrot.lane.b32.xlu1 %v4678_v60, %s3085_s12  ;;  %2024 = vrot.lane.b32.xlu0 %v4708_v10, %s3084_s9 }
 0x891   :  { %2004 = vrot.lane.b32.xlu2 %v4678_v60, %s3083_s8 }
 0x893   :  { %v4716_v48 = vpop.permute.xlu2 %1858 }
 0x898   :  { %2032 = vrot.lane.b32.xlu1 %v4718_v16, %s3084_s9  ;;  %1992 = vrot.lane.b32.xlu0 %v4708_v10, %s3083_s8 }
 0x899   :  { %1828 = vrot.lane.b32.xlu2 %v4680_v51, %s3088_s14 }
 0x89a   :  { %v4726_v35 = vpop.permute.xlu0 %1922  ;;  %v2027_v20 = vpop.permute.xlu1 %2026 }
 0x89b   :  { %v4728_v53 = vpop.permute.xlu2 %1834 }
 0x89c   :  { %5658 = vst [vmem:[#allocation41_spill] sm:$0xff] %v4728_v53 }
 0x8a0   :  { %2000 = vrot.lane.b32.xlu1 %v4718_v16, %s3083_s8  ;;  %1960 = vrot.lane.b32.xlu0 %v4708_v10, %s3085_s12 }
 0x8a1   :  { %2060 = vrot.lane.b32.xlu2 %v4680_v51, %s3082_s30 }
 0x8a2   :  { %v4736_v1 = vpop.permute.xlu0 %1890  ;;  %v1995_v18 = vpop.permute.xlu1 %1994 }
 0x8a3   :  { %v2023_v40 = vpop.permute.xlu2 %2022 }
 0x8a4   :  { %v4740_v43 = vsel %vm281_vm3, %v2023_v40, %v2027_v20  ;;  %v4744_v46 = vsel %vm281_vm3, %v2035_v36, %v2023_v40 }
 0x8a8   :  { %1968 = vrot.lane.b32.xlu1 %v4718_v16, %s3085_s12  ;;  %1894 = vrot.lane.b32.xlu0 %v4644_v57, %s3086_s0 }
 0x8a9   :  { %1920 = vrot.lane.b32.xlu2 %v4708_v10, %s3087_s13 }
 0x8aa   :  { %v4752_v31 = vpop.permute.xlu0 %1866  ;;  %v1963_v56 = vpop.permute.xlu1 %1962 }
 0x8ab   :  { %v1991_v38 = vpop.permute.xlu2 %1990 }
 0x8ac   :  { %v4756_v49 = vsel %vm260_vm2, %v1991_v38, %v1995_v18 }
 0x8b0   :  { %2066 = vrot.lane.b32.xlu1 %v4618_v34, %s3082_s30  ;;  %1824 = vrot.lane.b32.xlu0 %v4708_v10, %s3088_s14 }
 0x8b1   :  { %1888 = vrot.lane.b32.xlu2 %v4708_v10, %s3086_s0 }
 0x8b2   :  { %v1971_v55 = vpop.permute.xlu0 %1970  ;;  %v4764_v11 = vpop.permute.xlu1 %1898 }
 0x8b3   :  { %v1959_v3 = vpop.permute.xlu2 %1958 }
 0x8b4   :  { %v4768_v45 = vsel %vm239_vm4, %v1959_v3, %v1963_v56  ;;  %v4772_v32 = vsel %vm239_vm4, %v1971_v55, %v1959_v3 }
 0x8b5   :  { %5659 = vst [vmem:[#allocation42_spill] sm:$0xff] %v4772_v32 }
 0x8b8   :  { %1856 = vrot.lane.b32.xlu1 %v4708_v10, %s3089_s15  ;;  %2056 = vrot.lane.b32.xlu0 %v4708_v10, %s3082_s30 }
 0x8b9   :  { %1862 = vrot.lane.b32.xlu2 %v4644_v57, %s3089_s15 }
 0x8ba   :  { %v2031_v21 = vpop.permute.xlu0 %2030  ;;  %v2003_v6 = vpop.permute.xlu1 %2002 }
 0x8bb   :  { %v2038_v8 = vsel %vm281_vm3, %v2031_v21, %v2035_v36  ;;  %v2040_v25 = vsel %vm281_vm3, %v2027_v20, %v2031_v21  ;;  %v4786_v33 = vsel %vm260_vm2, %v2003_v6, %v1991_v38  ;;  %v4788_v17 = vpop.permute.xlu2 %1822 }
 0x8bc   :  { %5660 = vst [vmem:[#allocation43_spill] sm:$0xff] %v4788_v17 }
 0x8c0   :  { %2064 = vrot.lane.b32.xlu1 %v4718_v16, %s3082_s30  ;;  %1864 = vrot.lane.b32.xlu0 %v4718_v16, %s3089_s15 }
 0x8c1   :  { %1928 = vrot.lane.b32.xlu2 %v4718_v16, %s3087_s13 }
 0x8c2   :  { %v1999_v28 = vpop.permute.xlu0 %1998  ;;  %v4796_v54 = vpop.permute.xlu1 %1826 }
 0x8c3   :  { %5661 = vst [vmem:[#allocation44_spill] sm:$0xff] %v4796_v54  ;;  %v4800_v30 = vsel %vm260_vm2, %v1999_v28, %v2003_v6  ;;  %v4804_v52 = vsel %vm260_vm2, %v1995_v18, %v1999_v28  ;;  %v4806_v9 = vpop.permute.xlu2 %2054  ;;  %v2123_v18 = vld [vmem:[%s5528_s2 + $0x48] sm:$0xff] }
 0x8c4   :  { %5662 = vst [vmem:[#allocation45_spill] sm:$0xff] %v4800_v30 }
 0x8c8   :  { %1896 = vrot.lane.b32.xlu1 %v4718_v16, %s3086_s0  ;;  %1830 = vrot.lane.b32.xlu0 %v4644_v57, %s3088_s14 }
 0x8c9   :  { %2068 = vrot.lane.b32.xlu2 %v4678_v60, %s3082_s30 }
 0x8ca   :  { %v1967_v37 = vpop.permute.xlu0 %1966  ;;  %v4814_v23 = vpop.permute.xlu1 %2058 }
 0x8cb   :  { %v4818_v44 = vsel %vm239_vm4, %v1967_v37, %v1971_v55  ;;  %v4822_v36 = vsel %vm239_vm4, %v1963_v56, %v1967_v37  ;;  %v2029_v20 = vpop.permute.xlu2 %2028 }
 0x8cc   :  { %5663 = vst [vmem:[#allocation46_spill] sm:$0xff] %v4818_v44 }
 0x8d0   :  { %1832 = vrot.lane.b32.xlu1 %v4718_v16, %s3088_s14 }
 0x8d1   :  { %2126 = vperm.xlu2 %3050, %v2123_v18  }
 0x8d2   :  { %v4829_v40 = vpop.permute.xlu0 %1854  ;;  %v4831_v38 = vpop.permute.xlu1 %1918 }
 0x8d3   :  { %v1997_v3 = vpop.permute.xlu2 %1996 }
 0x8da   :  { %v4833_v55 = vpop.permute.xlu0 %2062  ;;  %v4835_v21 = vpop.permute.xlu1 %1886 }
 0x8db   :  { %5664 = vst [vmem:[#allocation47_spill] sm:$0xff] %v4833_v55  ;;  %v4837_v56 = vpop.permute.xlu2 %1964 }
 0x8e2   :  { %v4839_v6 = vpop.permute.xlu0 %1932  ;;  %v4841_v28 = vpop.permute.xlu1 %1926 }
 0x8e3   :  { %v4843_v37 = vpop.permute.xlu2 %1900 }
 0x8ea   :  { %v2037_v12 = vpop.permute.xlu0 %2036  ;;  %v4845_v29 = vpop.permute.xlu1 %1924 }
 0x8eb   :  { %v4847_v18 = vpop.permute.xlu2 %2004 }
 0x8f2   :  { %v4849_v62 = vpop.permute.xlu0 %1860  ;;  %v4851_v2 = vpop.permute.xlu1 %1892 }
 0x8f3   :  { %5665 = vst [vmem:[#allocation48_spill] sm:$0xff] %v4849_v62  ;;  %v4853_v34 = vpop.permute.xlu2 %1828 }
 0x8f4   :  { %5666 = vst [vmem:[#allocation49_spill] sm:$0xff] %v4853_v34  ;;  %v2046_v34 = vmul.f32 %v4740_v43, %v5645_v27 }
 0x8fa   :  { %v4855_v60 = vpop.permute.xlu0 %1836  ;;  %v4857_v32 = vpop.permute.xlu1 %1868 }
 0x8fb   :  { %5667 = vst [vmem:[#allocation50_spill] sm:$0xff] %v4855_v60  ;;  %v4859_v57 = vpop.permute.xlu2 %2060  ;;  %v4873_v60 = vmul.f32 %v4744_v46, %v5653_v50 }
 0x8fc   :  { %5668 = vst [vmem:[#allocation51_spill] sm:$0xff] %v4857_v32 }
 0x8fd   :  { %5669 = vst [vmem:[#allocation52_spill] sm:$0xff] %v4859_v57 }
 0x902   :  { %v4861_v16 = vpop.permute.xlu1 %1972  ;;  %v2025_v44 = vpop.permute.xlu0 %2024 }
 0x903   :  { %5670 = vst [vmem:[#allocation53_spill] sm:$0xff] %v4861_v16  ;;  %v4863_v30 = vpop.permute.xlu2 %1920  ;;  %v2043_v55 = vsel %vm281_vm3, %v2025_v44, %v2029_v20  ;;  %v2045_v62 = vsel %vm281_vm3, %v2037_v12, %v2025_v44 }
 0x904   :  { %v2050_v57 = vmul.f32 %v2043_v55, %v5645_v27  ;;  %v4877_v16 = vmul.f32 %v2045_v62, %v5653_v50 }
 0x906   :  { %v2114_v32 = vpack.c.bf16 %v2050_v57, %v2046_v34  ;;  %v2047_v34 = vmul.f32 %v2040_v25, %v3328_v59  ;;  %v4894_v57 = vmul.f32 %v2038_v8, %v3264_v26  ;;  %v1951_v8 = vmul.f32 %v4616_v24, %v3409_v14 }
 0x908   :  { %2138 = vmatpush.bf16.msrb.mxu3 %v2114_v32 }
 0x90a   :  { %v2033_v53 = vpop.permute.xlu1 %2032  ;;  %v1993_v17 = vpop.permute.xlu0 %1992 }
 0x90b   :  { %v2039_v44 = vsel %vm281_vm3, %v2033_v53, %v2037_v12  ;;  %v2041_v43 = vsel %vm281_vm3, %v2029_v20, %v2033_v53  ;;  %v4885_v46 = vpop.permute.xlu2 %1888  ;;  %v2011_v55 = vsel %vm260_vm2, %v1993_v17, %v1997_v3  ;;  %v2013_v62 = vsel %vm260_vm2, %v4847_v18, %v1993_v17 }
 0x90c   :  { %v2051_v32 = vmul.f32 %v2041_v43, %v3328_v59  ;;  %v4898_v12 = vmul.f32 %v2039_v44, %v3264_v26  ;;  %v2014_v53 = vmul.f32 %v4756_v49, %v5651_v4  ;;  %v4904_v20 = vmul.f32 %v4786_v33, %v5652_v47 }
 0x90d   :  { %v2018_v54 = vmul.f32 %v2011_v55, %v5651_v4  ;;  %v4908_v17 = vmul.f32 %v2013_v62, %v5652_v47  ;;  %v2015_v62 = vmul.f32 %v4804_v52, %v3338_v63  ;;  %v1940_v44 = vsel %vm210_vm6, %v4700_v0, %v4831_v38  ;;  %v5681_v47 = vld [vmem:[#allocation47_spill] sm:$0xff] }
 0x90e   :  { %v2115_v25 = vpack.c.bf16 %v2051_v32, %v2047_v34  ;;  %v1982_v32 = vmul.f32 %v4768_v45, %v3412_v15  ;;  %v1941_v52 = vsel %vm210_vm6, %v4839_v6, %v4863_v30  ;;  %v1950_v45 = vmul.f32 %v4646_v41, %v3406_v13 }
 0x90f   :  { %v2110_v43 = vpack.c.bf16 %v2018_v54, %v2014_v53  ;;  %v1942_v41 = vmul.f32 %v1940_v44, %v3451_v22 }
 0x910   :  { %2164 = vmatpush.bf16.msra.mxu2 %v2115_v25 }
 0x911   :  { %2139 = vmatpush.bf16.msrb.mxu3 %v2110_v43 }
 0x912   :  { %v4914_v49 = vpop.permute.xlu1 %2000  ;;  %v4916_v50 = vpop.permute.xlu0 %1960 }
 0x913   :  { %v2009_v33 = vsel %vm260_vm2, %v1997_v3, %v4914_v49  ;;  %v4921_v55 = vpop.permute.xlu2 %1862  ;;  %v1979_v54 = vsel %vm239_vm4, %v4916_v50, %v4837_v56  ;;  %v1954_v3 = vmul.f32 %v4708_v10, %v3406_v13  ;;  %v1934_v10 = vsel %vm210_vm6, %v4841_v28, %v4700_v0  ;;  %v5683_v13 = vld [vmem:[#allocation32_spill] sm:$0xff] }
 0x914   :  { %v2019_v34 = vmul.f32 %v2009_v33, %v3338_v63  ;;  %v1986_v53 = vmul.f32 %v1979_v54, %v3412_v15  ;;  %v1936_v33 = vsel %vm210_vm6, %v4726_v35, %v4841_v28  ;;  %v1909_v28 = vsel %vm189_vm5, %v4843_v37, %v4885_v46  ;;  %v5682_v63 = vld [vmem:[#allocation2_spill] sm:$0xff] }
 0x916   :  { %v2111_v25 = vpack.c.bf16 %v2019_v34, %v2015_v62  ;;  %v2106_v43 = vpack.c.bf16 %v1986_v53, %v1982_v32  ;;  %v2102_v34 = vpack.c.bf16 %v1954_v3, %v1950_v45  ;;  %v1983_v32 = vmul.f32 %v4822_v36, %v3415_v19 }
 0x917   :  { %v1946_v53 = vmul.f32 %v1941_v52, %v3451_v22 }
 0x918   :  { %2165 = vmatpush.bf16.msra.mxu2 %v2111_v25  ;;  %2140 = vmatpush.bf16.msrb.mxu3 %v2106_v43  ;;  %v4977_v43 = vmul.f32 %v1936_v33, %v3389_v42  ;;  %v1939_v33 = vsel %vm210_vm6, %v4863_v30, %v4845_v29 }
 0x919   :  { %v1947_v30 = vmul.f32 %v1939_v33, %v3454_v58  ;;  %v1874_v33 = vsel %vm168_vm8, %v4829_v40, %v4716_v48 }
 0x91a   :  { %v4953_v54 = vpop.permute.xlu1 %1968  ;;  %v4955_v62 = vpop.permute.xlu0 %1894 }
 0x91b   :  { %v1977_v0 = vsel %vm239_vm4, %v4837_v56, %v4953_v54  ;;  %v1929_v25 = vpop.permute.xlu2 %1928  ;;  %v4980_v56 = vmul.f32 %v1934_v10, %v3380_v39  ;;  %v1955_v10 = vmul.f32 %v4680_v51, %v3409_v14  ;;  %v5680_v14 = vld [vmem:[#allocation49_spill] sm:$0xff] }
 0x91c   :  { %v1987_v3 = vmul.f32 %v1977_v0, %v3415_v19  ;;  %v1935_v36 = vsel %vm210_vm6, %v1929_v25, %v4839_v6  ;;  %v1937_v44 = vsel %vm210_vm6, %v4845_v29, %v1929_v25  ;;  %2141 = vmatpush.bf16.msrb.mxu3 %v2102_v34  ;;  %v1908_v6 = vsel %vm189_vm5, %v4764_v11, %v4835_v21 }
 0x91d   :  { %v4983_v52 = vmul.f32 %v1937_v44, %v3389_v42  ;;  %v4986_v45 = vmul.f32 %v1935_v36, %v3380_v39  ;;  %v1914_v25 = vmul.f32 %v1909_v28, %v3460_v61  ;;  %v2098_v44 = vpack.c.bf16 %v1946_v53, %v1942_v41  ;;  %v5676_v39 = vld [vmem:[#allocation50_spill] sm:$0xff] }
 0x91e   :  { %v2107_v0 = vpack.c.bf16 %v1987_v3, %v1983_v32  ;;  %v1938_v29 = vsel %vm210_vm6, %v4831_v38, %v4726_v35  ;;  %v1910_v51 = vmul.f32 %v1908_v6, %v3460_v61  ;;  %v2103_v53 = vpack.c.bf16 %v1955_v10, %v1951_v8  ;;  %v5671_v10 = vld [vmem:[#allocation43_spill] sm:$0xff] }
 0x91f   :  { %v1907_v28 = vsel %vm189_vm5, %v4885_v46, %v4851_v2  ;;  %v1943_v24 = vmul.f32 %v1938_v29, %v3454_v58  ;;  %v1906_v35 = vsel %vm189_vm5, %v4835_v21, %v4736_v1  ;;  %v2074_v38 = vsel %vm302_vm0, %v4806_v9, %v4814_v23  ;;  %v2122_v21 = vld [vmem:[%s5529_s1 + $0x60] sm:$0xff]  ;;  %v5673_v29 = vld [vmem:[#allocation44_spill] sm:$0xff] }
 0x920   :  { %2166 = vmatpush.bf16.msra.mxu2 %v2107_v0  ;;  %2142 = vmatpush.bf16.msrb.mxu3 %v2098_v44  ;;  %v2094_v3 = vpack.c.bf16 %v1914_v25, %v1910_v51  ;;  %v1876_v46 = vsel %vm168_vm8, %v4752_v31, %v4829_v40  ;;  %v1915_v8 = vmul.f32 %v1907_v28, %v3463_v5  ;;  %v5672_v25 = vld [vmem:[#allocation41_spill] sm:$0xff]  ;;  %v5048_v40 = vld [vmem:[%s5527_s3 + $0x20] ss:$0 sm:$0xff]  ;;  %v5679_v58 = vld [vmem:[#allocation52_spill] sm:$0xff]  ;;  %v2130_v22 = vunpack.c.l.b16 %v2122_v21 }
 0x921   :  { %v2099_v6 = vpack.c.bf16 %v1947_v30, %v1943_v24  ;;  %v1911_v0 = vmul.f32 %v1906_v35, %v3463_v5  ;;  %v1844_v44 = vsel %vm147_vm7, %v5672_v25, %v5671_v10  ;;  %v1842_v51 = vsel %vm147_vm7, %v5671_v10, %v5673_v29  ;;  %v5677_v5 = vld [vmem:[#allocation48_spill] sm:$0xff] }
 0x922   :  { %v2067_v32 = vpop.permute.xlu1 %2066  ;;  %v1825_v41 = vpop.permute.xlu0 %1824  ;;  %v2078_v30 = vmul.f32 %v5048_v40, %v2074_v38  ;;  %v2007_v35 = vsel %vm260_vm2, %v4914_v49, %v4847_v18  ;;  %v2131_v10 = vunpack.c.h.b16 %v2122_v21  ;;  %v5106_v21 = vld [vmem:[%s5527_s3 + $0x28] ss:$0 sm:$0xff] }
 0x923   :  { %v2095_v34 = vpack.c.bf16 %v1915_v8, %v1911_v0  ;;  %v1845_v42 = vsel %vm147_vm7, %v5676_v39, %v1825_v41  ;;  %v2069_v49 = vpop.permute.xlu2 %2068  ;;  %v1843_v8 = vsel %vm147_vm7, %v1825_v41, %v5680_v14  ;;  %v2020_v59 = vmul.f32 %v2007_v35, %v5682_v63  ;;  %v5685_v35 = vld [vmem:[#allocation45_spill] sm:$0xff] }
 0x924   :  { %2167 = vmatpush.bf16.msra.mxu2 %v2103_v53  ;;  %2143 = vmatpush.bf16.msrb.mxu3 %v2094_v3  ;;  %v5674_v53 = vld [vmem:[#allocation30_spill] sm:$0xff]  ;;  %v5675_v3 = vld [vmem:[#allocation31_spill] sm:$0xff]  ;;  %v1850_v41 = vmul.f32 %v1845_v42, %v5683_v13  ;;  %v2016_v27 = vmul.f32 %v5685_v35, %v5682_v63  ;;  %v5099_v42 = vld [vmem:[%s5527_s3 + $0x38] ss:$0 sm:$0xff] }
 0x925   :  { %v1878_v28 = vmul.f32 %v1876_v46, %v5674_v53  ;;  %v1879_v24 = vmul.f32 %v1874_v33, %v5675_v3  ;;  %v5678_v46 = vld [vmem:[#allocation51_spill] sm:$0xff] }
 0x928   :  { %2168 = vmatpush.bf16.msra.mxu2 %v2099_v6 }
 0x92a   :  { %v1857_v6 = vpop.permute.xlu1 %1856  ;;  %v2057_v36 = vpop.permute.xlu0 %2056 }
 0x92b   :  { %v1875_v38 = vsel %vm168_vm8, %v1857_v6, %v5677_v5  ;;  %v1877_v33 = vsel %vm168_vm8, %v5678_v46, %v1857_v6  ;;  %v2075_v18 = vsel %vm302_vm0, %v2057_v36, %v5679_v58  ;;  %v2072_v6 = vsel %vm302_vm0, %v4814_v23, %v5681_v47 }
 0x92c   :  { %v1882_v0 = vmul.f32 %v1877_v33, %v5674_v53  ;;  %v1883_v19 = vmul.f32 %v1875_v38, %v5675_v3  ;;  %v2082_v26 = vmul.f32 %v5048_v40, %v2075_v18  ;;  %2169 = vmatpush.bf16.msra.mxu2 %v2095_v34  ;;  %v2077_v61 = vsel %vm302_vm0, %v2069_v49, %v2057_v36  ;;  %v5684_v18 = vld [vmem:[#allocation33_spill] sm:$0xff] }
 0x92d   :  { %v1846_v38 = vmul.f32 %v1844_v44, %v5683_v13  ;;  %v2076_v34 = vsel %vm302_vm0, %v2067_v32, %v4806_v9  ;;  %v1851_v3 = vmul.f32 %v1843_v8, %v5684_v18  ;;  %v5088_v23 = vpack.c.b16 %v2131_v10, %v2131_v10  ;;  %v5686_v36 = vld [vmem:[#allocation53_spill] sm:$0xff]  ;;  %v5688_v10 = vld [vmem:[#allocation12_spill] sm:$0xff] }
 0x92e   :  { %v2118_v15 = vpack.c.bf16 %v2082_v26, %v2078_v30  ;;  %v2090_v33 = vpack.c.bf16 %v1882_v0, %v1878_v28  ;;  %v2091_v53 = vpack.c.bf16 %v1883_v19, %v1879_v24  ;;  %v1975_v26 = vsel %vm239_vm4, %v4953_v54, %v5686_v36 }
 0x92f   :  { %v2085_v19 = vmul.f32 %v5099_v42, %v2077_v61  ;;  %v1847_v9 = vmul.f32 %v1842_v51, %v5684_v18  ;;  %v2079_v44 = vmul.f32 %v5106_v21, %v2072_v6  ;;  %v2070_v54 = vsel %vm302_vm0, %v5681_v47, %v2067_v32 }
 0x930   :  { %2144 = vmatpush.bf16.msrb.mxu3 %v2090_v33  ;;  %2158 = vmatpush.bf16.msra.mxu1 %v2118_v15  ;;  %v5687_v30 = vpack.c.bf16 %v4898_v12, %v4894_v57  ;;  %v2081_v15 = vmul.f32 %v5099_v42, %v2076_v34  ;;  %v2086_v51 = vpack.c.bf16 %v1850_v41, %v1846_v38  ;;  %v5129_v57 = vld [vmem:[%s5527_s3 + $0x30] ss:$0 sm:$0xff]  ;;  %v5690_v41 = vld [vmem:[#allocation7_spill] sm:$0xff] }
 0x931   :  { %2170 = vmatpush.bf16.msra.mxu2 %v2091_v53  ;;  %v2112_v28 = vpack.c.bf16 %v2020_v59, %v2016_v27  ;;  %v5116_v24 = vpack.c.b16 %v2130_v22, %v2130_v22  ;;  %v1988_v8 = vmul.f32 %v1975_v26, %v5688_v10  ;;  %v2087_v32 = vpack.c.bf16 %v1851_v3, %v1847_v9  ;;  %v5689_v53 = vld [vmem:[#allocation46_spill] sm:$0xff]  ;;  %v5691_v33 = vld [vmem:[#allocation40_spill] sm:$0xff] }
 0x932   :  { %v2065_v61 = vpop.permute.xlu1 %2064  ;;  %v2080_v59 = vmul.f32 %v5129_v57, %v2070_v54  ;;  %v2121_v22 = vpack.c.bf16 %v2085_v19, %v2081_v15  ;;  %v1956_v38 = vmul.f32 %v5691_v33, %v5690_v41  ;;  %v1981_v34 = vsel %vm239_vm4, %v5686_v36, %v4916_v50  ;;  %v1865_v35 = vpop.permute.xlu0 %1864  ;;  %v5692_v26 = vld [vmem:[#allocation38_spill] sm:$0xff] }
 0x933   :  { %v2071_v0 = vsel %vm302_vm0, %v2065_v61, %v2069_v49  ;;  %v2073_v47 = vsel %vm302_vm0, %v5679_v58, %v2065_v61  ;;  %2951 = vmatmul.msk.bf16.vlgmr.msra.gmra.mxu1 %vm1472_vm10, %v5088_v23  ;;  %v1984_v58 = vmul.f32 %v5689_v53, %v5688_v10  ;;  %v1952_v19 = vmul.f32 %v5692_v26, %v5690_v41  ;;  %v5695_v36 = vld [vmem:[#allocation42_spill] sm:$0xff] }
 0x934   :  { %2190 = vmatpush.bf16.msrb.mxu1 %v5687_v30  ;;  %v2083_v27 = vmul.f32 %v5106_v21, %v2073_v47  ;;  %v2084_v12 = vmul.f32 %v5129_v57, %v2071_v0  ;;  %2145 = vmatpush.bf16.msrb.mxu3 %v2086_v51  ;;  %v5693_v9 = vpack.c.bf16 %v4877_v16, %v4873_v60  ;;  %v5694_v30 = vld [vmem:[#allocation13_spill] sm:$0xff]  ;;  %v5697_v51 = vld [vmem:[#allocation16_spill] sm:$0xff]  ;;  %v5699_v47 = vld [vmem:[#allocation39_spill] sm:$0xff] }
 0x935   :  { %2171 = vmatpush.bf16.msra.mxu2 %v2087_v32  ;;  %v2108_v6 = vpack.c.bf16 %v1988_v8, %v1984_v58  ;;  %v2104_v54 = vpack.c.bf16 %v1956_v38, %v1952_v19  ;;  %v1989_v15 = vmul.f32 %v1981_v34, %v5694_v30  ;;  %v1985_v61 = vmul.f32 %v5695_v36, %v5694_v30  ;;  %v5698_v0 = vld [vmem:[#allocation8_spill] sm:$0xff]  ;;  %v5703_v33 = vld [vmem:[#allocation22_spill] sm:$0xff] }
 0x936   :  { %v2119_v3 = vpack.c.bf16 %v2083_v27, %v2079_v44  ;;  %v2120_v49 = vpack.c.bf16 %v2084_v12, %v2080_v59  ;;  %v1904_v60 = vsel %vm189_vm5, %v4736_v1, %v4955_v62  ;;  %v5696_v16 = vpack.c.bf16 %v4908_v17, %v4904_v20  ;;  %v5701_v17 = vld [vmem:[#allocation10_spill] sm:$0xff]  ;;  %v5702_v27 = vld [vmem:[#allocation23_spill] sm:$0xff] }
 0x937   :  { %2146 = vmatmul.bf16.vlgmr.msrb.gmra.mxu3 %v5116_v24  ;;  %v1873_v8 = vsel %vm168_vm8, %v5677_v5, %v1865_v35  ;;  %v1957_v32 = vmul.f32 %v5699_v47, %v5698_v0  ;;  %v1912_v59 = vmul.f32 %v1904_v60, %v5697_v51  ;;  %v1872_v1 = vsel %vm168_vm8, %v4716_v48, %v4921_v55  ;;  %v5704_v34 = vld [vmem:[#allocation14_spill] sm:$0xff]  ;;  %v2127_v60 = vpop.permute.xlu2 %2126 }
 0x938   :  { %2191 = vmatpush.bf16.msrb.mxu1 %v2112_v28  ;;  %2172 = vmatmul.bf16.vlgmr.msra.gmra.mxu2 %v5116_v24  ;;  %v1953_v5 = vmul.f32 %v5701_v17, %v5698_v0  ;;  %v1884_v12 = vmul.f32 %v1873_v8, %v5702_v27  ;;  %v1870_v19 = vsel %vm168_vm8, %v4921_v55, %v4752_v31  ;;  %v5709_v17 = vld [vmem:[#allocation35_spill] sm:$0xff] }
 0x939   :  { %2236 = vmatpush.bf16.msrb.mxu2 %v2121_v22  ;;  %2184 = vmatpush.bf16.msra.mxu0 %v2119_v3  ;;  %v5700_v22 = vpack.c.bf16 %v4983_v52, %v4977_v43  ;;  %v1880_v52 = vmul.f32 %v1872_v1, %v5702_v27  ;;  %v5708_v1 = vld [vmem:[#allocation34_spill] sm:$0xff] }
 0x93a   :  { %2210 = vmatpush.bf16.msra.mxu3 %v2120_v49  ;;  %v1897_v44 = vpop.permute.xlu1 %1896  ;;  %v1831_v53 = vpop.permute.xlu0 %1830  ;;  %v2105_v43 = vpack.c.bf16 %v1957_v32, %v1953_v5 }
 0x93b   :  { %v1905_v50 = vsel %vm189_vm5, %v4851_v2, %v1897_v44  ;;  %v2109_v2 = vpack.c.bf16 %v1989_v15, %v1985_v61  ;;  %v1903_v48 = vsel %vm189_vm5, %v1897_v44, %v4843_v37  ;;  %v1840_v49 = vsel %vm147_vm7, %v5673_v29, %v1831_v53 }
 0x93c   :  { %2192 = vmatpush.bf16.msrb.mxu1 %v2108_v6  ;;  %2952 = vmatmul.msk.bf16.vlgmr.msra.gmra.mxu0 %vm1472_vm10, %v5088_v23  ;;  %v1916_v28 = vmul.f32 %v1905_v50, %v5697_v51  ;;  %v1902_v6 = vsel %vm189_vm5, %v4955_v62, %v4764_v11  ;;  %v2092_v38 = vpack.c.bf16 %v1884_v12, %v1880_v52 }
 0x93d   :  { %2216 = vmatpush.bf16.msrb.mxu0 %v5693_v9  ;;  %v1917_v26 = vmul.f32 %v1903_v48, %v5704_v34  ;;  %v1871_v37 = vsel %vm168_vm8, %v1865_v35, %v5678_v46  ;;  %v1848_v29 = vmul.f32 %v1840_v49, %v5703_v33  ;;  %v1913_v11 = vmul.f32 %v1902_v6, %v5704_v34 }
 0x93e   :  { %v2096_v58 = vpack.c.bf16 %v1916_v28, %v1912_v59  ;;  %v5705_v62 = vpack.c.bf16 %v4986_v45, %v4980_v56  ;;  %v1838_v56 = vsel %vm147_vm7, %v1831_v53, %v5672_v25  ;;  %v5707_v45 = vld [vmem:[#allocation28_spill] sm:$0xff] }
 0x93f   :  { %v1849_v55 = vmul.f32 %v1838_v56, %v5707_v45 }
 0x940   :  { %2193 = vmatpush.bf16.msrb.mxu1 %v2104_v54  ;;  %v2097_v54 = vpack.c.bf16 %v1917_v26, %v1913_v11 }
 0x941   :  { %2217 = vmatpush.bf16.msrb.mxu0 %v5696_v16 }
 0x942   :  { %v1833_v20 = vpop.permute.xlu1 %1832 }
 0x943   :  { %v1841_v3 = vsel %vm147_vm7, %v5680_v14, %v1833_v20  ;;  %v1839_v46 = vsel %vm147_vm7, %v1833_v20, %v5676_v39 }
 0x944   :  { %2194 = vmatpush.bf16.msrb.mxu1 %v5700_v22  ;;  %v1852_v14 = vmul.f32 %v1841_v3, %v5703_v33  ;;  %v1853_v15 = vmul.f32 %v1839_v46, %v5707_v45  ;;  %v5711_v46 = vld [vmem:[#allocation36_spill] sm:$0xff] }
 0x945   :  { %2218 = vmatpush.bf16.msrb.mxu0 %v2109_v2 }
 0x946   :  { %v2088_v9 = vpack.c.bf16 %v1852_v14, %v1848_v29  ;;  %v2089_v50 = vpack.c.bf16 %v1853_v15, %v1849_v55  ;;  %v2407_v15 = vld [vmem:[%s5528_s2 + $0x50] sm:$0xff] }
 0x947   :  { %2953 = vmatmul.msk.bf16.vlgmr.msra.gmra.mxu3 %vm1472_vm10, %v5088_v23 }
 0x948   :  { %2195 = vmatpush.bf16.msrb.mxu1 %v2096_v58  ;;  %2954 = vmatmul.msk.bf16.vlgmr.msrb.gmra.mxu2 %vm1472_vm10, %v5088_v23  ;;  %v5706_v23 = vld [vmem:[#allocation29_spill] sm:$0xff] }
 0x949   :  { %2219 = vmatpush.bf16.msrb.mxu0 %v2105_v43  ;;  %v1885_v44 = vmul.f32 %v1871_v37, %v5706_v23  ;;  %v1881_v35 = vmul.f32 %v1870_v19, %v5706_v23  ;;  %v5710_v19 = vld [vmem:[#allocation37_spill] sm:$0xff] }
 0x94b   :  { %v2093_v31 = vpack.c.bf16 %v1885_v44, %v1881_v35 }
 0x94c   :  { %2196 = vmatpush.bf16.msrb.mxu1 %v2092_v38 }
 0x94d   :  { %2220 = vmatpush.bf16.msrb.mxu0 %v5705_v62 }
 0x950   :  { %2197 = vmatpush.bf16.msrb.mxu1 %v2088_v9 }
 0x951   :  { %2221 = vmatpush.bf16.msrb.mxu0 %v2097_v54 }
 0x953   :  { %2198 = vmatmul.bf16.vlgmr.msrb.gmra.mxu1 %v5116_v24 }
 0x955   :  { %2222 = vmatpush.bf16.msrb.mxu0 %v2093_v31  ;;  %v2485_v31 = vld [vmem:[%s5528_s2 + $0x58] sm:$0x1] }
 0x959   :  { %2223 = vmatpush.bf16.msrb.mxu0 %v2089_v50 }
 0x95c   :  { %2224 = vmatmul.bf16.vlgmr.msrb.gmra.mxu0 %v5116_v24 }
 0x9b0   :  { %v2160_v39 = vpop.f32.mrf.mxu1 }
 0x9b8   :  { %v2162_v61 = vpop.f32.mrf.mxu1 }
 0x9b9   :  { %v2186_v36 = vpop.f32.mrf.mxu0 }
 0x9ba   :  { %v2147_v16 = vpop.f32.mrf.mxu3 }
 0x9bb   :  { %v2148_v28 = vadd.f32 %v2147_v16, %v2127_v60  ;;  %v2173_v8 = vpop.f32.mrf.mxu2 }
 0x9bc   :  { %v2174_v25 = vadd.f32 %v2173_v8, %v2127_v60 }
 0x9bd   :  { %v2161_v2 = vadd.f32 %v2160_v39, %v2148_v28 }
 0x9be   :  { %v2187_v47 = vadd.f32 %v2186_v36, %v2174_v25 }
 0x9bf   :  { %v2242_v32 = vmax.f32 %v2161_v2, 0.0 }
 0x9c0   :  { %v2243_v59 = vmax.f32 %v2187_v47, 0.0 }
 0x9c1   :  { %v2188_v22 = vpop.f32.mrf.mxu0  ;;  %v2246_v20 = vadd.f32 %v2242_v32, %v5708_v1 }
 0x9c2   :  { %v2247_v5 = vadd.f32 %v2243_v59, %v5709_v17  ;;  %v2149_v12 = vpop.f32.mrf.mxu3 }
 0x9c3   :  { %v5227_v53 = vmax.f32 %v2246_v20, 0.0  ;;  %v2175_v24 = vpop.f32.mrf.mxu2 }
 0x9c4   :  { %v5229_v58 = vmax.f32 %v2247_v5, 0.0  ;;  %v5713_v24 = vld [vmem:[#allocation20_spill] sm:$0xff] }
 0x9c5   :  { %2338 = vrot.lane.b32.xlu2 %v5227_v53, %s3083_s8  ;;  %2370 = vrot.lane.b32.xlu0 %v5227_v53, %s3082_s30 }
 0x9c6   :  { %2372 = vrot.lane.b32.xlu1 %v5229_v58, %s3082_s30 }
 0x9ca   :  { %v2212_v3 = vpop.f32.mrf.mxu3 }
 0x9cb   :  { %v2238_v43 = vpop.f32.mrf.mxu2 }
 0x9cd   :  { %2356 = vrot.lane.b32.xlu2 %v5229_v58, %s3084_s9  ;;  %2340 = vrot.lane.b32.xlu0 %v5229_v58, %s3083_s8 }
 0x9ce   :  { %2354 = vrot.lane.b32.xlu1 %v5227_v53, %s3084_s9 }
 0x9d0   :  { %v2199_v52 = vpop.f32.mrf.mxu1 }
 0x9d1   :  { %v2200_v37 = vadd.f32 %v2199_v52, %v2127_v60 }
 0x9d2   :  { %v2214_v48 = vpop.f32.mrf.mxu3 }
 0x9d3   :  { %v2240_v49 = vpop.f32.mrf.mxu2  ;;  %v2213_v62 = vadd.f32 %v2212_v3, %v2200_v37 }
 0x9d5   :  { %2286 = vrot.lane.b32.xlu2 %v5227_v53, %s3086_s0  ;;  %2322 = vrot.lane.b32.xlu0 %v5227_v53, %s3085_s12  ;;  %v2244_v44 = vmax.f32 %v2213_v62, 0.0  ;;  %v5716_v62 = vld [vmem:[#allocation26_spill] sm:$0xff] }
 0x9d6   :  { %2324 = vrot.lane.b32.xlu1 %v5229_v58, %s3085_s12 }
 0x9d7   :  { %v2248_v35 = vadd.f32 %v2244_v44, %v5711_v46 }
 0x9d8   :  { %v2201_v6 = vpop.f32.mrf.mxu1 }
 0x9d9   :  { %v2225_v14 = vpop.f32.mrf.mxu0  ;;  %v5265_v56 = vmax.f32 %v2248_v35, 0.0 }
 0x9da   :  { %v2226_v38 = vadd.f32 %v2225_v14, %v2127_v60 }
 0x9dc   :  { %v2239_v26 = vadd.f32 %v2238_v43, %v2226_v38  ;;  %v5714_v43 = vld [vmem:[#allocation18_spill] sm:$0xff] }
 0x9dd   :  { %2254 = vrot.lane.b32.xlu2 %v5227_v53, %s3088_s14  ;;  %2288 = vrot.lane.b32.xlu0 %v5229_v58, %s3086_s0  ;;  %v2318_v52 = vmul.f32 %v5227_v53, %v5714_v43 }
 0x9de   :  { %v2245_v29 = vmax.f32 %v2239_v26, 0.0  ;;  %2302 = vrot.lane.b32.xlu1 %v5227_v53, %s3087_s13 }
 0x9e0   :  { %v2249_v9 = vadd.f32 %v2245_v29, %v5710_v19  ;;  %v5715_v29 = vld [vmem:[#allocation24_spill] sm:$0xff] }
 0x9e1   :  { %v2227_v11 = vpop.f32.mrf.mxu0 }
 0x9e2   :  { %v5256_v54 = vmax.f32 %v2249_v9, 0.0 }
 0x9e5   :  { %2304 = vrot.lane.b32.xlu2 %v5229_v58, %s3087_s13  ;;  %2292 = vrot.lane.b32.xlu0 %v5256_v54, %s3086_s0 }
 0x9e6   :  { %2270 = vrot.lane.b32.xlu1 %v5227_v53, %s3089_s15 }
 0x9ed   :  { %2308 = vrot.lane.b32.xlu2 %v5256_v54, %s3087_s13  ;;  %2374 = vrot.lane.b32.xlu0 %v5265_v56, %s3082_s30 }
 0x9ee   :  { %2256 = vrot.lane.b32.xlu1 %v5229_v58, %s3088_s14 }
 0x9f5   :  { %2276 = vrot.lane.b32.xlu2 %v5256_v54, %s3089_s15  ;;  %2260 = vrot.lane.b32.xlu0 %v5256_v54, %s3088_s14 }
 0x9f6   :  { %2376 = vrot.lane.b32.xlu1 %v5256_v54, %s3082_s30 }
 0x9fd   :  { %2358 = vrot.lane.b32.xlu2 %v5265_v56, %s3084_s9  ;;  %2342 = vrot.lane.b32.xlu0 %v5265_v56, %s3083_s8 }
 0x9fe   :  { %2344 = vrot.lane.b32.xlu1 %v5256_v54, %s3083_s8 }
 0xa05   :  { %2328 = vrot.lane.b32.xlu2 %v5256_v54, %s3085_s12  ;;  %2360 = vrot.lane.b32.xlu0 %v5256_v54, %s3084_s9 }
 0xa06   :  { %2326 = vrot.lane.b32.xlu1 %v5265_v56, %s3085_s12 }
 0xa0d   :  { %2258 = vrot.lane.b32.xlu2 %v5265_v56, %s3088_s14  ;;  %2306 = vrot.lane.b32.xlu0 %v5265_v56, %s3087_s13 }
 0xa0e   :  { %2290 = vrot.lane.b32.xlu1 %v5265_v56, %s3086_s0 }
 0xa15   :  { %2410 = vperm.xlu2 %3050, %v2407_v15   ;;  %2272 = vrot.lane.b32.xlu0 %v5229_v58, %s3089_s15 }
 0xa16   :  { %2274 = vrot.lane.b32.xlu1 %v5265_v56, %s3089_s15 }
 0xa1d   :  { %2492 = vperm.xlu0 %3051, %v2485_v31  }
 0xa1f   :  { %v5307_v55 = vpop.permute.xlu2 %2338 }
 0xa27   :  { %v2357_v50 = vpop.permute.xlu2 %2356 }
 0xa2f   :  { %v5309_v39 = vpop.permute.xlu2 %2286 }
 0xa37   :  { %v2371_v36 = vpop.permute.xlu0 %2370  ;;  %v5320_v32 = vpop.permute.xlu2 %2254 }
 0xa38   :  { %v2373_v61 = vpop.permute.xlu1 %2372 }
 0xa39   :  { %v2380_v60 = vsel %vm302_vm0, %v2371_v36, %v2373_v61 }
 0xa3a   :  { %v2382_v16 = vmul.f32 %v5048_v40, %v2380_v60  ;;  %v5712_v40 = vld [vmem:[#allocation6_spill] sm:$0xff] }
 0xa3c   :  { %v2402_v28 = vpack.c.bf16 %v2382_v16, %v2382_v16 }
 0xa3e   :  { %v2417_v8 = vsel %vm346_vm1, %v2402_v28, 0 }
 0xa3f   :  { %2431 = vmatpush.bf16.msrb.mxu3 %v2417_v8  ;;  %v2341_v25 = vpop.permute.xlu0 %2340  ;;  %v5335_v48 = vpop.permute.xlu2 %2304 }
 0xa40   :  { %v5315_v2 = vpop.permute.xlu1 %2354  ;;  %v2348_v47 = vsel %vm260_vm2, %v5307_v55, %v2341_v25 }
 0xa41   :  { %v2364_v59 = vsel %vm281_vm3, %v5315_v2, %v2357_v50  ;;  %v2350_v22 = vmul.f32 %v2348_v47, %v5651_v4 }
 0xa42   :  { %v2366_v1 = vmul.f32 %v2364_v59, %v5712_v40 }
 0xa44   :  { %v2398_v20 = vpack.c.bf16 %v2366_v1, %v2350_v22 }
 0xa46   :  { %2432 = vmatpush.bf16.msrb.mxu3 %v2398_v20 }
 0xa47   :  { %v2323_v17 = vpop.permute.xlu0 %2322  ;;  %v5339_v14 = vpop.permute.xlu2 %2308 }
 0xa48   :  { %v5327_v5 = vpop.permute.xlu1 %2324 }
 0xa49   :  { %v2332_v12 = vsel %vm239_vm4, %v2323_v17, %v5327_v5 }
 0xa4a   :  { %v2334_v3 = vmul.f32 %v2332_v12, %v5713_v24 }
 0xa4c   :  { %v2394_v49 = vpack.c.bf16 %v2334_v3, %v2318_v52 }
 0xa4e   :  { %2433 = vmatpush.bf16.msrb.mxu3 %v2394_v49  ;;  %v5383_v49 = vld [vmem:[%s5529_s1 + $0x70] sm:$0xf] }
 0xa4f   :  { %v5337_v4 = vpop.permute.xlu0 %2288  ;;  %v5354_v46 = vpop.permute.xlu2 %2276 }
 0xa50   :  { %v2303_v6 = vpop.permute.xlu1 %2302 }
 0xa51   :  { %v2313_v38 = vsel %vm210_vm6, %v5339_v14, %v2303_v6 }
 0xa52   :  { %v2314_v11 = vmul.f32 %v2313_v38, %v5715_v29  ;;  %v5718_v29 = vld [vmem:[#allocation9_spill] sm:$0xff] }
 0xa57   :  { %v5344_v26 = vpop.permute.xlu0 %2292  ;;  %v2359_v20 = vpop.permute.xlu2 %2358 }
 0xa58   :  { %v5346_v37 = vpop.permute.xlu1 %2270  ;;  %v2297_v53 = vsel %vm189_vm5, %v5344_v26, %v5309_v39  ;;  %v2363_v38 = vsel %vm281_vm3, %v2357_v50, %v2359_v20 }
 0xa59   :  { %v2298_v19 = vmul.f32 %v2297_v53, %v5716_v62  ;;  %v2281_v28 = vsel %vm168_vm8, %v5354_v46, %v5346_v37  ;;  %v5719_v62 = vld [vmem:[#allocation11_spill] sm:$0xff] }
 0xa5b   :  { %v2390_v9 = vpack.c.bf16 %v2314_v11, %v2298_v19  ;;  %v2367_v11 = vmul.f32 %v2363_v38, %v5718_v29 }
 0xa5d   :  { %2434 = vmatpush.bf16.msrb.mxu3 %v2390_v9 }
 0xa5f   :  { %v2375_v44 = vpop.permute.xlu0 %2374  ;;  %v2329_v50 = vpop.permute.xlu2 %2328 }
 0xa60   :  { %v5356_v35 = vpop.permute.xlu1 %2256  ;;  %v2379_v15 = vsel %vm302_vm0, %v2373_v61, %v2375_v44  ;;  %v5717_v61 = vld [vmem:[#allocation30_spill] sm:$0xff] }
 0xa61   :  { %v2383_v31 = vmul.f32 %v5106_v21, %v2379_v15  ;;  %v2282_v22 = vmul.f32 %v2281_v28, %v5717_v61  ;;  %v5720_v28 = vld [vmem:[#allocation4_spill] sm:$0xff] }
 0xa63   :  { %v2403_v60 = vpack.c.bf16 %v2383_v31, %v2383_v31  ;;  %v2296_v31 = vsel %vm189_vm5, %v5309_v39, %v5337_v4 }
 0xa65   :  { %v2420_v16 = vsel %vm346_vm1, %v2403_v60, 0  ;;  %v2333_v60 = vsel %vm239_vm4, %v2329_v50, %v2323_v17  ;;  %v5721_v17 = vld [vmem:[#allocation3_spill] sm:$0xff] }
 0xa66   :  { %2444 = vmatpush.bf16.msra.mxu1 %v2420_v16 }
 0xa67   :  { %v5366_v8 = vpop.permute.xlu0 %2260 }
 0xa68   :  { %v2377_v47 = vpop.permute.xlu1 %2376  ;;  %v2265_v59 = vsel %vm147_vm7, %v5366_v8, %v5320_v32 }
 0xa69   :  { %v2378_v21 = vsel %vm302_vm0, %v2375_v44, %v2377_v47  ;;  %v2381_v40 = vsel %vm302_vm0, %v2377_v47, %v2371_v36  ;;  %v2266_v1 = vmul.f32 %v2265_v59, %v5683_v13 }
 0xa6a   :  { %v2384_v12 = vmul.f32 %v5129_v57, %v2378_v21  ;;  %v2385_v24 = vmul.f32 %v5099_v42, %v2381_v40  ;;  %v5722_v40 = vld [vmem:[#allocation5_spill] sm:$0xff] }
 0xa6b   :  { %v2386_v3 = vpack.c.bf16 %v2282_v22, %v2266_v1 }
 0xa6c   :  { %v2404_v43 = vpack.c.bf16 %v2384_v12, %v2384_v12  ;;  %v2405_v52 = vpack.c.bf16 %v2385_v24, %v2385_v24  ;;  %v5724_v24 = vld [vmem:[#allocation19_spill] sm:$0xff] }
 0xa6d   :  { %2435 = vmatpush.bf16.msrb.mxu3 %v2386_v3 }
 0xa6e   :  { %v2423_v36 = vsel %vm346_vm1, %v2404_v43, 0  ;;  %v2426_v13 = vsel %vm346_vm1, %v2405_v52, 0  ;;  %v5725_v52 = vld [vmem:[#allocation25_spill] sm:$0xff] }
 0xa6f   :  { %2457 = vmatpush.bf16.msra.mxu2 %v2423_v36  ;;  %v2343_v57 = vpop.permute.xlu0 %2342  ;;  %v5726_v36 = vld [vmem:[#allocation27_spill] sm:$0xff] }
 0xa70   :  { %v2345_v42 = vpop.permute.xlu1 %2344  ;;  %v2347_v53 = vsel %vm260_vm2, %v2341_v25, %v2343_v57  ;;  %2955 = vmatmul.msk.bf16.vlgmr.msrb.gmra.mxu3 %vm342_vm9, %v5383_v49  ;;  %v2312_v25 = vsel %vm210_vm6, %v2303_v6, %v5335_v48 }
 0xa71   :  { %2470 = vmatpush.bf16.msra.mxu3 %v2426_v13  ;;  %v2351_v19 = vmul.f32 %v2347_v53, %v5719_v62  ;;  %v2349_v44 = vsel %vm260_vm2, %v2345_v42, %v5307_v55  ;;  %v2346_v15 = vsel %vm260_vm2, %v2343_v57, %v2345_v42  ;;  %v2315_v38 = vmul.f32 %v2312_v25, %v5725_v52 }
 0xa72   :  { %v2353_v47 = vmul.f32 %v2349_v44, %v5720_v28  ;;  %v2352_v55 = vmul.f32 %v2346_v15, %v5682_v63  ;;  %v5723_v63 = vld [vmem:[#allocation21_spill] sm:$0xff]  ;;  %v2299_v13 = vmul.f32 %v2296_v31, %v5726_v36  ;;  %v2337_v57 = vmul.f32 %v2333_v60, %v5694_v30 }
 0xa73   :  { %v2399_v9 = vpack.c.bf16 %v2367_v11, %v2351_v19  ;;  %v2320_v42 = vmul.f32 %v5265_v56, %v5690_v41 }
 0xa74   :  { %v2391_v62 = vpack.c.bf16 %v2315_v38, %v2299_v13 }
 0xa75   :  { %2445 = vmatpush.bf16.msra.mxu1 %v2399_v9  ;;  %v5728_v9 = vld [vmem:[#allocation15_spill] sm:$0xff] }
 0xa77   :  { %v2361_v16 = vpop.permute.xlu0 %2360 }
 0xa78   :  { %v2327_v59 = vpop.permute.xlu1 %2326  ;;  %v2362_v61 = vsel %vm281_vm3, %v2359_v20, %v2361_v16  ;;  %v2365_v6 = vsel %vm281_vm3, %v2361_v16, %v5315_v2  ;;  %v2319_v20 = vmul.f32 %v5229_v58, %v5724_v24  ;;  %v2321_v58 = vmul.f32 %v5256_v54, %v5698_v0  ;;  %v5727_v54 = vld [vmem:[#allocation17_spill] sm:$0xff] }
 0xa79   :  { %v2330_v22 = vsel %vm239_vm4, %v2327_v59, %v2329_v50  ;;  %v2331_v39 = vsel %vm239_vm4, %v5327_v5, %v2327_v59  ;;  %v2368_v21 = vmul.f32 %v2362_v61, %v5721_v17  ;;  %v2369_v1 = vmul.f32 %v2365_v6, %v5722_v40 }
 0xa7a   :  { %v2335_v12 = vmul.f32 %v2331_v39, %v5723_v63  ;;  %v2336_v3 = vmul.f32 %v2330_v22, %v5688_v10  ;;  %v2397_v19 = vpack.c.bf16 %v2337_v57, %v2321_v58  ;;  %v2484_v22 = vld [vmem:[%s5529_s1 + $0x80] sm:$0x1] }
 0xa7b   :  { %v2400_v43 = vpack.c.bf16 %v2368_v21, %v2352_v55  ;;  %v2401_v2 = vpack.c.bf16 %v2369_v1, %v2353_v47 }
 0xa7c   :  { %v2395_v5 = vpack.c.bf16 %v2335_v12, %v2319_v20  ;;  %v2396_v10 = vpack.c.bf16 %v2336_v3, %v2320_v42 }
 0xa7d   :  { %2458 = vmatpush.bf16.msra.mxu2 %v2400_v43  ;;  %2471 = vmatpush.bf16.msra.mxu3 %v2401_v2 }
 0xa7e   :  { %2446 = vmatpush.bf16.msra.mxu1 %v2395_v5 }
 0xa7f   :  { %v2307_v53 = vpop.permute.xlu0 %2306 }
 0xa80   :  { %v2291_v29 = vpop.permute.xlu1 %2290  ;;  %v2310_v11 = vsel %vm210_vm6, %v2307_v53, %v5339_v14  ;;  %v2311_v30 = vsel %vm210_vm6, %v5335_v48, %v2307_v53  ;;  %v2259_v48 = vpop.permute.xlu2 %2258 }
 0xa81   :  { %v2294_v41 = vsel %vm189_vm5, %v2291_v29, %v5344_v26  ;;  %v2295_v0 = vsel %vm189_vm5, %v5337_v4, %v2291_v29  ;;  %v2316_v56 = vmul.f32 %v2311_v30, %v5727_v54  ;;  %v2317_v50 = vmul.f32 %v2310_v11, %v5728_v9  ;;  %2459 = vmatpush.bf16.msra.mxu2 %v2396_v10 }
 0xa82   :  { %v2300_v14 = vmul.f32 %v2295_v0, %v5697_v51  ;;  %v2301_v44 = vmul.f32 %v2294_v41, %v5704_v34  ;;  %2447 = vmatpush.bf16.msra.mxu1 %v2391_v62  ;;  %2472 = vmatpush.bf16.msra.mxu3 %v2397_v19  ;;  %v2264_v26 = vsel %vm147_vm7, %v5320_v32, %v5356_v35 }
 0xa83   :  { %v2263_v4 = vsel %vm147_vm7, %v5356_v35, %v2259_v48  ;;  %v2262_v51 = vsel %vm147_vm7, %v2259_v48, %v5366_v8  ;;  %v2267_v16 = vmul.f32 %v2264_v26, %v5684_v18  ;;  %v5729_v35 = vld [vmem:[#allocation31_spill] sm:$0xff] }
 0xa84   :  { %v2392_v15 = vpack.c.bf16 %v2316_v56, %v2300_v14  ;;  %v2393_v25 = vpack.c.bf16 %v2317_v50, %v2301_v44  ;;  %v2268_v55 = vmul.f32 %v2263_v4, %v5703_v33  ;;  %v2269_v8 = vmul.f32 %v2262_v51, %v5707_v45 }
 0xa86   :  { %2460 = vmatpush.bf16.msra.mxu2 %v2392_v15  ;;  %2473 = vmatpush.bf16.msra.mxu3 %v2393_v25 }
 0xa87   :  { %v2273_v34 = vpop.permute.xlu0 %2272 }
 0xa88   :  { %v2275_v31 = vpop.permute.xlu1 %2274  ;;  %v2280_v60 = vsel %vm168_vm8, %v5346_v37, %v2273_v34  ;;  %v2411_v7 = vpop.permute.xlu2 %2410 }
 0xa89   :  { %v2278_v32 = vsel %vm168_vm8, %v2275_v31, %v5354_v46  ;;  %v2279_v28 = vsel %vm168_vm8, %v2273_v34, %v2275_v31  ;;  %v2283_v47 = vmul.f32 %v2280_v60, %v5729_v35 }
 0xa8a   :  { %v2285_v59 = vmul.f32 %v2278_v32, %v5706_v23  ;;  %v2284_v61 = vmul.f32 %v2279_v28, %v5702_v27 }
 0xa8b   :  { %v2387_v37 = vpack.c.bf16 %v2283_v47, %v2267_v16 }
 0xa8c   :  { %v2388_v6 = vpack.c.bf16 %v2284_v61, %v2268_v55  ;;  %v2389_v18 = vpack.c.bf16 %v2285_v59, %v2269_v8 }
 0xa8d   :  { %2448 = vmatpush.bf16.msra.mxu1 %v2387_v37 }
 0xa8e   :  { %2461 = vmatpush.bf16.msra.mxu2 %v2388_v6  ;;  %2474 = vmatpush.bf16.msra.mxu3 %v2389_v18 }
 0xa8f   :  { %v2493_v53 = vpop.permute.xlu0 %2492 }
 0xa90   :  { %2956 = vmatmul.msk.bf16.vlgmr.msra.gmra.mxu1 %vm342_vm9, %v5383_v49 }
 0xa91   :  { %2957 = vmatmul.msk.bf16.vlgmr.msra.gmra.mxu2 %vm342_vm9, %v5383_v49  ;;  %2958 = vmatmul.msk.bf16.vlgmr.msra.gmra.mxu3 %vm342_vm9, %v5383_v49 }
 0xaf3   :  { %v2437_v33 = vpop.f32.mrf.mxu3 }
 0xaf4   :  { %v2438_v23 = vadd.f32 %v2437_v33, %v2411_v7 }
 0xaf6   :  { %v2480_v45 = vmax.f32 %v2438_v23, 0.0 }
 0xaf8   :  { %v2486_v27 = vpack.c.bf16 %v2480_v45, %v2480_v45 }
 0xafa   :  { %v2499_v46 = vsel %vm346_vm1, %v2486_v27, 0 }
 0xafb   :  { %2517 = vmatpush.bf16.msra.mxu0 %v2499_v46  ;;  %v2439_v39 = vpop.f32.mrf.mxu3 }
 0xafe   :  { %2959 = vmatmul.msk.bf16.vlgmr.msra.gmra.mxu0 %vm1580_vm11, %v2484_v22 }
 0xb0d   :  { %v2450_v17 = vpop.f32.mrf.mxu1 }
 0xb0e   :  { %v2451_v21 = vadd.f32 %v2450_v17, %v2411_v7 }
 0xb10   :  { %v2481_v40 = vmax.f32 %v2451_v21, 0.0 }
 0xb12   :  { %v2487_v1 = vpack.c.bf16 %v2481_v40, %v2481_v40 }
 0xb14   :  { %v2463_v49 = vpop.f32.mrf.mxu2  ;;  %v2476_v63 = vpop.f32.mrf.mxu3  ;;  %v2502_v12 = vsel %vm346_vm1, %v2487_v1, 0 }
 0xb15   :  { %v2464_v24 = vadd.f32 %v2463_v49, %v2411_v7  ;;  %v2477_v20 = vadd.f32 %v2476_v63, %v2411_v7  ;;  %2530 = vmatpush.bf16.msrb.mxu1 %v2502_v12  ;;  %v2452_v3 = vpop.f32.mrf.mxu1 }
 0xb17   :  { %v2482_v43 = vmax.f32 %v2464_v24, 0.0  ;;  %v2483_v2 = vmax.f32 %v2477_v20, 0.0 }
 0xb18   :  { %2960 = vmatmul.msk.bf16.vlgmr.msrb.gmra.mxu1 %vm1580_vm11, %v2484_v22 }
 0xb19   :  { %v2488_v52 = vpack.c.bf16 %v2482_v43, %v2482_v43  ;;  %v2489_v38 = vpack.c.bf16 %v2483_v2, %v2483_v2 }
 0xb1b   :  { %v2505_v36 = vsel %vm346_vm1, %v2488_v52, 0  ;;  %v2508_v13 = vsel %vm346_vm1, %v2489_v38, 0 }
 0xb1c   :  { %v2465_v57 = vpop.f32.mrf.mxu2  ;;  %v2478_v5 = vpop.f32.mrf.mxu3  ;;  %2543 = vmatpush.bf16.msrb.mxu2 %v2505_v36  ;;  %2556 = vmatpush.bf16.msrb.mxu3 %v2508_v13 }
 0xb1f   :  { %2961 = vmatmul.msk.bf16.vlgmr.msrb.gmra.mxu2 %vm1580_vm11, %v2484_v22  ;;  %2962 = vmatmul.msk.bf16.vlgmr.msrb.gmra.mxu3 %vm1580_vm11, %v2484_v22  ;;  %vm2645_vm11 = vcmask 1040384  }
 0xb7b   :  { %v2519_v42 = vpop.f32.mrf.mxu0 }
 0xb7c   :  { %v2520_v10 = vadd.f32 %v2519_v42, %v2493_v53 }
 0xb7e   :  { %v2963_v29 = vmul.f32 -1.442695, %v2520_v10 }
 0xb80   :  { %3058 = vpow2.f32 %v2963_v29 }
 0xb83   :  { %v2521_v58 = vpop.f32.mrf.mxu0 }
 0xb86   :  { %v3059_v41 = vpop.eup %3058 }
 0xb87   :  { %v5491_v54 = vadd.f32 1.0, %v3059_v41 }
 0xb89   :  { %vm2583_vm13 = vweird.f32 %v5491_v54  ;;  %v2589_v45 = vand.u32 2147483648, %v5491_v54  ;;  %v2587_v20 = vand.u32 2147483647, %v5491_v54 }
 0xb8b   :  { %v2590_v2 = vor.u32 1.1754944e-38, %v2589_v45 }
 0xb95   :  { %v2532_v11 = vpop.f32.mrf.mxu1 }
 0xb96   :  { %v2533_v30 = vadd.f32 %v2532_v11, %v2493_v53 }
 0xb98   :  { %v2964_v62 = vmul.f32 -1.442695, %v2533_v30  ;;  %v5734_v30 = vlaneseq }
 0xb9a   :  { %3060 = vpow2.f32 %v2964_v62 }
 0xb9d   :  { %v2534_v19 = vpop.f32.mrf.mxu1 }
 0xba0   :  { %v3061_v0 = vpop.eup %3060 }
 0xba1   :  { %v2575_v56 = vadd.f32 1.0, %v3061_v0 }
 0xba2   :  { %v2545_v9 = vpop.f32.mrf.mxu2  ;;  %v2558_v50 = vpop.f32.mrf.mxu3 }
 0xba3   :  { %3062 = vrcp.f32 %v2575_v56  ;;  %v2546_v14 = vadd.f32 %v2545_v9, %v2493_v53  ;;  %v2559_v44 = vadd.f32 %v2558_v50, %v2493_v53  ;;  %v2604_v37 = vand.u32 2147483648, %v2575_v56 }
 0xba4   :  { %3064 = vrcp.f32 %v5491_v54  ;;  %vm2598_vm14 = vweird.f32 %v2575_v56  ;;  %v2602_v7 = vand.u32 2147483647, %v2575_v56 }
 0xba5   :  { %v2965_v48 = vmul.f32 -1.442695, %v2546_v14  ;;  %v2966_v15 = vmul.f32 -1.442695, %v2559_v44  ;;  %v2605_v39 = vor.u32 1.1754944e-38, %v2604_v37 }
 0xba6   :  { %vm2603_vm2 = vcmp.eq.f32.partialorder %v2602_v7, 8.507059e+37 }
 0xba7   :  { %3066 = vpow2.f32 %v2965_v48 }
 0xba8   :  { %3068 = vpow2.f32 %v2966_v15 }
 0xba9   :  { %v3063_v25 = vpop.eup %3062 }
 0xbaa   :  { %v2547_v26 = vpop.f32.mrf.mxu2  ;;  %v2560_v4 = vpop.f32.mrf.mxu3  ;;  %v2594_v34 = vmul.f32 %v3063_v25, %v2575_v56  ;;  %vm2599_vm12 = vweird.f32 %v3063_v25 }
 0xbab   :  { %v5494_v51 = vpop.eup %3064  ;;  %vm5503_vm0 = vmor %vm2598_vm14, %vm2599_vm12  ;;  %vm2647_vm12 = vcmask 1042434   ;;  %vm2649_vm14 = vcmask 1041408  }
 0xbac   :  { %v2579_v60 = vmul.f32 %v5494_v51, %v5491_v54  ;;  %v2595_v32 = vsub.f32 1.0, %v2594_v34  ;;  %vm2584_vm15 = vweird.f32 %v5494_v51 }
 0xbad   :  { %v3067_v31 = vpop.eup %3066  ;;  %vm5513_vm4 = vmor %vm2583_vm13, %vm2584_vm15  ;;  %vm2588_vm13 = vcmp.eq.f32.partialorder %v2587_v20, 8.507059e+37  ;;  %vm2654_vm15 = vcmp.lt.s32.totalorder %v5734_v30, 512 }
 0xbae   :  { %v3069_v16 = vpop.eup %3068  ;;  %v2576_v28 = vadd.f32 1.0, %v3067_v31  ;;  %v2580_v47 = vsub.f32 1.0, %v2579_v60  ;;  %v2596_v55 = vmul.f32 %v3063_v25, %v2595_v32 }
 0xbaf   :  { %v2577_v35 = vadd.f32 1.0, %v3069_v16 }
 0xbb0   :  { %3070 = vrcp.f32 %v2576_v28  ;;  %v2581_v8 = vmul.f32 %v5494_v51, %v2580_v47  ;;  %v2597_v61 = vadd.f32 %v3063_v25, %v2596_v55  ;;  %v2619_v17 = vand.u32 2147483648, %v2576_v28 }
 0xbb1   :  { %3072 = vrcp.f32 %v2577_v35  ;;  %v2617_v1 = vand.u32 2147483647, %v2576_v28  ;;  %v2634_v49 = vand.u32 2147483648, %v2577_v35  ;;  %v2632_v12 = vand.u32 2147483647, %v2577_v35 }
 0xbb2   :  { %v2582_v23 = vadd.f32 %v5494_v51, %v2581_v8  ;;  %v2601_v22 = vsel %vm5503_vm0, %v3063_v25, %v2597_v61  ;;  %vm2613_vm5 = vweird.f32 %v2576_v28  ;;  %v2620_v52 = vor.u32 1.1754944e-38, %v2619_v17 }
 0xbb3   :  { %v2606_v3 = vsel %vm2603_vm2, %v2605_v39, %v2601_v22  ;;  %vm2628_vm7 = vweird.f32 %v2577_v35  ;;  %vm2618_vm8 = vcmp.eq.f32.partialorder %v2617_v1, 8.507059e+37  ;;  %v2635_v57 = vor.u32 1.1754944e-38, %v2634_v49 }
 0xbb4   :  { %v2586_v36 = vsel %vm5513_vm4, %v5494_v51, %v2582_v23  ;;  %v2642_v5 = vrot.slane %v2606_v3, 7  ;;  %vm2633_vm10 = vcmp.eq.f32.partialorder %v2632_v12, 8.507059e+37 }
 0xbb5   :  { %v2591_v11 = vsel %vm2588_vm13, %v2590_v2, %v2586_v36 }
 0xbb6   :  { %v3071_v59 = vpop.eup %3070  ;;  %v2646_v62 = vsel %vm2645_vm11, %v2591_v11, %v2642_v5 }
 0xbb7   :  { %v3073_v6 = vpop.eup %3072  ;;  %v2609_v18 = vmul.f32 %v3071_v59, %v2576_v28  ;;  %vm2614_vm1 = vweird.f32 %v3071_v59 }
 0xbb8   :  { %v2624_v33 = vmul.f32 %v3073_v6, %v2577_v35  ;;  %vm2629_vm3 = vweird.f32 %v3073_v6  ;;  %vm2615_vm6 = vmor %vm2613_vm5, %vm2614_vm1 }
 0xbb9   :  { %v2610_v46 = vsub.f32 1.0, %v2609_v18  ;;  %vm2630_vm9 = vmor %vm2628_vm7, %vm2629_vm3 }
 0xbba   :  { %v2625_v21 = vsub.f32 1.0, %v2624_v33 }
 0xbbb   :  { %v2611_v40 = vmul.f32 %v3071_v59, %v2610_v46 }
 0xbbc   :  { %v2626_v63 = vmul.f32 %v3073_v6, %v2625_v21 }
 0xbbd   :  { %v2612_v43 = vadd.f32 %v3071_v59, %v2611_v40 }
 0xbbe   :  { %v2627_v38 = vadd.f32 %v3073_v6, %v2626_v63 }
 0xbbf   :  { %v2616_v13 = vsel %vm2615_vm6, %v3071_v59, %v2612_v43 }
 0xbc0   :  { %v2621_v42 = vsel %vm2618_vm8, %v2620_v52, %v2616_v13  ;;  %v2631_v58 = vsel %vm2630_vm9, %v3073_v6, %v2627_v38 }
 0xbc1   :  { %v2643_v53 = vrot.slane %v2621_v42, 6  ;;  %v2636_v10 = vsel %vm2633_vm10, %v2635_v57, %v2631_v58 }
 0xbc2   :  { %v2644_v29 = vrot.slane %v2636_v10, 5 }
 0xbc4   :  { %v2648_v19 = vsel %vm2647_vm12, %v2643_v53, %v2644_v29 }
 0xbc5   :  { %v2650_v41 = vsel %vm2649_vm14, %v2646_v62, %v2648_v19 }
 0xbc6   :  { %2656 = vst.msk [vmem:[%s5533_s7] sm:$0xf] %vm2654_vm15, %v2650_v41 }

</bundles_post_ra>
